<compile_context>
chip_gen: v6e
topology: v6e:2x2x1
jax: 0.10.0
libtpu: 0.0.40
codegen_flags: <defaults>
</compile_context>

<pallas_src>
import jax
import jax.numpy as jnp
from jax.experimental import pallas as pl
from jax.experimental.pallas import tpu as pltpu

# ----- model hyperparameters (from the PyTorch source) -----
N_EMBD = 64 * 4          # 256
BLOCK_SIZE = 256
VOCAB_SIZE = 10000
N_HEAD = 4
HEAD_SIZE = N_EMBD // N_HEAD
N_LAYER = 4
FF_DIM = 4 * N_EMBD
LN_EPS = 1e-5

# lm_head tiling (could grow to V_TILE=4096 / ROW_TILE=512 on v5e/v6e's 128 MiB VMEM)
V_TILE = 2048                                                 # lane-dense vocab tile
VOCAB_PAD = ((VOCAB_SIZE + V_TILE - 1) // V_TILE) * V_TILE    # 10240 = 80 * 128
ROW_TILE = 256                                                # (B*T) row tile


def _layernorm(x, gamma, beta):
    mean = jnp.mean(x, axis=-1, keepdims=True)
    var = jnp.mean(jnp.square(x - mean), axis=-1, keepdims=True)
    return (x - mean) * jax.lax.rsqrt(var + LN_EPS) * gamma + beta


# ---------------------------------------------------------------------------
# Pallas kernel: ALL transformer blocks + final LayerNorm fused.
# grid = (B, N_LAYER): batch outer ("parallel"), layer inner ("arbitrary").
# The residual stream for one batch element lives in the resident output block;
# the big per-layer weights are DMA'd once (constant index_map) and indexed by l.
# ---------------------------------------------------------------------------
def _fused_blocks_kernel(x_ref, mask_ref,
                         ln1g_ref, ln1b_ref,
                         wqkv_ref, wproj_ref, bproj_ref,
                         ln2g_ref, ln2b_ref,
                         w1_ref, b1_ref, w2_ref, b2_ref,
                         lnfg_ref, lnfb_ref,
                         o_ref):
    l = pl.program_id(1)
    C, HS = N_EMBD, HEAD_SIZE

    # Residual stream: seeded from the (tok+pos) embedding block at layer 0,
    # otherwise carried in the VMEM-resident output block (no store->reload).
    x = jnp.where(l == 0, x_ref[0], o_ref[0])                       # (T, C) f32

    # ---- multi-head self attention on LN1(x) ----
    xn = _layernorm(x, ln1g_ref[0, 0], ln1b_ref[0, 0])
    # Fused Q/K/V projection: one full-width bf16 matmul, f32 accumulation.
    qkv = jnp.dot(xn.astype(jnp.bfloat16), wqkv_ref[l],
                  preferred_element_type=jnp.float32)               # (T, 3C) f32

    scale = float(N_EMBD) ** -0.5   # reference quirk: scales by n_embd, not head_size
    mask = mask_ref[...]            # (T, T) additive bias: 0 where allowed, -1e30 else

    heads = []
    for h in range(N_HEAD):         # static unroll over 4 heads
        qh = qkv[:, h * HS:(h + 1) * HS]
        kh = qkv[:, C + h * HS:C + (h + 1) * HS]
        vh = qkv[:, 2 * C + h * HS:2 * C + (h + 1) * HS]
        # q @ k^T without materializing a transpose (contract dim 1 with dim 1).
        wei = jax.lax.dot_general(qh, kh, (((1,), (1,)), ((), ())),
                                  preferred_element_type=jnp.float32) * scale + mask
        wei = wei - jnp.max(wei, axis=-1, keepdims=True)
        e = jnp.exp(wei)
        p = e * pl.reciprocal(jnp.sum(e, axis=-1, keepdims=True), approx=True)
        heads.append(jnp.dot(p.astype(jnp.bfloat16), vh.astype(jnp.bfloat16),
                             preferred_element_type=jnp.float32))   # (T, HS)
    # Assemble heads (XLU slot) so the output projection is one full-width dot.
    sa = jnp.concatenate(heads, axis=-1)                            # (T, C)
    sa = jnp.dot(sa.astype(jnp.bfloat16), wproj_ref[l],
                 preferred_element_type=jnp.float32) + bproj_ref[0, 0]
    x = x + sa

    # ---- feed-forward on LN2(x) ----
    xn2 = _layernorm(x, ln2g_ref[0, 0], ln2b_ref[0, 0])
    h1 = jnp.dot(xn2.astype(jnp.bfloat16), w1_ref[l],
                 preferred_element_type=jnp.float32) + b1_ref[0, 0]
    h1 = jnp.maximum(h1, 0.0)
    ff = jnp.dot(h1.astype(jnp.bfloat16), w2_ref[l],
                 preferred_element_type=jnp.float32) + b2_ref[0, 0]
    y = x + ff

    # ---- write residual back; fold the final LayerNorm into the last layer ----
    @pl.when(l == N_LAYER - 1)
    def _():
        o_ref[0] = _layernorm(y, lnfg_ref[0], lnfb_ref[0])

    @pl.when(l != N_LAYER - 1)
    def _():
        o_ref[0] = y


def transformer_blocks(x, bp, lnf_g, lnf_b, mask):
    """Run all N_LAYER blocks + final LN in one pallas_call. x: (B, T, C) float32."""
    B, T, C = x.shape
    L, F = N_LAYER, FF_DIM

    # Per-layer vectors as (L, 1, dim) so per-step blocks are tiny (1, 1, dim).
    ln1g = bp["ln1_g"].reshape(L, 1, C)
    ln1b = bp["ln1_b"].reshape(L, 1, C)
    bproj = bp["bproj"].reshape(L, 1, C)
    ln2g = bp["ln2_g"].reshape(L, 1, C)
    ln2b = bp["ln2_b"].reshape(L, 1, C)
    b1 = bp["b1"].reshape(L, 1, F)
    b2 = bp["b2"].reshape(L, 1, C)

    vec_c = pl.BlockSpec((1, 1, C), lambda b, l: (l, 0, 0))
    vec_f = pl.BlockSpec((1, 1, F), lambda b, l: (l, 0, 0))
    # Big weights: full-L blocks with constant index maps -> DMA'd once and VMEM
    # resident across the whole (B, L) grid; indexed by l inside the kernel.
    resident = lambda shape: pl.BlockSpec(shape, lambda b, l: (0, 0, 0))

    return pl.pallas_call(
        _fused_blocks_kernel,
        out_shape=jax.ShapeDtypeStruct((B, T, C), jnp.float32),
        grid_spec=pltpu.PrefetchScalarGridSpec(
            num_scalar_prefetch=0,
            grid=(B, L),                                        # batch outer, layer inner
            in_specs=[
                pl.BlockSpec((1, T, C), lambda b, l: (b, 0, 0)),    # x (tok+pos emb)
                pl.BlockSpec((T, T), lambda b, l: (0, 0)),          # causal mask bias
                vec_c, vec_c,                                       # ln1 gamma/beta
                resident((L, C, 3 * C)),                            # Wqkv (bf16)
                resident((L, C, C)),                                # Wproj (bf16)
                vec_c,                                              # bproj
                vec_c, vec_c,                                       # ln2 gamma/beta
                resident((L, C, F)),                                # W1 (bf16)
                vec_f,                                              # b1
                resident((L, F, C)),                                # W2 (bf16)
                vec_c,                                              # b2
                pl.BlockSpec((1, C), lambda b, l: (0, 0)),          # lnf gamma
                pl.BlockSpec((1, C), lambda b, l: (0, 0)),          # lnf beta
            ],
            out_specs=pl.BlockSpec((1, T, C), lambda b, l: (b, 0, 0)),
        ),
        compiler_params=pltpu.CompilerParams(
            dimension_semantics=("parallel", "arbitrary"),
            # ~6 MB bf16 resident weights (x2 double-buffering) + activation blocks
            # + kernel scratch: ~20 MB peak.  40 MiB is valid on v5e/v6e/v7x
            # (< 64 MiB physical per-TC on v7x) and lifts v5e's 16 MiB default.
            vmem_limit_bytes=40 * 1024 * 1024),
        input_output_aliases={0: 0},        # residual stream written back in place
    )(x, mask, ln1g, ln1b, bp["wqkv"], bp["wproj"], bproj,
      ln2g, ln2b, bp["w1"], b1, bp["w2"], b2, lnf_g, lnf_b)


# ---------------------------------------------------------------------------
# Pallas kernel: lm_head projection (pure matmul + bias), tiled over (vocab, rows).
# The final LayerNorm was already applied by the fused block kernel.
# ---------------------------------------------------------------------------
def _head_kernel(x_ref, w_ref, b_ref, o_ref):
    o_ref[...] = (jnp.dot(x_ref[...].astype(jnp.bfloat16), w_ref[...],
                          preferred_element_type=jnp.float32) + b_ref[0])


def lm_head(x, w, b):
    """x: (B, T, C) f32 (already lnf'd); w: (C, VOCAB_PAD) bf16 -> (B, T, VOCAB_PAD)."""
    B, T, C = x.shape
    Vp = w.shape[1]
    M = B * T
    tm = ROW_TILE if M >= ROW_TILE else max(8, ((M + 7) // 8) * 8)
    m_pad = ((M + tm - 1) // tm) * tm

    x2 = x.reshape(M, C)
    if m_pad != M:
        x2 = jnp.pad(x2, ((0, m_pad - M), (0, 0)))
    b2d = b.reshape(1, Vp)

    # TODO(synk): int8/fp8 head-weight quantization (review suggestion for v5e/v6e)
    #             is a further optional step; bf16 is used here for all chips.
    out = pl.pallas_call(
        _head_kernel,
        out_shape=jax.ShapeDtypeStruct((m_pad, Vp), jnp.float32),
        grid_spec=pltpu.PrefetchScalarGridSpec(
            num_scalar_prefetch=0,
            # vocab axis outer -> each 1 MB bf16 weight tile is loaded once and
            # stays resident while row tiles stream.
            grid=(Vp // V_TILE, m_pad // tm),
            in_specs=[
                pl.BlockSpec((tm, C), lambda j, i: (i, 0)),        # activations
                pl.BlockSpec((C, V_TILE), lambda j, i: (0, j)),    # W_head tile (bf16)
                pl.BlockSpec((1, V_TILE), lambda j, i: (0, j)),    # b_head tile
            ],
            out_specs=pl.BlockSpec((tm, V_TILE), lambda j, i: (i, j)),
        ),
        compiler_params=pltpu.CompilerParams(
            dimension_semantics=("parallel", "parallel")),
    )(x2, w, b2d)
    return out[:M].reshape(B, T, Vp)


# ---------------------------------------------------------------------------
# Parameter construction (deterministic, synthetic weights).
# ---------------------------------------------------------------------------
def init_params(key):
    keys = iter(jax.random.split(key, 8))
    nrm = lambda shape, s=0.02: (s * jax.random.normal(next(keys), shape)
                                 ).astype(jnp.float32)
    L, C, F = N_LAYER, N_EMBD, FF_DIM
    blocks = {
        "ln1_g": jnp.ones((L, C), jnp.float32),
        "ln1_b": jnp.zeros((L, C), jnp.float32),
        # wqkv[l] = [Wq | Wk | Wv] columns; columns h*HS:(h+1)*HS of the Wq slab are
        # layer l / head h's query.weight.T (same for key/value).  bf16 storage.
        "wqkv": nrm((L, C, 3 * C)).astype(jnp.bfloat16),
        # proj.weight.T per layer (heads concatenated along the input rows).
        "wproj": nrm((L, C, C)).astype(jnp.bfloat16),
        "bproj": jnp.zeros((L, C), jnp.float32),
        "ln2_g": jnp.ones((L, C), jnp.float32),
        "ln2_b": jnp.zeros((L, C), jnp.float32),
        "w1": nrm((L, C, F)).astype(jnp.bfloat16),
        "b1": jnp.zeros((L, F), jnp.float32),
        "w2": nrm((L, F, C)).astype(jnp.bfloat16),
        "b2": jnp.zeros((L, C), jnp.float32),
    }
    # lm_head weight padded once to the vocab tile boundary (10000 -> 10240);
    # padded logit columns are zero and sliced off in the forward pass.
    w_head = jnp.zeros((C, VOCAB_PAD), jnp.float32)
    w_head = w_head.at[:, :VOCAB_SIZE].set(nrm((C, VOCAB_SIZE)))
    return {
        "tok_emb": nrm((VOCAB_SIZE, C)),
        "pos_emb": nrm((BLOCK_SIZE, C)),
        "blocks": blocks,
        "lnf_g": jnp.ones((1, C), jnp.float32),
        "lnf_b": jnp.zeros((1, C), jnp.float32),
        "w_head": w_head.astype(jnp.bfloat16),
        "b_head": jnp.zeros((VOCAB_PAD,), jnp.float32),
    }


@jax.jit
def bigram_lm_forward(idx, params):
    """idx: [B, T] int32 token ids -> logits [B, T, VOCAB_SIZE] (targets=None path)."""
    B, T = idx.shape
    # Embedding gathers are data-dependent; kept in plain JAX (glue).
    tok_emb = jnp.take(params["tok_emb"], idx, axis=0)              # (B, T, C)
    pos_emb = params["pos_emb"][:T]                                 # (T, C)
    x = tok_emb + pos_emb[None, :, :]
    # Additive causal-mask bias built once per forward (loaded once by the kernel).
    row = jax.lax.broadcasted_iota(jnp.int32, (T, T), 0)
    col = jax.lax.broadcasted_iota(jnp.int32, (T, T), 1)
    mask = jnp.where(col <= row, 0.0, -1e30).astype(jnp.float32)
    x = transformer_blocks(x, params["blocks"], params["lnf_g"], params["lnf_b"], mask)
    logits = lm_head(x, params["w_head"], params["b_head"])
    return logits[..., :VOCAB_SIZE]                                 # drop vocab padding


if __name__ == "__main__":
    key = jax.random.PRNGKey(0)
    pkey, ikey = jax.random.split(key)
    params = init_params(pkey)

    B, T = 2, 8
    idx = jax.random.randint(ikey, (B, T), 0, VOCAB_SIZE, dtype=jnp.int32)

    logits = bigram_lm_forward(idx, params)
    jax.block_until_ready(logits)

    assert logits.shape == (B, T, VOCAB_SIZE)
    assert logits.dtype == jnp.float32
    assert bool(jnp.all(jnp.isfinite(logits)))
    print("KERNEL_OK")
</pallas_src>

<mosaic_0001>
module attributes {stable_mosaic.version = 11 : i64} {
  func.func @_head_kernel(%arg0: i32, %arg1: i32, %arg2: memref<16x256xf32, #tpu.memory_space<vmem>>, %arg3: memref<256x2048xbf16, #tpu.memory_space<vmem>>, %arg4: memref<1x2048xf32, #tpu.memory_space<vmem>>, %arg5: memref<16x2048xf32, #tpu.memory_space<vmem>>) attributes {dimension_semantics = [#tpu.dimension_semantics<parallel>, #tpu.dimension_semantics<parallel>], iteration_bounds = array<i64: 5, 1>, scalar_prefetch = 0 : i64, scratch_operands = 0 : i64, tpu.core_type = #tpu.core_type<tc>, window_params = [{transform_indices = @transform_0, window_bounds = array<i64: 16, 256>}, {transform_indices = @transform_1, window_bounds = array<i64: 256, 2048>}, {transform_indices = @transform_2, window_bounds = array<i64: 1, 2048>}, {transform_indices = @transform_3, window_bounds = array<i64: 16, 2048>}]} {
    %c0 = arith.constant 0 : index
    %c0_0 = arith.constant 0 : index
    %0 = vector.load %arg2[%c0, %c0_0] : memref<16x256xf32, #tpu.memory_space<vmem>>, vector<16x256xf32>
    %1 = arith.truncf %0 : vector<16x256xf32> to vector<16x256xbf16>
    %c0_1 = arith.constant 0 : index
    %c0_2 = arith.constant 0 : index
    %2 = vector.load %arg3[%c0_1, %c0_2] : memref<256x2048xbf16, #tpu.memory_space<vmem>>, vector<256x2048xbf16>
    %cst = arith.constant dense<0.000000e+00> : vector<16x2048xf32>
    %3 = tpu.matmul %1, %2, %cst {dimension_numbers = #tpu.dot_dimension_numbers<[1], [0], [0], [1], [0, 0, 1, 1], [], []>} : vector<16x256xbf16>, vector<256x2048xbf16>, vector<16x2048xf32> -> vector<16x2048xf32>
    %c0_3 = arith.constant 0 : index
    %c0_4 = arith.constant 0 : index
    %4 = vector.load %arg4[%c0_3, %c0_4] : memref<1x2048xf32, #tpu.memory_space<vmem>>, vector<1x2048xf32>
    %5 = vector.shape_cast %4 : vector<1x2048xf32> to vector<2048xf32>
    %6 = vector.shape_cast %5 : vector<2048xf32> to vector<1x2048xf32>
    %7 = vector.broadcast %6 : vector<1x2048xf32> to vector<16x2048xf32>
    %8 = arith.addf %3, %7 : vector<16x2048xf32>
    %c0_5 = arith.constant 0 : index
    %c0_6 = arith.constant 0 : index
    %9 = vector.load %arg5[%c0_5, %c0_6] : memref<16x2048xf32, #tpu.memory_space<vmem>>, vector<16x2048xf32>
    tpu.vector_store %arg5[%c0_5, %c0_6], %8 {strides = array<i32>} : memref<16x2048xf32, #tpu.memory_space<vmem>>, vector<16x2048xf32>,
    return
  }
  func.func @transform_0(%arg0: i32, %arg1: i32) -> (i32, i32) {
    %c0_i32 = arith.constant 0 : i32
    %c0_i32_0 = arith.constant 0 : i32
    return %arg1, %c0_i32 : i32, i32
  }
  func.func @transform_1(%arg0: i32, %arg1: i32) -> (i32, i32) {
    %c0_i32 = arith.constant 0 : i32
    %c0_i32_0 = arith.constant 0 : i32
    return %c0_i32, %arg0 : i32, i32
  }
  func.func @transform_2(%arg0: i32, %arg1: i32) -> (i32, i32) {
    %c0_i32 = arith.constant 0 : i32
    %c0_i32_0 = arith.constant 0 : i32
    return %c0_i32, %arg0 : i32, i32
  }
  func.func @transform_3(%arg0: i32, %arg1: i32) -> (i32, i32) {
    %c0_i32 = arith.constant 0 : i32
    return %arg1, %arg0 : i32, i32
  }
}

module attributes {stable_mosaic.version = 11 : i64} {
  func.func @_fused_blocks_kernel(%arg0: i32, %arg1: i32, %arg2: memref<1x8x256xf32, #tpu.memory_space<vmem>>, %arg3: memref<8x8xf32, #tpu.memory_space<vmem>>, %arg4: memref<1x1x256xf32, #tpu.memory_space<vmem>>, %arg5: memref<1x1x256xf32, #tpu.memory_space<vmem>>, %arg6: memref<4x256x768xbf16, #tpu.memory_space<vmem>>, %arg7: memref<4x256x256xbf16, #tpu.memory_space<vmem>>, %arg8: memref<1x1x256xf32, #tpu.memory_space<vmem>>, %arg9: memref<1x1x256xf32, #tpu.memory_space<vmem>>, %arg10: memref<1x1x256xf32, #tpu.memory_space<vmem>>, %arg11: memref<4x256x1024xbf16, #tpu.memory_space<vmem>>, %arg12: memref<1x1x1024xf32, #tpu.memory_space<vmem>>, %arg13: memref<4x1024x256xbf16, #tpu.memory_space<vmem>>, %arg14: memref<1x1x256xf32, #tpu.memory_space<vmem>>, %arg15: memref<1x256xf32, #tpu.memory_space<vmem>>, %arg16: memref<1x256xf32, #tpu.memory_space<vmem>>, %arg17: memref<1x8x256xf32, #tpu.memory_space<vmem>>) attributes {dimension_semantics = [#tpu.dimension_semantics<parallel>, #tpu.dimension_semantics<arbitrary>], iteration_bounds = array<i64: 2, 4>, scalar_prefetch = 0 : i64, scratch_operands = 0 : i64, tpu.core_type = #tpu.core_type<tc>, window_params = [{transform_indices = @transform_0, window_bounds = array<i64: 1, 8, 256>}, {pipeline_mode = #tpu.pipeline_mode<synchronous>, transform_indices = @transform_1, window_bounds = array<i64: 8, 8>}, {transform_indices = @transform_2, window_bounds = array<i64: 1, 1, 256>}, {transform_indices = @transform_3, window_bounds = array<i64: 1, 1, 256>}, {pipeline_mode = #tpu.pipeline_mode<synchronous>, transform_indices = @transform_4, window_bounds = array<i64: 4, 256, 768>}, {pipeline_mode = #tpu.pipeline_mode<synchronous>, transform_indices = @transform_5, window_bounds = array<i64: 4, 256, 256>}, {transform_indices = @transform_6, window_bounds = array<i64: 1, 1, 256>}, {transform_indices = @transform_7, window_bounds = array<i64: 1, 1, 256>}, {transform_indices = @transform_8, window_bounds = array<i64: 1, 1, 256>}, {pipeline_mode = #tpu.pipeline_mode<synchronous>, transform_indices = @transform_9, window_bounds = array<i64: 4, 256, 1024>}, {transform_indices = @transform_10, window_bounds = array<i64: 1, 1, 1024>}, {pipeline_mode = #tpu.pipeline_mode<synchronous>, transform_indices = @transform_11, window_bounds = array<i64: 4, 1024, 256>}, {transform_indices = @transform_12, window_bounds = array<i64: 1, 1, 256>}, {pipeline_mode = #tpu.pipeline_mode<synchronous>, transform_indices = @transform_13, window_bounds = array<i64: 1, 256>}, {pipeline_mode = #tpu.pipeline_mode<synchronous>, transform_indices = @transform_14, window_bounds = array<i64: 1, 256>}, {transform_indices = @transform_15, window_bounds = array<i64: 1, 8, 256>}]} {
    %c0_i32 = arith.constant 0 : i32
    %0 = arith.cmpi eq, %arg1, %c0_i32 : i32
    %c0 = arith.constant 0 : index
    %c0_0 = arith.constant 0 : index
    %c0_1 = arith.constant 0 : index
    %1 = vector.load %arg2[%c0, %c0_0, %c0_1] : memref<1x8x256xf32, #tpu.memory_space<vmem>>, vector<1x8x256xf32>
    %2 = vector.shape_cast %1 : vector<1x8x256xf32> to vector<8x256xf32>
    %c0_2 = arith.constant 0 : index
    %c0_3 = arith.constant 0 : index
    %c0_4 = arith.constant 0 : index
    %3 = vector.load %arg17[%c0_2, %c0_3, %c0_4] : memref<1x8x256xf32, #tpu.memory_space<vmem>>, vector<1x8x256xf32>
    %4 = vector.shape_cast %3 : vector<1x8x256xf32> to vector<8x256xf32>
    %5 = arith.select %0, %2, %4 : vector<8x256xf32>
    %c0_5 = arith.constant 0 : index
    %c0_6 = arith.constant 0 : index
    %c0_7 = arith.constant 0 : index
    %6 = vector.load %arg4[%c0_5, %c0_6, %c0_7] : memref<1x1x256xf32, #tpu.memory_space<vmem>>, vector<1x1x256xf32>
    %7 = vector.shape_cast %6 : vector<1x1x256xf32> to vector<256xf32>
    %c0_8 = arith.constant 0 : index
    %c0_9 = arith.constant 0 : index
    %c0_10 = arith.constant 0 : index
    %8 = vector.load %arg5[%c0_8, %c0_9, %c0_10] : memref<1x1x256xf32, #tpu.memory_space<vmem>>, vector<1x1x256xf32>
    %9 = vector.shape_cast %8 : vector<1x1x256xf32> to vector<256xf32>
    %cst = arith.constant dense<0.000000e+00> : vector<8xf32>
    %10 = vector.multi_reduction <add>, %5, %cst [1] : vector<8x256xf32> to vector<8xf32>
    %11 = vector.shape_cast %10 : vector<8xf32> to vector<8x1xf32>
    %cst_11 = arith.constant 2.560000e+02 : f32
    %12 = vector.broadcast %cst_11 : f32 to vector<8x1xf32>
    %13 = arith.divf %11, %12 : vector<8x1xf32>
    %14 = vector.broadcast %13 : vector<8x1xf32> to vector<8x256xf32>
    %15 = arith.subf %5, %14 : vector<8x256xf32>
    %16 = arith.mulf %15, %15 : vector<8x256xf32>
    %cst_12 = arith.constant dense<0.000000e+00> : vector<8xf32>
    %17 = vector.multi_reduction <add>, %16, %cst_12 [1] : vector<8x256xf32> to vector<8xf32>
    %18 = vector.shape_cast %17 : vector<8xf32> to vector<8x1xf32>
    %cst_13 = arith.constant 2.560000e+02 : f32
    %19 = vector.broadcast %cst_13 : f32 to vector<8x1xf32>
    %20 = arith.divf %18, %19 : vector<8x1xf32>
    %21 = vector.broadcast %13 : vector<8x1xf32> to vector<8x256xf32>
    %22 = arith.subf %5, %21 : vector<8x256xf32>
    %cst_14 = arith.constant 9.99999974E-6 : f32
    %23 = vector.broadcast %cst_14 : f32 to vector<8x1xf32>
    %24 = arith.addf %20, %23 : vector<8x1xf32>
    %25 = math.rsqrt %24 : vector<8x1xf32>
    %26 = vector.broadcast %25 : vector<8x1xf32> to vector<8x256xf32>
    %27 = arith.mulf %22, %26 : vector<8x256xf32>
    %28 = vector.shape_cast %7 : vector<256xf32> to vector<1x256xf32>
    %29 = vector.broadcast %28 : vector<1x256xf32> to vector<8x256xf32>
    %30 = arith.mulf %27, %29 : vector<8x256xf32>
    %31 = vector.shape_cast %9 : vector<256xf32> to vector<1x256xf32>
    %32 = vector.broadcast %31 : vector<1x256xf32> to vector<8x256xf32>
    %33 = arith.addf %30, %32 : vector<8x256xf32>
    %34 = arith.truncf %33 : vector<8x256xf32> to vector<8x256xbf16>
    %35 = arith.index_cast %arg1 : i32 to index
    %c0_15 = arith.constant 0 : index
    %c0_16 = arith.constant 0 : index
    %36 = vector.load %arg6[%35, %c0_15, %c0_16] : memref<4x256x768xbf16, #tpu.memory_space<vmem>>, vector<1x256x768xbf16>
    %37 = vector.shape_cast %36 : vector<1x256x768xbf16> to vector<256x768xbf16>
    %cst_17 = arith.constant dense<0.000000e+00> : vector<8x768xf32>
    %38 = tpu.matmul %34, %37, %cst_17 {dimension_numbers = #tpu.dot_dimension_numbers<[1], [0], [0], [1], [0, 0, 1, 1], [], []>} : vector<8x256xbf16>, vector<256x768xbf16>, vector<8x768xf32> -> vector<8x768xf32>
    %c0_18 = arith.constant 0 : index
    %c0_19 = arith.constant 0 : index
    %39 = vector.load %arg3[%c0_18, %c0_19] : memref<8x8xf32, #tpu.memory_space<vmem>>, vector<8x8xf32>
    %40 = vector.extract_strided_slice %38 {offsets = [0, 0], sizes = [8, 64], strides = [1, 1]} : vector<8x768xf32> to vector<8x64xf32>
    %41 = vector.extract_strided_slice %38 {offsets = [0, 256], sizes = [8, 64], strides = [1, 1]} : vector<8x768xf32> to vector<8x64xf32>
    %42 = vector.extract_strided_slice %38 {offsets = [0, 512], sizes = [8, 64], strides = [1, 1]} : vector<8x768xf32> to vector<8x64xf32>
    %cst_20 = arith.constant dense<0.000000e+00> : vector<8x8xf32>
    %43 = tpu.matmul %40, %41, %cst_20 {dimension_numbers = #tpu.dot_dimension_numbers<[1], [1], [0], [0], [0, 0, 1, 0], [], []>} : vector<8x64xf32>, vector<8x64xf32>, vector<8x8xf32> -> vector<8x8xf32>
    %cst_21 = arith.constant 6.250000e-02 : f32
    %44 = vector.broadcast %cst_21 : f32 to vector<8x8xf32>
    %45 = arith.mulf %43, %44 : vector<8x8xf32>
    %46 = arith.addf %45, %39 : vector<8x8xf32>
    %cst_22 = arith.constant dense<0xFF800000> : vector<8xf32>
    %47 = vector.multi_reduction <maximumf>, %46, %cst_22 [1] : vector<8x8xf32> to vector<8xf32>
    %48 = vector.shape_cast %47 : vector<8xf32> to vector<8x1xf32>
    %49 = vector.broadcast %48 : vector<8x1xf32> to vector<8x8xf32>
    %50 = arith.subf %46, %49 : vector<8x8xf32>
    %51 = math.exp %50 : vector<8x8xf32>
    %cst_23 = arith.constant dense<0.000000e+00> : vector<8xf32>
    %52 = vector.multi_reduction <add>, %51, %cst_23 [1] : vector<8x8xf32> to vector<8xf32>
    %53 = vector.shape_cast %52 : vector<8xf32> to vector<8x1xf32>
    %54 = tpu.reciprocal %53 {approx = true} : vector<8x1xf32> -> vector<8x1xf32>
    %55 = vector.broadcast %54 : vector<8x1xf32> to vector<8x8xf32>
    %56 = arith.mulf %51, %55 : vector<8x8xf32>
    %57 = arith.truncf %56 : vector<8x8xf32> to vector<8x8xbf16>
    %58 = arith.truncf %42 : vector<8x64xf32> to vector<8x64xbf16>
    %cst_24 = arith.constant dense<0.000000e+00> : vector<8x64xf32>
    %59 = tpu.matmul %57, %58, %cst_24 {dimension_numbers = #tpu.dot_dimension_numbers<[1], [0], [0], [1], [0, 0, 1, 1], [], []>} : vector<8x8xbf16>, vector<8x64xbf16>, vector<8x64xf32> -> vector<8x64xf32>
    %60 = vector.extract_strided_slice %38 {offsets = [0, 64], sizes = [8, 64], strides = [1, 1]} : vector<8x768xf32> to vector<8x64xf32>
    %61 = vector.extract_strided_slice %38 {offsets = [0, 320], sizes = [8, 64], strides = [1, 1]} : vector<8x768xf32> to vector<8x64xf32>
    %62 = vector.extract_strided_slice %38 {offsets = [0, 576], sizes = [8, 64], strides = [1, 1]} : vector<8x768xf32> to vector<8x64xf32>
    %cst_25 = arith.constant dense<0.000000e+00> : vector<8x8xf32>
    %63 = tpu.matmul %60, %61, %cst_25 {dimension_numbers = #tpu.dot_dimension_numbers<[1], [1], [0], [0], [0, 0, 1, 0], [], []>} : vector<8x64xf32>, vector<8x64xf32>, vector<8x8xf32> -> vector<8x8xf32>
    %cst_26 = arith.constant 6.250000e-02 : f32
    %64 = vector.broadcast %cst_26 : f32 to vector<8x8xf32>
    %65 = arith.mulf %63, %64 : vector<8x8xf32>
    %66 = arith.addf %65, %39 : vector<8x8xf32>
    %cst_27 = arith.constant dense<0xFF800000> : vector<8xf32>
    %67 = vector.multi_reduction <maximumf>, %66, %cst_27 [1] : vector<8x8xf32> to vector<8xf32>
    %68 = vector.shape_cast %67 : vector<8xf32> to vector<8x1xf32>
    %69 = vector.broadcast %68 : vector<8x1xf32> to vector<8x8xf32>
    %70 = arith.subf %66, %69 : vector<8x8xf32>
    %71 = math.exp %70 : vector<8x8xf32>
    %cst_28 = arith.constant dense<0.000000e+00> : vector<8xf32>
    %72 = vector.multi_reduction <add>, %71, %cst_28 [1] : vector<8x8xf32> to vector<8xf32>
    %73 = vector.shape_cast %72 : vector<8xf32> to vector<8x1xf32>
    %74 = tpu.reciprocal %73 {approx = true} : vector<8x1xf32> -> vector<8x1xf32>
    %75 = vector.broadcast %74 : vector<8x1xf32> to vector<8x8xf32>
    %76 = arith.mulf %71, %75 : vector<8x8xf32>
    %77 = arith.truncf %76 : vector<8x8xf32> to vector<8x8xbf16>
    %78 = arith.truncf %62 : vector<8x64xf32> to vector<8x64xbf16>
    %cst_29 = arith.constant dense<0.000000e+00> : vector<8x64xf32>
    %79 = tpu.matmul %77, %78, %cst_29 {dimension_numbers = #tpu.dot_dimension_numbers<[1], [0], [0], [1], [0, 0, 1, 1], [], []>} : vector<8x8xbf16>, vector<8x64xbf16>, vector<8x64xf32> -> vector<8x64xf32>
    %80 = vector.extract_strided_slice %38 {offsets = [0, 128], sizes = [8, 64], strides = [1, 1]} : vector<8x768xf32> to vector<8x64xf32>
    %81 = vector.extract_strided_slice %38 {offsets = [0, 384], sizes = [8, 64], strides = [1, 1]} : vector<8x768xf32> to vector<8x64xf32>
    %82 = vector.extract_strided_slice %38 {offsets = [0, 640], sizes = [8, 64], strides = [1, 1]} : vector<8x768xf32> to vector<8x64xf32>
    %cst_30 = arith.constant dense<0.000000e+00> : vector<8x8xf32>
    %83 = tpu.matmul %80, %81, %cst_30 {dimension_numbers = #tpu.dot_dimension_numbers<[1], [1], [0], [0], [0, 0, 1, 0], [], []>} : vector<8x64xf32>, vector<8x64xf32>, vector<8x8xf32> -> vector<8x8xf32>
    %cst_31 = arith.constant 6.250000e-02 : f32
    %84 = vector.broadcast %cst_31 : f32 to vector<8x8xf32>
    %85 = arith.mulf %83, %84 : vector<8x8xf32>
    %86 = arith.addf %85, %39 : vector<8x8xf32>
    %cst_32 = arith.constant dense<0xFF800000> : vector<8xf32>
    %87 = vector.multi_reduction <maximumf>, %86, %cst_32 [1] : vector<8x8xf32> to vector<8xf32>
    %88 = vector.shape_cast %87 : vector<8xf32> to vector<8x1xf32>
    %89 = vector.broadcast %88 : vector<8x1xf32> to vector<8x8xf32>
    %90 = arith.subf %86, %89 : vector<8x8xf32>
    %91 = math.exp %90 : vector<8x8xf32>
    %cst_33 = arith.constant dense<0.000000e+00> : vector<8xf32>
    %92 = vector.multi_reduction <add>, %91, %cst_33 [1] : vector<8x8xf32> to vector<8xf32>
    %93 = vector.shape_cast %92 : vector<8xf32> to vector<8x1xf32>
    %94 = tpu.reciprocal %93 {approx = true} : vector<8x1xf32> -> vector<8x1xf32>
    %95 = vector.broadcast %94 : vector<8x1xf32> to vector<8x8xf32>
    %96 = arith.mulf %91, %95 : vector<8x8xf32>
    %97 = arith.truncf %96 : vector<8x8xf32> to vector<8x8xbf16>
    %98 = arith.truncf %82 : vector<8x64xf32> to vector<8x64xbf16>
    %cst_34 = arith.constant dense<0.000000e+00> : vector<8x64xf32>
    %99 = tpu.matmul %97, %98, %cst_34 {dimension_numbers = #tpu.dot_dimension_numbers<[1], [0], [0], [1], [0, 0, 1, 1], [], []>} : vector<8x8xbf16>, vector<8x64xbf16>, vector<8x64xf32> -> vector<8x64xf32>
    %100 = vector.extract_strided_slice %38 {offsets = [0, 192], sizes = [8, 64], strides = [1, 1]} : vector<8x768xf32> to vector<8x64xf32>
    %101 = vector.extract_strided_slice %38 {offsets = [0, 448], sizes = [8, 64], strides = [1, 1]} : vector<8x768xf32> to vector<8x64xf32>
    %102 = vector.extract_strided_slice %38 {offsets = [0, 704], sizes = [8, 64], strides = [1, 1]} : vector<8x768xf32> to vector<8x64xf32>
    %cst_35 = arith.constant dense<0.000000e+00> : vector<8x8xf32>
    %103 = tpu.matmul %100, %101, %cst_35 {dimension_numbers = #tpu.dot_dimension_numbers<[1], [1], [0], [0], [0, 0, 1, 0], [], []>} : vector<8x64xf32>, vector<8x64xf32>, vector<8x8xf32> -> vector<8x8xf32>
    %cst_36 = arith.constant 6.250000e-02 : f32
    %104 = vector.broadcast %cst_36 : f32 to vector<8x8xf32>
    %105 = arith.mulf %103, %104 : vector<8x8xf32>
    %106 = arith.addf %105, %39 : vector<8x8xf32>
    %cst_37 = arith.constant dense<0xFF800000> : vector<8xf32>
    %107 = vector.multi_reduction <maximumf>, %106, %cst_37 [1] : vector<8x8xf32> to vector<8xf32>
    %108 = vector.shape_cast %107 : vector<8xf32> to vector<8x1xf32>
    %109 = vector.broadcast %108 : vector<8x1xf32> to vector<8x8xf32>
    %110 = arith.subf %106, %109 : vector<8x8xf32>
    %111 = math.exp %110 : vector<8x8xf32>
    %cst_38 = arith.constant dense<0.000000e+00> : vector<8xf32>
    %112 = vector.multi_reduction <add>, %111, %cst_38 [1] : vector<8x8xf32> to vector<8xf32>
    %113 = vector.shape_cast %112 : vector<8xf32> to vector<8x1xf32>
    %114 = tpu.reciprocal %113 {approx = true} : vector<8x1xf32> -> vector<8x1xf32>
    %115 = vector.broadcast %114 : vector<8x1xf32> to vector<8x8xf32>
    %116 = arith.mulf %111, %115 : vector<8x8xf32>
    %117 = arith.truncf %116 : vector<8x8xf32> to vector<8x8xbf16>
    %118 = arith.truncf %102 : vector<8x64xf32> to vector<8x64xbf16>
    %cst_39 = arith.constant dense<0.000000e+00> : vector<8x64xf32>
    %119 = tpu.matmul %117, %118, %cst_39 {dimension_numbers = #tpu.dot_dimension_numbers<[1], [0], [0], [1], [0, 0, 1, 1], [], []>} : vector<8x8xbf16>, vector<8x64xbf16>, vector<8x64xf32> -> vector<8x64xf32>
    %120 = tpu.concatenate %59, %79, %99, %119 in 1 : vector<8x64xf32>, vector<8x64xf32>, vector<8x64xf32>, vector<8x64xf32> -> vector<8x256xf32>
    %121 = arith.truncf %120 : vector<8x256xf32> to vector<8x256xbf16>
    %122 = arith.index_cast %arg1 : i32 to index
    %c0_40 = arith.constant 0 : index
    %c0_41 = arith.constant 0 : index
    %123 = vector.load %arg7[%122, %c0_40, %c0_41] : memref<4x256x256xbf16, #tpu.memory_space<vmem>>, vector<1x256x256xbf16>
    %124 = vector.shape_cast %123 : vector<1x256x256xbf16> to vector<256x256xbf16>
    %cst_42 = arith.constant dense<0.000000e+00> : vector<8x256xf32>
    %125 = tpu.matmul %121, %124, %cst_42 {dimension_numbers = #tpu.dot_dimension_numbers<[1], [0], [0], [1], [0, 0, 1, 1], [], []>} : vector<8x256xbf16>, vector<256x256xbf16>, vector<8x256xf32> -> vector<8x256xf32>
    %c0_43 = arith.constant 0 : index
    %c0_44 = arith.constant 0 : index
    %c0_45 = arith.constant 0 : index
    %126 = vector.load %arg8[%c0_43, %c0_44, %c0_45] : memref<1x1x256xf32, #tpu.memory_space<vmem>>, vector<1x1x256xf32>
    %127 = vector.shape_cast %126 : vector<1x1x256xf32> to vector<256xf32>
    %128 = vector.shape_cast %127 : vector<256xf32> to vector<1x256xf32>
    %129 = vector.broadcast %128 : vector<1x256xf32> to vector<8x256xf32>
    %130 = arith.addf %125, %129 : vector<8x256xf32>
    %131 = arith.addf %5, %130 : vector<8x256xf32>
    %c0_46 = arith.constant 0 : index
    %c0_47 = arith.constant 0 : index
    %c0_48 = arith.constant 0 : index
    %132 = vector.load %arg9[%c0_46, %c0_47, %c0_48] : memref<1x1x256xf32, #tpu.memory_space<vmem>>, vector<1x1x256xf32>
    %133 = vector.shape_cast %132 : vector<1x1x256xf32> to vector<256xf32>
    %c0_49 = arith.constant 0 : index
    %c0_50 = arith.constant 0 : index
    %c0_51 = arith.constant 0 : index
    %134 = vector.load %arg10[%c0_49, %c0_50, %c0_51] : memref<1x1x256xf32, #tpu.memory_space<vmem>>, vector<1x1x256xf32>
    %135 = vector.shape_cast %134 : vector<1x1x256xf32> to vector<256xf32>
    %cst_52 = arith.constant dense<0.000000e+00> : vector<8xf32>
    %136 = vector.multi_reduction <add>, %131, %cst_52 [1] : vector<8x256xf32> to vector<8xf32>
    %137 = vector.shape_cast %136 : vector<8xf32> to vector<8x1xf32>
    %cst_53 = arith.constant 2.560000e+02 : f32
    %138 = vector.broadcast %cst_53 : f32 to vector<8x1xf32>
    %139 = arith.divf %137, %138 : vector<8x1xf32>
    %140 = vector.broadcast %139 : vector<8x1xf32> to vector<8x256xf32>
    %141 = arith.subf %131, %140 : vector<8x256xf32>
    %142 = arith.mulf %141, %141 : vector<8x256xf32>
    %cst_54 = arith.constant dense<0.000000e+00> : vector<8xf32>
    %143 = vector.multi_reduction <add>, %142, %cst_54 [1] : vector<8x256xf32> to vector<8xf32>
    %144 = vector.shape_cast %143 : vector<8xf32> to vector<8x1xf32>
    %cst_55 = arith.constant 2.560000e+02 : f32
    %145 = vector.broadcast %cst_55 : f32 to vector<8x1xf32>
    %146 = arith.divf %144, %145 : vector<8x1xf32>
    %147 = vector.broadcast %139 : vector<8x1xf32> to vector<8x256xf32>
    %148 = arith.subf %131, %147 : vector<8x256xf32>
    %cst_56 = arith.constant 9.99999974E-6 : f32
    %149 = vector.broadcast %cst_56 : f32 to vector<8x1xf32>
    %150 = arith.addf %146, %149 : vector<8x1xf32>
    %151 = math.rsqrt %150 : vector<8x1xf32>
    %152 = vector.broadcast %151 : vector<8x1xf32> to vector<8x256xf32>
    %153 = arith.mulf %148, %152 : vector<8x256xf32>
    %154 = vector.shape_cast %133 : vector<256xf32> to vector<1x256xf32>
    %155 = vector.broadcast %154 : vector<1x256xf32> to vector<8x256xf32>
    %156 = arith.mulf %153, %155 : vector<8x256xf32>
    %157 = vector.shape_cast %135 : vector<256xf32> to vector<1x256xf32>
    %158 = vector.broadcast %157 : vector<1x256xf32> to vector<8x256xf32>
    %159 = arith.addf %156, %158 : vector<8x256xf32>
    %160 = arith.truncf %159 : vector<8x256xf32> to vector<8x256xbf16>
    %161 = arith.index_cast %arg1 : i32 to index
    %c0_57 = arith.constant 0 : index
    %c0_58 = arith.constant 0 : index
    %162 = vector.load %arg11[%161, %c0_57, %c0_58] : memref<4x256x1024xbf16, #tpu.memory_space<vmem>>, vector<1x256x1024xbf16>
    %163 = vector.shape_cast %162 : vector<1x256x1024xbf16> to vector<256x1024xbf16>
    %cst_59 = arith.constant dense<0.000000e+00> : vector<8x1024xf32>
    %164 = tpu.matmul %160, %163, %cst_59 {dimension_numbers = #tpu.dot_dimension_numbers<[1], [0], [0], [1], [0, 0, 1, 1], [], []>} : vector<8x256xbf16>, vector<256x1024xbf16>, vector<8x1024xf32> -> vector<8x1024xf32>
    %c0_60 = arith.constant 0 : index
    %c0_61 = arith.constant 0 : index
    %c0_62 = arith.constant 0 : index
    %165 = vector.load %arg12[%c0_60, %c0_61, %c0_62] : memref<1x1x1024xf32, #tpu.memory_space<vmem>>, vector<1x1x1024xf32>
    %166 = vector.shape_cast %165 : vector<1x1x1024xf32> to vector<1024xf32>
    %167 = vector.shape_cast %166 : vector<1024xf32> to vector<1x1024xf32>
    %168 = vector.broadcast %167 : vector<1x1024xf32> to vector<8x1024xf32>
    %169 = arith.addf %164, %168 : vector<8x1024xf32>
    %cst_63 = arith.constant 0.000000e+00 : f32
    %170 = vector.broadcast %cst_63 : f32 to vector<8x1024xf32>
    %171 = arith.maximumf %169, %170 : vector<8x1024xf32>
    %172 = arith.truncf %171 : vector<8x1024xf32> to vector<8x1024xbf16>
    %173 = arith.index_cast %arg1 : i32 to index
    %c0_64 = arith.constant 0 : index
    %c0_65 = arith.constant 0 : index
    %174 = vector.load %arg13[%173, %c0_64, %c0_65] : memref<4x1024x256xbf16, #tpu.memory_space<vmem>>, vector<1x1024x256xbf16>
    %175 = vector.shape_cast %174 : vector<1x1024x256xbf16> to vector<1024x256xbf16>
    %cst_66 = arith.constant dense<0.000000e+00> : vector<8x256xf32>
    %176 = tpu.matmul %172, %175, %cst_66 {dimension_numbers = #tpu.dot_dimension_numbers<[1], [0], [0], [1], [0, 0, 1, 1], [], []>} : vector<8x1024xbf16>, vector<1024x256xbf16>, vector<8x256xf32> -> vector<8x256xf32>
    %c0_67 = arith.constant 0 : index
    %c0_68 = arith.constant 0 : index
    %c0_69 = arith.constant 0 : index
    %177 = vector.load %arg14[%c0_67, %c0_68, %c0_69] : memref<1x1x256xf32, #tpu.memory_space<vmem>>, vector<1x1x256xf32>
    %178 = vector.shape_cast %177 : vector<1x1x256xf32> to vector<256xf32>
    %179 = vector.shape_cast %178 : vector<256xf32> to vector<1x256xf32>
    %180 = vector.broadcast %179 : vector<1x256xf32> to vector<8x256xf32>
    %181 = arith.addf %176, %180 : vector<8x256xf32>
    %182 = arith.addf %131, %181 : vector<8x256xf32>
    %c3_i32 = arith.constant 3 : i32
    %183 = arith.cmpi eq, %arg1, %c3_i32 : i32
    %184 = arith.extui %183 : i1 to i32
    %c0_i32_70 = arith.constant 0 : i32
    %185 = arith.cmpi ne, %184, %c0_i32_70 : i32
    scf.if %185 {
      %c0_73 = arith.constant 0 : index
      %c0_74 = arith.constant 0 : index
      %189 = vector.load %arg15[%c0_73, %c0_74] : memref<1x256xf32, #tpu.memory_space<vmem>>, vector<1x256xf32>
      %190 = vector.shape_cast %189 : vector<1x256xf32> to vector<256xf32>
      %c0_75 = arith.constant 0 : index
      %c0_76 = arith.constant 0 : index
      %191 = vector.load %arg16[%c0_75, %c0_76] : memref<1x256xf32, #tpu.memory_space<vmem>>, vector<1x256xf32>
      %192 = vector.shape_cast %191 : vector<1x256xf32> to vector<256xf32>
      %cst_77 = arith.constant dense<0.000000e+00> : vector<8xf32>
      %193 = vector.multi_reduction <add>, %182, %cst_77 [1] : vector<8x256xf32> to vector<8xf32>
      %194 = vector.shape_cast %193 : vector<8xf32> to vector<8x1xf32>
      %cst_78 = arith.constant 2.560000e+02 : f32
      %195 = vector.broadcast %cst_78 : f32 to vector<8x1xf32>
      %196 = arith.divf %194, %195 : vector<8x1xf32>
      %197 = vector.broadcast %196 : vector<8x1xf32> to vector<8x256xf32>
      %198 = arith.subf %182, %197 : vector<8x256xf32>
      %199 = arith.mulf %198, %198 : vector<8x256xf32>
      %cst_79 = arith.constant dense<0.000000e+00> : vector<8xf32>
      %200 = vector.multi_reduction <add>, %199, %cst_79 [1] : vector<8x256xf32> to vector<8xf32>
      %201 = vector.shape_cast %200 : vector<8xf32> to vector<8x1xf32>
      %cst_80 = arith.constant 2.560000e+02 : f32
      %202 = vector.broadcast %cst_80 : f32 to vector<8x1xf32>
      %203 = arith.divf %201, %202 : vector<8x1xf32>
      %204 = vector.broadcast %196 : vector<8x1xf32> to vector<8x256xf32>
      %205 = arith.subf %182, %204 : vector<8x256xf32>
      %cst_81 = arith.constant 9.99999974E-6 : f32
      %206 = vector.broadcast %cst_81 : f32 to vector<8x1xf32>
      %207 = arith.addf %203, %206 : vector<8x1xf32>
      %208 = math.rsqrt %207 : vector<8x1xf32>
      %209 = vector.broadcast %208 : vector<8x1xf32> to vector<8x256xf32>
      %210 = arith.mulf %205, %209 : vector<8x256xf32>
      %211 = vector.shape_cast %190 : vector<256xf32> to vector<1x256xf32>
      %212 = vector.broadcast %211 : vector<1x256xf32> to vector<8x256xf32>
      %213 = arith.mulf %210, %212 : vector<8x256xf32>
      %214 = vector.shape_cast %192 : vector<256xf32> to vector<1x256xf32>
      %215 = vector.broadcast %214 : vector<1x256xf32> to vector<8x256xf32>
      %216 = arith.addf %213, %215 : vector<8x256xf32>
      %c0_82 = arith.constant 0 : index
      %c0_83 = arith.constant 0 : index
      %c0_84 = arith.constant 0 : index
      %217 = vector.load %arg17[%c0_82, %c0_83, %c0_84] : memref<1x8x256xf32, #tpu.memory_space<vmem>>, vector<1x8x256xf32>
      %218 = vector.shape_cast %217 : vector<1x8x256xf32> to vector<8x256xf32>
      %219 = vector.shape_cast %216 : vector<8x256xf32> to vector<1x8x256xf32>
      tpu.vector_store %arg17[%c0_82, %c0_83, %c0_84], %219 {strides = array<i32>} : memref<1x8x256xf32, #tpu.memory_space<vmem>>, vector<1x8x256xf32>,
    } else {
    }
    %c3_i32_71 = arith.constant 3 : i32
    %186 = arith.cmpi ne, %arg1, %c3_i32_71 : i32
    %187 = arith.extui %186 : i1 to i32
    %c0_i32_72 = arith.constant 0 : i32
    %188 = arith.cmpi ne, %187, %c0_i32_72 : i32
    scf.if %188 {
      %c0_73 = arith.constant 0 : index
      %c0_74 = arith.constant 0 : index
      %c0_75 = arith.constant 0 : index
      %189 = vector.load %arg17[%c0_73, %c0_74, %c0_75] : memref<1x8x256xf32, #tpu.memory_space<vmem>>, vector<1x8x256xf32>
      %190 = vector.shape_cast %189 : vector<1x8x256xf32> to vector<8x256xf32>
      %191 = vector.shape_cast %182 : vector<8x256xf32> to vector<1x8x256xf32>
      tpu.vector_store %arg17[%c0_73, %c0_74, %c0_75], %191 {strides = array<i32>} : memref<1x8x256xf32, #tpu.memory_space<vmem>>, vector<1x8x256xf32>,
    } else {
    }
    return
  }
  func.func @transform_0(%arg0: i32, %arg1: i32) -> (i32, i32, i32) {
    %c0_i32 = arith.constant 0 : i32
    %c0_i32_0 = arith.constant 0 : i32
    %c0_i32_1 = arith.constant 0 : i32
    return %arg0, %c0_i32, %c0_i32_0 : i32, i32, i32
  }
  func.func @transform_1(%arg0: i32, %arg1: i32) -> (i32, i32) {
    %c0_i32 = arith.constant 0 : i32
    %c0_i32_0 = arith.constant 0 : i32
    %c0_i32_1 = arith.constant 0 : i32
    return %c0_i32, %c0_i32_0 : i32, i32
  }
  func.func @transform_2(%arg0: i32, %arg1: i32) -> (i32, i32, i32) {
    %c0_i32 = arith.constant 0 : i32
    %c0_i32_0 = arith.constant 0 : i32
    %c0_i32_1 = arith.constant 0 : i32
    return %arg1, %c0_i32, %c0_i32_0 : i32, i32, i32
  }
  func.func @transform_3(%arg0: i32, %arg1: i32) -> (i32, i32, i32) {
    %c0_i32 = arith.constant 0 : i32
    %c0_i32_0 = arith.constant 0 : i32
    %c0_i32_1 = arith.constant 0 : i32
    return %arg1, %c0_i32, %c0_i32_0 : i32, i32, i32
  }
  func.func @transform_4(%arg0: i32, %arg1: i32) -> (i32, i32, i32) {
    %c0_i32 = arith.constant 0 : i32
    %c0_i32_0 = arith.constant 0 : i32
    %c0_i32_1 = arith.constant 0 : i32
    %c0_i32_2 = arith.constant 0 : i32
    return %c0_i32, %c0_i32_0, %c0_i32_1 : i32, i32, i32
  }
  func.func @transform_5(%arg0: i32, %arg1: i32) -> (i32, i32, i32) {
    %c0_i32 = arith.constant 0 : i32
    %c0_i32_0 = arith.constant 0 : i32
    %c0_i32_1 = arith.constant 0 : i32
    %c0_i32_2 = arith.constant 0 : i32
    return %c0_i32, %c0_i32_0, %c0_i32_1 : i32, i32, i32
  }
  func.func @transform_6(%arg0: i32, %arg1: i32) -> (i32, i32, i32) {
    %c0_i32 = arith.constant 0 : i32
    %c0_i32_0 = arith.constant 0 : i32
    %c0_i32_1 = arith.constant 0 : i32
    return %arg1, %c0_i32, %c0_i32_0 : i32, i32, i32
  }
  func.func @transform_7(%arg0: i32, %arg1: i32) -> (i32, i32, i32) {
    %c0_i32 = arith.constant 0 : i32
    %c0_i32_0 = arith.constant 0 : i32
    %c0_i32_1 = arith.constant 0 : i32
    return %arg1, %c0_i32, %c0_i32_0 : i32, i32, i32
  }
  func.func @transform_8(%arg0: i32, %arg1: i32) -> (i32, i32, i32) {
    %c0_i32 = arith.constant 0 : i32
    %c0_i32_0 = arith.constant 0 : i32
    %c0_i32_1 = arith.constant 0 : i32
    return %arg1, %c0_i32, %c0_i32_0 : i32, i32, i32
  }
  func.func @transform_9(%arg0: i32, %arg1: i32) -> (i32, i32, i32) {
    %c0_i32 = arith.constant 0 : i32
    %c0_i32_0 = arith.constant 0 : i32
    %c0_i32_1 = arith.constant 0 : i32
    %c0_i32_2 = arith.constant 0 : i32
    return %c0_i32, %c0_i32_0, %c0_i32_1 : i32, i32, i32
  }
  func.func @transform_10(%arg0: i32, %arg1: i32) -> (i32, i32, i32) {
    %c0_i32 = arith.constant 0 : i32
    %c0_i32_0 = arith.constant 0 : i32
    %c0_i32_1 = arith.constant 0 : i32
    return %arg1, %c0_i32, %c0_i32_0 : i32, i32, i32
  }
  func.func @transform_11(%arg0: i32, %arg1: i32) -> (i32, i32, i32) {
    %c0_i32 = arith.constant 0 : i32
    %c0_i32_0 = arith.constant 0 : i32
    %c0_i32_1 = arith.constant 0 : i32
    %c0_i32_2 = arith.constant 0 : i32
    return %c0_i32, %c0_i32_0, %c0_i32_1 : i32, i32, i32
  }
  func.func @transform_12(%arg0: i32, %arg1: i32) -> (i32, i32, i32) {
    %c0_i32 = arith.constant 0 : i32
    %c0_i32_0 = arith.constant 0 : i32
    %c0_i32_1 = arith.constant 0 : i32
    return %arg1, %c0_i32, %c0_i32_0 : i32, i32, i32
  }
  func.func @transform_13(%arg0: i32, %arg1: i32) -> (i32, i32) {
    %c0_i32 = arith.constant 0 : i32
    %c0_i32_0 = arith.constant 0 : i32
    %c0_i32_1 = arith.constant 0 : i32
    return %c0_i32, %c0_i32_0 : i32, i32
  }
  func.func @transform_14(%arg0: i32, %arg1: i32) -> (i32, i32) {
    %c0_i32 = arith.constant 0 : i32
    %c0_i32_0 = arith.constant 0 : i32
    %c0_i32_1 = arith.constant 0 : i32
    return %c0_i32, %c0_i32_0 : i32, i32
  }
  func.func @transform_15(%arg0: i32, %arg1: i32) -> (i32, i32, i32) {
    %c0_i32 = arith.constant 0 : i32
    %c0_i32_0 = arith.constant 0 : i32
    %c0_i32_1 = arith.constant 0 : i32
    return %arg0, %c0_i32, %c0_i32_0 : i32, i32, i32
  }
}

</mosaic_0001>

<bundles_post_ra>
// kernel: bigram_lm_forward.3
= control target key start
LH: loop header
LB: loop body
LE: loop exit
PB: predicated region body
PF: predicated region fallthrough
CT: control target
= control target key end

     0   :  { %s3317_s12 = smov 0   ;;  %s3319_s13 = smov 0   ;;  %s4339_s0 = inlined_call_operand.vmem [shape: f32[16,256], index: 0, kind: input, shape index: {}]   ;;  %s4340_s1 = inlined_call_operand.vmem [shape: bf16[256,10240], index: 1, kind: input, shape index: {}]   ;;  %s4341_s2 = inlined_call_operand.vmem [shape: f32[1,10240], index: 2, kind: input, shape index: {}]   ;;  %s4342_s3 = inlined_call_operand.vmem [shape: f32[16,10240], index: 3, kind: output, shape index: {}]  }
   0x1   :  { %s3321_s14 = smov 0   ;;  %s3323_s15 = smov 0  }
   0x2   :  { %s3325_s16 = smov 0  }
   0x3 LB: > { %s25_s17 = sadd.s32 1, %s3291_s15  ;;  %s2942_s18 = sadd.s32 4294967295, %s3295_s16   ;;  %s3295_s16 = sphi %s3325_s16, %s13_s16   ;;  %s3291_s15 = sphi %s3323_s15, %s4348_s15   ;;  %s3287_s14 = sphi %s3321_s14, %s4347_s14   ;;  %s3283_s13 = sphi %s3319_s13, %s4346_s13   ;;  %s3279_s12 = sphi %s3317_s12, %s4345_s12  }
   0x4   : > { %p27_p0 = scmp.ge.s32.totalorder %s25_s17, 5  ;;  %p65_p1 = scmp.ne.s32.totalorder %s3283_s13, %s3279_s12 }
   0x5   : > { %p66_p2 = scmp.eq.s32.totalorder %s3295_s16, 0  ;;  %p123_p4 = scmp.eq.s32.totalorder %s2942_s18, 4 }
   0x6   : > { %s4350_s17 = smov (%p27_p0, %s25_s17), 0  ;;  %s58_s20 = sadd.s32 1, %s3283_s13 }
   0x7   : > { %p67_p3 = por %p66_p2, %p65_p1  ;;  %s55_s19 = ssub.s32 %s3291_s15, %s4350_s17 }
   0x8   : > { %p56_p5 = scmp.eq.s32.totalorder %s55_s19, 0  ;;  %p3352_p6 = por %p123_p4, %p65_p1 }
   0x9   : > { %p2946_p7 = scmp.ge.s32.totalorder %s3295_s16, 5 }
   0xa   : > { %s3357_s22 = scalar_select %p56_p5, %s3283_s13, %s58_s20  }
   0xb   : > { %155 = sbr.rel (%p2946_p7) target bundleno = 148 (0x94), region = 20 }
  0x10   : > { %158 = sbr.rel (!%p67_p3) target bundleno = 148 (0x94), region = 24  ;;  %s160_s23 = sand.u32 (%p67_p3), 1, %s3283_s13  }
  0x11   : > { %s3215_s24 = sshll.u32 (%p67_p3), %s3291_s15, 6  ;;  %s2947_s25 = sshll.u32 (%p67_p3), %s160_s23, 11 }
  0x12   : > { %s3365_s28 = scalar_lea.vmem (%p67_p3), %s4340_s1, %s3215_s24  ;;  %s3370_s29 = scalar_lea.vmem (%p67_p3), [#allocation2], %s2947_s25 }
  0x13   : > { %v178_v0 = vld [vmem:[%s3365_s28] sm:$0xff] (%p67_p3)  ;;  %v180_v1 = vld [vmem:[%s3365_s28 + $0x8] sm:$0xff] (%p67_p3)  ;;  %v182_v2 = vld [vmem:[%s3365_s28 + $0x10] sm:$0xff] (%p67_p3) }
  0x14   : > { %179 = vst [vmem:[%s3370_s29] sm:$0xff] (%p67_p3), %v178_v0  ;;  %181 = vst [vmem:[%s3370_s29 + $0x8] sm:$0xff] (%p67_p3), %v180_v1  ;;  %v184_v3 = vld [vmem:[%s3365_s28 + $0x18] sm:$0xff] (%p67_p3)  ;;  %v186_v4 = vld [vmem:[%s3365_s28 + $0x20] sm:$0xff] (%p67_p3) }
  0x15   : > { %183 = vst [vmem:[%s3370_s29 + $0x10] sm:$0xff] %v182_v2  ;;  %v188_v5 = vld [vmem:[%s3365_s28 + $0x28] sm:$0xff]  ;;  %185 = vst [vmem:[%s3370_s29 + $0x18] sm:$0xff] %v184_v3  ;;  %v190_v6 = vld [vmem:[%s3365_s28 + $0x30] sm:$0xff] }
  0x16   : > { %187 = vst [vmem:[%s3370_s29 + $0x20] sm:$0xff] %v186_v4  ;;  %189 = vst [vmem:[%s3370_s29 + $0x28] sm:$0xff] %v188_v5  ;;  %v192_v7 = vld [vmem:[%s3365_s28 + $0x38] sm:$0xff]  ;;  %v194_v8 = vld [vmem:[%s3365_s28 + $0x140] sm:$0xff] }
  0x17   : > { %191 = vst [vmem:[%s3370_s29 + $0x30] sm:$0xff] %v190_v6  ;;  %193 = vst [vmem:[%s3370_s29 + $0x38] sm:$0xff] %v192_v7  ;;  %v196_v9 = vld [vmem:[%s3365_s28 + $0x148] sm:$0xff]  ;;  %v198_v10 = vld [vmem:[%s3365_s28 + $0x150] sm:$0xff] }
  0x18   : > { %195 = vst [vmem:[%s3370_s29 + $0x40] sm:$0xff] %v194_v8  ;;  %v200_v11 = vld [vmem:[%s3365_s28 + $0x158] sm:$0xff]  ;;  %197 = vst [vmem:[%s3370_s29 + $0x48] sm:$0xff] %v196_v9  ;;  %v202_v12 = vld [vmem:[%s3365_s28 + $0x160] sm:$0xff] }
  0x19   : > { %199 = vst [vmem:[%s3370_s29 + $0x50] sm:$0xff] %v198_v10  ;;  %201 = vst [vmem:[%s3370_s29 + $0x58] sm:$0xff] %v200_v11  ;;  %v204_v13 = vld [vmem:[%s3365_s28 + $0x168] sm:$0xff]  ;;  %v206_v14 = vld [vmem:[%s3365_s28 + $0x170] sm:$0xff] }
  0x1a   : > { %203 = vst [vmem:[%s3370_s29 + $0x60] sm:$0xff] %v202_v12  ;;  %205 = vst [vmem:[%s3370_s29 + $0x68] sm:$0xff] %v204_v13  ;;  %v208_v15 = vld [vmem:[%s3365_s28 + $0x178] sm:$0xff]  ;;  %v210_v16 = vld [vmem:[%s3365_s28 + $0x280] sm:$0xff] }
  0x1b   : > { %207 = vst [vmem:[%s3370_s29 + $0x70] sm:$0xff] %v206_v14  ;;  %v212_v17 = vld [vmem:[%s3365_s28 + $0x288] sm:$0xff]  ;;  %209 = vst [vmem:[%s3370_s29 + $0x78] sm:$0xff] %v208_v15  ;;  %v214_v18 = vld [vmem:[%s3365_s28 + $0x290] sm:$0xff] }
  0x1c   : > { %211 = vst [vmem:[%s3370_s29 + $0x80] sm:$0xff] %v210_v16  ;;  %213 = vst [vmem:[%s3370_s29 + $0x88] sm:$0xff] %v212_v17  ;;  %v216_v19 = vld [vmem:[%s3365_s28 + $0x298] sm:$0xff]  ;;  %v218_v20 = vld [vmem:[%s3365_s28 + $0x2a0] sm:$0xff] }
  0x1d   : > { %215 = vst [vmem:[%s3370_s29 + $0x90] sm:$0xff] %v214_v18  ;;  %217 = vst [vmem:[%s3370_s29 + $0x98] sm:$0xff] %v216_v19  ;;  %v220_v21 = vld [vmem:[%s3365_s28 + $0x2a8] sm:$0xff]  ;;  %v222_v22 = vld [vmem:[%s3365_s28 + $0x2b0] sm:$0xff] }
  0x1e   : > { %219 = vst [vmem:[%s3370_s29 + $0xa0] sm:$0xff] %v218_v20  ;;  %v224_v23 = vld [vmem:[%s3365_s28 + $0x2b8] sm:$0xff]  ;;  %221 = vst [vmem:[%s3370_s29 + $0xa8] sm:$0xff] %v220_v21  ;;  %v226_v24 = vld [vmem:[%s3365_s28 + $0x3c0] sm:$0xff] }
  0x1f   : > { %223 = vst [vmem:[%s3370_s29 + $0xb0] sm:$0xff] %v222_v22  ;;  %225 = vst [vmem:[%s3370_s29 + $0xb8] sm:$0xff] %v224_v23  ;;  %v228_v25 = vld [vmem:[%s3365_s28 + $0x3c8] sm:$0xff]  ;;  %v230_v26 = vld [vmem:[%s3365_s28 + $0x3d0] sm:$0xff] }
  0x20   : > { %227 = vst [vmem:[%s3370_s29 + $0xc0] sm:$0xff] %v226_v24  ;;  %229 = vst [vmem:[%s3370_s29 + $0xc8] sm:$0xff] %v228_v25  ;;  %v232_v27 = vld [vmem:[%s3365_s28 + $0x3d8] sm:$0xff]  ;;  %v234_v28 = vld [vmem:[%s3365_s28 + $0x3e0] sm:$0xff] }
  0x21   : > { %231 = vst [vmem:[%s3370_s29 + $0xd0] sm:$0xff] %v230_v26  ;;  %v236_v29 = vld [vmem:[%s3365_s28 + $0x3e8] sm:$0xff]  ;;  %233 = vst [vmem:[%s3370_s29 + $0xd8] sm:$0xff] %v232_v27  ;;  %v238_v30 = vld [vmem:[%s3365_s28 + $0x3f0] sm:$0xff] }
  0x22   : > { %235 = vst [vmem:[%s3370_s29 + $0xe0] sm:$0xff] %v234_v28  ;;  %237 = vst [vmem:[%s3370_s29 + $0xe8] sm:$0xff] %v236_v29  ;;  %v240_v31 = vld [vmem:[%s3365_s28 + $0x3f8] sm:$0xff]  ;;  %v242_v32 = vld [vmem:[%s3365_s28 + $0x500] sm:$0xff] }
  0x23   : > { %239 = vst [vmem:[%s3370_s29 + $0xf0] sm:$0xff] %v238_v30  ;;  %241 = vst [vmem:[%s3370_s29 + $0xf8] sm:$0xff] %v240_v31  ;;  %v244_v33 = vld [vmem:[%s3365_s28 + $0x508] sm:$0xff]  ;;  %v246_v34 = vld [vmem:[%s3365_s28 + $0x510] sm:$0xff] }
  0x24   : > { %243 = vst [vmem:[%s3370_s29 + $0x100] sm:$0xff] %v242_v32  ;;  %v248_v35 = vld [vmem:[%s3365_s28 + $0x518] sm:$0xff]  ;;  %245 = vst [vmem:[%s3370_s29 + $0x108] sm:$0xff] %v244_v33  ;;  %v250_v36 = vld [vmem:[%s3365_s28 + $0x520] sm:$0xff] }
  0x25   : > { %247 = vst [vmem:[%s3370_s29 + $0x110] sm:$0xff] %v246_v34  ;;  %249 = vst [vmem:[%s3370_s29 + $0x118] sm:$0xff] %v248_v35  ;;  %v252_v37 = vld [vmem:[%s3365_s28 + $0x528] sm:$0xff]  ;;  %v254_v38 = vld [vmem:[%s3365_s28 + $0x530] sm:$0xff] }
  0x26   : > { %251 = vst [vmem:[%s3370_s29 + $0x120] sm:$0xff] %v250_v36  ;;  %253 = vst [vmem:[%s3370_s29 + $0x128] sm:$0xff] %v252_v37  ;;  %v256_v39 = vld [vmem:[%s3365_s28 + $0x538] sm:$0xff]  ;;  %v258_v40 = vld [vmem:[%s3365_s28 + $0x640] sm:$0xff] }
  0x27   : > { %255 = vst [vmem:[%s3370_s29 + $0x130] sm:$0xff] %v254_v38  ;;  %v260_v41 = vld [vmem:[%s3365_s28 + $0x648] sm:$0xff]  ;;  %257 = vst [vmem:[%s3370_s29 + $0x138] sm:$0xff] %v256_v39  ;;  %v262_v42 = vld [vmem:[%s3365_s28 + $0x650] sm:$0xff] }
  0x28   : > { %259 = vst [vmem:[%s3370_s29 + $0x140] sm:$0xff] %v258_v40  ;;  %261 = vst [vmem:[%s3370_s29 + $0x148] sm:$0xff] %v260_v41  ;;  %v264_v43 = vld [vmem:[%s3365_s28 + $0x658] sm:$0xff]  ;;  %v266_v44 = vld [vmem:[%s3365_s28 + $0x660] sm:$0xff] }
  0x29   : > { %263 = vst [vmem:[%s3370_s29 + $0x150] sm:$0xff] %v262_v42  ;;  %265 = vst [vmem:[%s3370_s29 + $0x158] sm:$0xff] %v264_v43  ;;  %v268_v45 = vld [vmem:[%s3365_s28 + $0x668] sm:$0xff]  ;;  %v270_v46 = vld [vmem:[%s3365_s28 + $0x670] sm:$0xff] }
  0x2a   : > { %267 = vst [vmem:[%s3370_s29 + $0x160] sm:$0xff] %v266_v44  ;;  %v272_v47 = vld [vmem:[%s3365_s28 + $0x678] sm:$0xff]  ;;  %269 = vst [vmem:[%s3370_s29 + $0x168] sm:$0xff] %v268_v45  ;;  %v274_v48 = vld [vmem:[%s3365_s28 + $0x780] sm:$0xff] }
  0x2b   : > { %271 = vst [vmem:[%s3370_s29 + $0x170] sm:$0xff] %v270_v46  ;;  %273 = vst [vmem:[%s3370_s29 + $0x178] sm:$0xff] %v272_v47  ;;  %v276_v49 = vld [vmem:[%s3365_s28 + $0x788] sm:$0xff]  ;;  %v278_v50 = vld [vmem:[%s3365_s28 + $0x790] sm:$0xff] }
  0x2c   : > { %275 = vst [vmem:[%s3370_s29 + $0x180] sm:$0xff] %v274_v48  ;;  %277 = vst [vmem:[%s3370_s29 + $0x188] sm:$0xff] %v276_v49  ;;  %v280_v51 = vld [vmem:[%s3365_s28 + $0x798] sm:$0xff]  ;;  %v282_v52 = vld [vmem:[%s3365_s28 + $0x7a0] sm:$0xff] }
  0x2d   : > { %279 = vst [vmem:[%s3370_s29 + $0x190] sm:$0xff] %v278_v50  ;;  %v284_v53 = vld [vmem:[%s3365_s28 + $0x7a8] sm:$0xff]  ;;  %281 = vst [vmem:[%s3370_s29 + $0x198] sm:$0xff] %v280_v51  ;;  %v286_v54 = vld [vmem:[%s3365_s28 + $0x7b0] sm:$0xff] }
  0x2e   : > { %283 = vst [vmem:[%s3370_s29 + $0x1a0] sm:$0xff] %v282_v52  ;;  %285 = vst [vmem:[%s3370_s29 + $0x1a8] sm:$0xff] %v284_v53  ;;  %v288_v55 = vld [vmem:[%s3365_s28 + $0x7b8] sm:$0xff]  ;;  %v290_v56 = vld [vmem:[%s3365_s28 + $0x8c0] sm:$0xff] }
  0x2f   : > { %287 = vst [vmem:[%s3370_s29 + $0x1b0] sm:$0xff] %v286_v54  ;;  %289 = vst [vmem:[%s3370_s29 + $0x1b8] sm:$0xff] %v288_v55  ;;  %v292_v57 = vld [vmem:[%s3365_s28 + $0x8c8] sm:$0xff]  ;;  %v294_v58 = vld [vmem:[%s3365_s28 + $0x8d0] sm:$0xff] }
  0x30   : > { %291 = vst [vmem:[%s3370_s29 + $0x1c0] sm:$0xff] %v290_v56  ;;  %v296_v59 = vld [vmem:[%s3365_s28 + $0x8d8] sm:$0xff]  ;;  %293 = vst [vmem:[%s3370_s29 + $0x1c8] sm:$0xff] %v292_v57  ;;  %v298_v60 = vld [vmem:[%s3365_s28 + $0x8e0] sm:$0xff] }
  0x31   : > { %295 = vst [vmem:[%s3370_s29 + $0x1d0] sm:$0xff] %v294_v58  ;;  %297 = vst [vmem:[%s3370_s29 + $0x1d8] sm:$0xff] %v296_v59  ;;  %v300_v61 = vld [vmem:[%s3365_s28 + $0x8e8] sm:$0xff]  ;;  %v302_v62 = vld [vmem:[%s3365_s28 + $0x8f0] sm:$0xff] }
  0x32   : > { %299 = vst [vmem:[%s3370_s29 + $0x1e0] sm:$0xff] %v298_v60  ;;  %301 = vst [vmem:[%s3370_s29 + $0x1e8] sm:$0xff] %v300_v61  ;;  %v304_v63 = vld [vmem:[%s3365_s28 + $0x8f8] sm:$0xff]  ;;  %v306_v0 = vld [vmem:[%s3365_s28 + $0xa00] sm:$0xff] }
  0x33   : > { %303 = vst [vmem:[%s3370_s29 + $0x1f0] sm:$0xff] %v302_v62  ;;  %v308_v1 = vld [vmem:[%s3365_s28 + $0xa08] sm:$0xff]  ;;  %305 = vst [vmem:[%s3370_s29 + $0x1f8] sm:$0xff] %v304_v63  ;;  %v310_v2 = vld [vmem:[%s3365_s28 + $0xa10] sm:$0xff] }
  0x34   : > { %307 = vst [vmem:[%s3370_s29 + $0x200] sm:$0xff] %v306_v0  ;;  %309 = vst [vmem:[%s3370_s29 + $0x208] sm:$0xff] %v308_v1  ;;  %v312_v3 = vld [vmem:[%s3365_s28 + $0xa18] sm:$0xff]  ;;  %v314_v4 = vld [vmem:[%s3365_s28 + $0xa20] sm:$0xff] }
  0x35   : > { %311 = vst [vmem:[%s3370_s29 + $0x210] sm:$0xff] %v310_v2  ;;  %313 = vst [vmem:[%s3370_s29 + $0x218] sm:$0xff] %v312_v3  ;;  %v316_v5 = vld [vmem:[%s3365_s28 + $0xa28] sm:$0xff]  ;;  %v318_v6 = vld [vmem:[%s3365_s28 + $0xa30] sm:$0xff] }
  0x36   : > { %315 = vst [vmem:[%s3370_s29 + $0x220] sm:$0xff] %v314_v4  ;;  %v320_v7 = vld [vmem:[%s3365_s28 + $0xa38] sm:$0xff]  ;;  %317 = vst [vmem:[%s3370_s29 + $0x228] sm:$0xff] %v316_v5  ;;  %v322_v8 = vld [vmem:[%s3365_s28 + $0xb40] sm:$0xff] }
  0x37   : > { %319 = vst [vmem:[%s3370_s29 + $0x230] sm:$0xff] %v318_v6  ;;  %321 = vst [vmem:[%s3370_s29 + $0x238] sm:$0xff] %v320_v7  ;;  %v324_v9 = vld [vmem:[%s3365_s28 + $0xb48] sm:$0xff]  ;;  %v326_v10 = vld [vmem:[%s3365_s28 + $0xb50] sm:$0xff] }
  0x38   : > { %323 = vst [vmem:[%s3370_s29 + $0x240] sm:$0xff] %v322_v8  ;;  %325 = vst [vmem:[%s3370_s29 + $0x248] sm:$0xff] %v324_v9  ;;  %v328_v11 = vld [vmem:[%s3365_s28 + $0xb58] sm:$0xff]  ;;  %v330_v12 = vld [vmem:[%s3365_s28 + $0xb60] sm:$0xff] }
  0x39   : > { %327 = vst [vmem:[%s3370_s29 + $0x250] sm:$0xff] %v326_v10  ;;  %v332_v13 = vld [vmem:[%s3365_s28 + $0xb68] sm:$0xff]  ;;  %329 = vst [vmem:[%s3370_s29 + $0x258] sm:$0xff] %v328_v11  ;;  %v334_v14 = vld [vmem:[%s3365_s28 + $0xb70] sm:$0xff] }
  0x3a   : > { %331 = vst [vmem:[%s3370_s29 + $0x260] sm:$0xff] %v330_v12  ;;  %333 = vst [vmem:[%s3370_s29 + $0x268] sm:$0xff] %v332_v13  ;;  %v336_v15 = vld [vmem:[%s3365_s28 + $0xb78] sm:$0xff]  ;;  %v338_v16 = vld [vmem:[%s3365_s28 + $0xc80] sm:$0xff] }
  0x3b   : > { %335 = vst [vmem:[%s3370_s29 + $0x270] sm:$0xff] %v334_v14  ;;  %337 = vst [vmem:[%s3370_s29 + $0x278] sm:$0xff] %v336_v15  ;;  %v340_v17 = vld [vmem:[%s3365_s28 + $0xc88] sm:$0xff]  ;;  %v342_v18 = vld [vmem:[%s3365_s28 + $0xc90] sm:$0xff] }
  0x3c   : > { %339 = vst [vmem:[%s3370_s29 + $0x280] sm:$0xff] %v338_v16  ;;  %v344_v19 = vld [vmem:[%s3365_s28 + $0xc98] sm:$0xff]  ;;  %341 = vst [vmem:[%s3370_s29 + $0x288] sm:$0xff] %v340_v17  ;;  %v346_v20 = vld [vmem:[%s3365_s28 + $0xca0] sm:$0xff] }
  0x3d   : > { %343 = vst [vmem:[%s3370_s29 + $0x290] sm:$0xff] %v342_v18  ;;  %345 = vst [vmem:[%s3370_s29 + $0x298] sm:$0xff] %v344_v19  ;;  %v348_v21 = vld [vmem:[%s3365_s28 + $0xca8] sm:$0xff]  ;;  %v350_v22 = vld [vmem:[%s3365_s28 + $0xcb0] sm:$0xff] }
  0x3e   : > { %347 = vst [vmem:[%s3370_s29 + $0x2a0] sm:$0xff] %v346_v20  ;;  %349 = vst [vmem:[%s3370_s29 + $0x2a8] sm:$0xff] %v348_v21  ;;  %v352_v23 = vld [vmem:[%s3365_s28 + $0xcb8] sm:$0xff]  ;;  %v354_v24 = vld [vmem:[%s3365_s28 + $0xdc0] sm:$0xff] }
  0x3f   : > { %351 = vst [vmem:[%s3370_s29 + $0x2b0] sm:$0xff] %v350_v22  ;;  %v356_v25 = vld [vmem:[%s3365_s28 + $0xdc8] sm:$0xff]  ;;  %353 = vst [vmem:[%s3370_s29 + $0x2b8] sm:$0xff] %v352_v23  ;;  %v358_v26 = vld [vmem:[%s3365_s28 + $0xdd0] sm:$0xff] }
  0x40   : > { %355 = vst [vmem:[%s3370_s29 + $0x2c0] sm:$0xff] %v354_v24  ;;  %357 = vst [vmem:[%s3370_s29 + $0x2c8] sm:$0xff] %v356_v25  ;;  %v360_v27 = vld [vmem:[%s3365_s28 + $0xdd8] sm:$0xff]  ;;  %v362_v28 = vld [vmem:[%s3365_s28 + $0xde0] sm:$0xff] }
  0x41   : > { %359 = vst [vmem:[%s3370_s29 + $0x2d0] sm:$0xff] %v358_v26  ;;  %361 = vst [vmem:[%s3370_s29 + $0x2d8] sm:$0xff] %v360_v27  ;;  %v364_v29 = vld [vmem:[%s3365_s28 + $0xde8] sm:$0xff]  ;;  %v366_v30 = vld [vmem:[%s3365_s28 + $0xdf0] sm:$0xff] }
  0x42   : > { %363 = vst [vmem:[%s3370_s29 + $0x2e0] sm:$0xff] %v362_v28  ;;  %v368_v31 = vld [vmem:[%s3365_s28 + $0xdf8] sm:$0xff]  ;;  %365 = vst [vmem:[%s3370_s29 + $0x2e8] sm:$0xff] %v364_v29  ;;  %v370_v32 = vld [vmem:[%s3365_s28 + $0xf00] sm:$0xff] }
  0x43   : > { %367 = vst [vmem:[%s3370_s29 + $0x2f0] sm:$0xff] %v366_v30  ;;  %369 = vst [vmem:[%s3370_s29 + $0x2f8] sm:$0xff] %v368_v31  ;;  %v372_v33 = vld [vmem:[%s3365_s28 + $0xf08] sm:$0xff]  ;;  %v374_v34 = vld [vmem:[%s3365_s28 + $0xf10] sm:$0xff] }
  0x44   : > { %371 = vst [vmem:[%s3370_s29 + $0x300] sm:$0xff] %v370_v32  ;;  %373 = vst [vmem:[%s3370_s29 + $0x308] sm:$0xff] %v372_v33  ;;  %v376_v35 = vld [vmem:[%s3365_s28 + $0xf18] sm:$0xff]  ;;  %v378_v36 = vld [vmem:[%s3365_s28 + $0xf20] sm:$0xff] }
  0x45   : > { %375 = vst [vmem:[%s3370_s29 + $0x310] sm:$0xff] %v374_v34  ;;  %v380_v37 = vld [vmem:[%s3365_s28 + $0xf28] sm:$0xff]  ;;  %377 = vst [vmem:[%s3370_s29 + $0x318] sm:$0xff] %v376_v35  ;;  %v382_v38 = vld [vmem:[%s3365_s28 + $0xf30] sm:$0xff] }
  0x46   : > { %379 = vst [vmem:[%s3370_s29 + $0x320] sm:$0xff] %v378_v36  ;;  %381 = vst [vmem:[%s3370_s29 + $0x328] sm:$0xff] %v380_v37  ;;  %v384_v39 = vld [vmem:[%s3365_s28 + $0xf38] sm:$0xff]  ;;  %v386_v40 = vld [vmem:[%s3365_s28 + $0x1040] sm:$0xff] }
  0x47   : > { %383 = vst [vmem:[%s3370_s29 + $0x330] sm:$0xff] %v382_v38  ;;  %385 = vst [vmem:[%s3370_s29 + $0x338] sm:$0xff] %v384_v39  ;;  %v388_v41 = vld [vmem:[%s3365_s28 + $0x1048] sm:$0xff]  ;;  %v390_v42 = vld [vmem:[%s3365_s28 + $0x1050] sm:$0xff] }
  0x48   : > { %387 = vst [vmem:[%s3370_s29 + $0x340] sm:$0xff] %v386_v40  ;;  %v392_v43 = vld [vmem:[%s3365_s28 + $0x1058] sm:$0xff]  ;;  %389 = vst [vmem:[%s3370_s29 + $0x348] sm:$0xff] %v388_v41  ;;  %v394_v44 = vld [vmem:[%s3365_s28 + $0x1060] sm:$0xff] }
  0x49   : > { %391 = vst [vmem:[%s3370_s29 + $0x350] sm:$0xff] %v390_v42  ;;  %393 = vst [vmem:[%s3370_s29 + $0x358] sm:$0xff] %v392_v43  ;;  %v396_v45 = vld [vmem:[%s3365_s28 + $0x1068] sm:$0xff]  ;;  %v398_v46 = vld [vmem:[%s3365_s28 + $0x1070] sm:$0xff] }
  0x4a   : > { %395 = vst [vmem:[%s3370_s29 + $0x360] sm:$0xff] %v394_v44  ;;  %397 = vst [vmem:[%s3370_s29 + $0x368] sm:$0xff] %v396_v45  ;;  %v400_v47 = vld [vmem:[%s3365_s28 + $0x1078] sm:$0xff]  ;;  %v402_v48 = vld [vmem:[%s3365_s28 + $0x1180] sm:$0xff] }
  0x4b   : > { %399 = vst [vmem:[%s3370_s29 + $0x370] sm:$0xff] %v398_v46  ;;  %v404_v49 = vld [vmem:[%s3365_s28 + $0x1188] sm:$0xff]  ;;  %401 = vst [vmem:[%s3370_s29 + $0x378] sm:$0xff] %v400_v47  ;;  %v406_v50 = vld [vmem:[%s3365_s28 + $0x1190] sm:$0xff] }
  0x4c   : > { %403 = vst [vmem:[%s3370_s29 + $0x380] sm:$0xff] %v402_v48  ;;  %405 = vst [vmem:[%s3370_s29 + $0x388] sm:$0xff] %v404_v49  ;;  %v408_v51 = vld [vmem:[%s3365_s28 + $0x1198] sm:$0xff]  ;;  %v410_v52 = vld [vmem:[%s3365_s28 + $0x11a0] sm:$0xff] }
  0x4d   : > { %407 = vst [vmem:[%s3370_s29 + $0x390] sm:$0xff] %v406_v50  ;;  %409 = vst [vmem:[%s3370_s29 + $0x398] sm:$0xff] %v408_v51  ;;  %v412_v53 = vld [vmem:[%s3365_s28 + $0x11a8] sm:$0xff]  ;;  %v414_v54 = vld [vmem:[%s3365_s28 + $0x11b0] sm:$0xff] }
  0x4e   : > { %411 = vst [vmem:[%s3370_s29 + $0x3a0] sm:$0xff] %v410_v52  ;;  %v416_v55 = vld [vmem:[%s3365_s28 + $0x11b8] sm:$0xff]  ;;  %413 = vst [vmem:[%s3370_s29 + $0x3a8] sm:$0xff] %v412_v53  ;;  %v418_v56 = vld [vmem:[%s3365_s28 + $0x12c0] sm:$0xff] }
  0x4f   : > { %415 = vst [vmem:[%s3370_s29 + $0x3b0] sm:$0xff] %v414_v54  ;;  %417 = vst [vmem:[%s3370_s29 + $0x3b8] sm:$0xff] %v416_v55  ;;  %v420_v57 = vld [vmem:[%s3365_s28 + $0x12c8] sm:$0xff]  ;;  %v422_v58 = vld [vmem:[%s3365_s28 + $0x12d0] sm:$0xff] }
  0x50   : > { %419 = vst [vmem:[%s3370_s29 + $0x3c0] sm:$0xff] %v418_v56  ;;  %421 = vst [vmem:[%s3370_s29 + $0x3c8] sm:$0xff] %v420_v57  ;;  %v424_v59 = vld [vmem:[%s3365_s28 + $0x12d8] sm:$0xff]  ;;  %v426_v60 = vld [vmem:[%s3365_s28 + $0x12e0] sm:$0xff] }
  0x51   : > { %423 = vst [vmem:[%s3370_s29 + $0x3d0] sm:$0xff] %v422_v58  ;;  %v428_v61 = vld [vmem:[%s3365_s28 + $0x12e8] sm:$0xff]  ;;  %425 = vst [vmem:[%s3370_s29 + $0x3d8] sm:$0xff] %v424_v59  ;;  %v430_v62 = vld [vmem:[%s3365_s28 + $0x12f0] sm:$0xff] }
  0x52   : > { %427 = vst [vmem:[%s3370_s29 + $0x3e0] sm:$0xff] %v426_v60  ;;  %429 = vst [vmem:[%s3370_s29 + $0x3e8] sm:$0xff] %v428_v61  ;;  %v432_v63 = vld [vmem:[%s3365_s28 + $0x12f8] sm:$0xff]  ;;  %v434_v0 = vld [vmem:[%s3365_s28 + $0x1400] sm:$0xff] }
  0x53   : > { %431 = vst [vmem:[%s3370_s29 + $0x3f0] sm:$0xff] %v430_v62  ;;  %433 = vst [vmem:[%s3370_s29 + $0x3f8] sm:$0xff] %v432_v63  ;;  %v436_v1 = vld [vmem:[%s3365_s28 + $0x1408] sm:$0xff]  ;;  %v438_v2 = vld [vmem:[%s3365_s28 + $0x1410] sm:$0xff] }
  0x54   : > { %435 = vst [vmem:[%s3370_s29 + $0x400] sm:$0xff] %v434_v0  ;;  %v440_v3 = vld [vmem:[%s3365_s28 + $0x1418] sm:$0xff]  ;;  %437 = vst [vmem:[%s3370_s29 + $0x408] sm:$0xff] %v436_v1  ;;  %v442_v4 = vld [vmem:[%s3365_s28 + $0x1420] sm:$0xff] }
  0x55   : > { %439 = vst [vmem:[%s3370_s29 + $0x410] sm:$0xff] %v438_v2  ;;  %441 = vst [vmem:[%s3370_s29 + $0x418] sm:$0xff] %v440_v3  ;;  %v444_v5 = vld [vmem:[%s3365_s28 + $0x1428] sm:$0xff]  ;;  %v446_v6 = vld [vmem:[%s3365_s28 + $0x1430] sm:$0xff] }
  0x56   : > { %443 = vst [vmem:[%s3370_s29 + $0x420] sm:$0xff] %v442_v4  ;;  %445 = vst [vmem:[%s3370_s29 + $0x428] sm:$0xff] %v444_v5  ;;  %v448_v7 = vld [vmem:[%s3365_s28 + $0x1438] sm:$0xff]  ;;  %v450_v8 = vld [vmem:[%s3365_s28 + $0x1540] sm:$0xff] }
  0x57   : > { %447 = vst [vmem:[%s3370_s29 + $0x430] sm:$0xff] %v446_v6  ;;  %v452_v9 = vld [vmem:[%s3365_s28 + $0x1548] sm:$0xff]  ;;  %449 = vst [vmem:[%s3370_s29 + $0x438] sm:$0xff] %v448_v7  ;;  %v454_v10 = vld [vmem:[%s3365_s28 + $0x1550] sm:$0xff] }
  0x58   : > { %451 = vst [vmem:[%s3370_s29 + $0x440] sm:$0xff] %v450_v8  ;;  %453 = vst [vmem:[%s3370_s29 + $0x448] sm:$0xff] %v452_v9  ;;  %v456_v11 = vld [vmem:[%s3365_s28 + $0x1558] sm:$0xff]  ;;  %v458_v12 = vld [vmem:[%s3365_s28 + $0x1560] sm:$0xff] }
  0x59   : > { %455 = vst [vmem:[%s3370_s29 + $0x450] sm:$0xff] %v454_v10  ;;  %457 = vst [vmem:[%s3370_s29 + $0x458] sm:$0xff] %v456_v11  ;;  %v460_v13 = vld [vmem:[%s3365_s28 + $0x1568] sm:$0xff]  ;;  %v462_v14 = vld [vmem:[%s3365_s28 + $0x1570] sm:$0xff] }
  0x5a   : > { %459 = vst [vmem:[%s3370_s29 + $0x460] sm:$0xff] %v458_v12  ;;  %v464_v15 = vld [vmem:[%s3365_s28 + $0x1578] sm:$0xff]  ;;  %461 = vst [vmem:[%s3370_s29 + $0x468] sm:$0xff] %v460_v13  ;;  %v466_v16 = vld [vmem:[%s3365_s28 + $0x1680] sm:$0xff] }
  0x5b   : > { %463 = vst [vmem:[%s3370_s29 + $0x470] sm:$0xff] %v462_v14  ;;  %465 = vst [vmem:[%s3370_s29 + $0x478] sm:$0xff] %v464_v15  ;;  %v468_v17 = vld [vmem:[%s3365_s28 + $0x1688] sm:$0xff]  ;;  %v470_v18 = vld [vmem:[%s3365_s28 + $0x1690] sm:$0xff] }
  0x5c   : > { %467 = vst [vmem:[%s3370_s29 + $0x480] sm:$0xff] %v466_v16  ;;  %469 = vst [vmem:[%s3370_s29 + $0x488] sm:$0xff] %v468_v17  ;;  %v472_v19 = vld [vmem:[%s3365_s28 + $0x1698] sm:$0xff]  ;;  %v474_v20 = vld [vmem:[%s3365_s28 + $0x16a0] sm:$0xff] }
  0x5d   : > { %471 = vst [vmem:[%s3370_s29 + $0x490] sm:$0xff] %v470_v18  ;;  %v476_v21 = vld [vmem:[%s3365_s28 + $0x16a8] sm:$0xff]  ;;  %473 = vst [vmem:[%s3370_s29 + $0x498] sm:$0xff] %v472_v19  ;;  %v478_v22 = vld [vmem:[%s3365_s28 + $0x16b0] sm:$0xff] }
  0x5e   : > { %475 = vst [vmem:[%s3370_s29 + $0x4a0] sm:$0xff] %v474_v20  ;;  %477 = vst [vmem:[%s3370_s29 + $0x4a8] sm:$0xff] %v476_v21  ;;  %v480_v23 = vld [vmem:[%s3365_s28 + $0x16b8] sm:$0xff]  ;;  %v482_v24 = vld [vmem:[%s3365_s28 + $0x17c0] sm:$0xff] }
  0x5f   : > { %479 = vst [vmem:[%s3370_s29 + $0x4b0] sm:$0xff] %v478_v22  ;;  %481 = vst [vmem:[%s3370_s29 + $0x4b8] sm:$0xff] %v480_v23  ;;  %v484_v25 = vld [vmem:[%s3365_s28 + $0x17c8] sm:$0xff]  ;;  %v486_v26 = vld [vmem:[%s3365_s28 + $0x17d0] sm:$0xff] }
  0x60   : > { %483 = vst [vmem:[%s3370_s29 + $0x4c0] sm:$0xff] %v482_v24  ;;  %v488_v27 = vld [vmem:[%s3365_s28 + $0x17d8] sm:$0xff]  ;;  %485 = vst [vmem:[%s3370_s29 + $0x4c8] sm:$0xff] %v484_v25  ;;  %v490_v28 = vld [vmem:[%s3365_s28 + $0x17e0] sm:$0xff] }
  0x61   : > { %487 = vst [vmem:[%s3370_s29 + $0x4d0] sm:$0xff] %v486_v26  ;;  %489 = vst [vmem:[%s3370_s29 + $0x4d8] sm:$0xff] %v488_v27  ;;  %v492_v29 = vld [vmem:[%s3365_s28 + $0x17e8] sm:$0xff]  ;;  %v494_v30 = vld [vmem:[%s3365_s28 + $0x17f0] sm:$0xff] }
  0x62   : > { %491 = vst [vmem:[%s3370_s29 + $0x4e0] sm:$0xff] %v490_v28  ;;  %493 = vst [vmem:[%s3370_s29 + $0x4e8] sm:$0xff] %v492_v29  ;;  %v496_v31 = vld [vmem:[%s3365_s28 + $0x17f8] sm:$0xff]  ;;  %v498_v32 = vld [vmem:[%s3365_s28 + $0x1900] sm:$0xff] }
  0x63   : > { %495 = vst [vmem:[%s3370_s29 + $0x4f0] sm:$0xff] %v494_v30  ;;  %v500_v33 = vld [vmem:[%s3365_s28 + $0x1908] sm:$0xff]  ;;  %497 = vst [vmem:[%s3370_s29 + $0x4f8] sm:$0xff] %v496_v31  ;;  %v502_v34 = vld [vmem:[%s3365_s28 + $0x1910] sm:$0xff] }
  0x64   : > { %499 = vst [vmem:[%s3370_s29 + $0x500] sm:$0xff] %v498_v32  ;;  %501 = vst [vmem:[%s3370_s29 + $0x508] sm:$0xff] %v500_v33  ;;  %v504_v35 = vld [vmem:[%s3365_s28 + $0x1918] sm:$0xff]  ;;  %v506_v36 = vld [vmem:[%s3365_s28 + $0x1920] sm:$0xff] }
  0x65   : > { %503 = vst [vmem:[%s3370_s29 + $0x510] sm:$0xff] %v502_v34  ;;  %505 = vst [vmem:[%s3370_s29 + $0x518] sm:$0xff] %v504_v35  ;;  %v508_v37 = vld [vmem:[%s3365_s28 + $0x1928] sm:$0xff]  ;;  %v510_v38 = vld [vmem:[%s3365_s28 + $0x1930] sm:$0xff] }
  0x66   : > { %507 = vst [vmem:[%s3370_s29 + $0x520] sm:$0xff] %v506_v36  ;;  %v512_v39 = vld [vmem:[%s3365_s28 + $0x1938] sm:$0xff]  ;;  %509 = vst [vmem:[%s3370_s29 + $0x528] sm:$0xff] %v508_v37  ;;  %v514_v40 = vld [vmem:[%s3365_s28 + $0x1a40] sm:$0xff] }
  0x67   : > { %511 = vst [vmem:[%s3370_s29 + $0x530] sm:$0xff] %v510_v38  ;;  %513 = vst [vmem:[%s3370_s29 + $0x538] sm:$0xff] %v512_v39  ;;  %v516_v41 = vld [vmem:[%s3365_s28 + $0x1a48] sm:$0xff]  ;;  %v518_v42 = vld [vmem:[%s3365_s28 + $0x1a50] sm:$0xff] }
  0x68   : > { %515 = vst [vmem:[%s3370_s29 + $0x540] sm:$0xff] %v514_v40  ;;  %517 = vst [vmem:[%s3370_s29 + $0x548] sm:$0xff] %v516_v41  ;;  %v520_v43 = vld [vmem:[%s3365_s28 + $0x1a58] sm:$0xff]  ;;  %v522_v44 = vld [vmem:[%s3365_s28 + $0x1a60] sm:$0xff] }
  0x69   : > { %519 = vst [vmem:[%s3370_s29 + $0x550] sm:$0xff] %v518_v42  ;;  %v524_v45 = vld [vmem:[%s3365_s28 + $0x1a68] sm:$0xff]  ;;  %521 = vst [vmem:[%s3370_s29 + $0x558] sm:$0xff] %v520_v43  ;;  %v526_v46 = vld [vmem:[%s3365_s28 + $0x1a70] sm:$0xff] }
  0x6a   : > { %523 = vst [vmem:[%s3370_s29 + $0x560] sm:$0xff] %v522_v44  ;;  %525 = vst [vmem:[%s3370_s29 + $0x568] sm:$0xff] %v524_v45  ;;  %v528_v47 = vld [vmem:[%s3365_s28 + $0x1a78] sm:$0xff]  ;;  %v530_v48 = vld [vmem:[%s3365_s28 + $0x1b80] sm:$0xff] }
  0x6b   : > { %527 = vst [vmem:[%s3370_s29 + $0x570] sm:$0xff] %v526_v46  ;;  %529 = vst [vmem:[%s3370_s29 + $0x578] sm:$0xff] %v528_v47  ;;  %v532_v49 = vld [vmem:[%s3365_s28 + $0x1b88] sm:$0xff]  ;;  %v534_v50 = vld [vmem:[%s3365_s28 + $0x1b90] sm:$0xff] }
  0x6c   : > { %531 = vst [vmem:[%s3370_s29 + $0x580] sm:$0xff] %v530_v48  ;;  %v536_v51 = vld [vmem:[%s3365_s28 + $0x1b98] sm:$0xff]  ;;  %533 = vst [vmem:[%s3370_s29 + $0x588] sm:$0xff] %v532_v49  ;;  %v538_v52 = vld [vmem:[%s3365_s28 + $0x1ba0] sm:$0xff] }
  0x6d   : > { %535 = vst [vmem:[%s3370_s29 + $0x590] sm:$0xff] %v534_v50  ;;  %537 = vst [vmem:[%s3370_s29 + $0x598] sm:$0xff] %v536_v51  ;;  %v540_v53 = vld [vmem:[%s3365_s28 + $0x1ba8] sm:$0xff]  ;;  %v542_v54 = vld [vmem:[%s3365_s28 + $0x1bb0] sm:$0xff] }
  0x6e   : > { %539 = vst [vmem:[%s3370_s29 + $0x5a0] sm:$0xff] %v538_v52  ;;  %541 = vst [vmem:[%s3370_s29 + $0x5a8] sm:$0xff] %v540_v53  ;;  %v544_v55 = vld [vmem:[%s3365_s28 + $0x1bb8] sm:$0xff]  ;;  %v546_v56 = vld [vmem:[%s3365_s28 + $0x1cc0] sm:$0xff] }
  0x6f   : > { %543 = vst [vmem:[%s3370_s29 + $0x5b0] sm:$0xff] %v542_v54  ;;  %v548_v57 = vld [vmem:[%s3365_s28 + $0x1cc8] sm:$0xff]  ;;  %545 = vst [vmem:[%s3370_s29 + $0x5b8] sm:$0xff] %v544_v55  ;;  %v550_v58 = vld [vmem:[%s3365_s28 + $0x1cd0] sm:$0xff] }
  0x70   : > { %547 = vst [vmem:[%s3370_s29 + $0x5c0] sm:$0xff] %v546_v56  ;;  %549 = vst [vmem:[%s3370_s29 + $0x5c8] sm:$0xff] %v548_v57  ;;  %v552_v59 = vld [vmem:[%s3365_s28 + $0x1cd8] sm:$0xff]  ;;  %v554_v60 = vld [vmem:[%s3365_s28 + $0x1ce0] sm:$0xff] }
  0x71   : > { %551 = vst [vmem:[%s3370_s29 + $0x5d0] sm:$0xff] %v550_v58  ;;  %553 = vst [vmem:[%s3370_s29 + $0x5d8] sm:$0xff] %v552_v59  ;;  %v556_v61 = vld [vmem:[%s3365_s28 + $0x1ce8] sm:$0xff]  ;;  %v558_v62 = vld [vmem:[%s3365_s28 + $0x1cf0] sm:$0xff] }
  0x72   : > { %555 = vst [vmem:[%s3370_s29 + $0x5e0] sm:$0xff] %v554_v60  ;;  %v560_v63 = vld [vmem:[%s3365_s28 + $0x1cf8] sm:$0xff]  ;;  %557 = vst [vmem:[%s3370_s29 + $0x5e8] sm:$0xff] %v556_v61  ;;  %v562_v0 = vld [vmem:[%s3365_s28 + $0x1e00] sm:$0xff] }
  0x73   : > { %559 = vst [vmem:[%s3370_s29 + $0x5f0] sm:$0xff] %v558_v62  ;;  %561 = vst [vmem:[%s3370_s29 + $0x5f8] sm:$0xff] %v560_v63  ;;  %v564_v1 = vld [vmem:[%s3365_s28 + $0x1e08] sm:$0xff]  ;;  %v566_v2 = vld [vmem:[%s3365_s28 + $0x1e10] sm:$0xff] }
  0x74   : > { %563 = vst [vmem:[%s3370_s29 + $0x600] sm:$0xff] %v562_v0  ;;  %565 = vst [vmem:[%s3370_s29 + $0x608] sm:$0xff] %v564_v1  ;;  %v568_v3 = vld [vmem:[%s3365_s28 + $0x1e18] sm:$0xff]  ;;  %v570_v4 = vld [vmem:[%s3365_s28 + $0x1e20] sm:$0xff] }
  0x75   : > { %567 = vst [vmem:[%s3370_s29 + $0x610] sm:$0xff] %v566_v2  ;;  %v572_v5 = vld [vmem:[%s3365_s28 + $0x1e28] sm:$0xff]  ;;  %569 = vst [vmem:[%s3370_s29 + $0x618] sm:$0xff] %v568_v3  ;;  %v574_v6 = vld [vmem:[%s3365_s28 + $0x1e30] sm:$0xff] }
  0x76   : > { %571 = vst [vmem:[%s3370_s29 + $0x620] sm:$0xff] %v570_v4  ;;  %573 = vst [vmem:[%s3370_s29 + $0x628] sm:$0xff] %v572_v5  ;;  %v576_v7 = vld [vmem:[%s3365_s28 + $0x1e38] sm:$0xff]  ;;  %v578_v8 = vld [vmem:[%s3365_s28 + $0x1f40] sm:$0xff] }
  0x77   : > { %575 = vst [vmem:[%s3370_s29 + $0x630] sm:$0xff] %v574_v6  ;;  %577 = vst [vmem:[%s3370_s29 + $0x638] sm:$0xff] %v576_v7  ;;  %v580_v9 = vld [vmem:[%s3365_s28 + $0x1f48] sm:$0xff]  ;;  %v582_v10 = vld [vmem:[%s3365_s28 + $0x1f50] sm:$0xff] }
  0x78   : > { %579 = vst [vmem:[%s3370_s29 + $0x640] sm:$0xff] %v578_v8  ;;  %v584_v11 = vld [vmem:[%s3365_s28 + $0x1f58] sm:$0xff]  ;;  %581 = vst [vmem:[%s3370_s29 + $0x648] sm:$0xff] %v580_v9  ;;  %v586_v12 = vld [vmem:[%s3365_s28 + $0x1f60] sm:$0xff] }
  0x79   : > { %583 = vst [vmem:[%s3370_s29 + $0x650] sm:$0xff] %v582_v10  ;;  %585 = vst [vmem:[%s3370_s29 + $0x658] sm:$0xff] %v584_v11  ;;  %v588_v13 = vld [vmem:[%s3365_s28 + $0x1f68] sm:$0xff]  ;;  %v590_v14 = vld [vmem:[%s3365_s28 + $0x1f70] sm:$0xff] }
  0x7a   : > { %587 = vst [vmem:[%s3370_s29 + $0x660] sm:$0xff] %v586_v12  ;;  %589 = vst [vmem:[%s3370_s29 + $0x668] sm:$0xff] %v588_v13  ;;  %v592_v15 = vld [vmem:[%s3365_s28 + $0x1f78] sm:$0xff]  ;;  %v594_v16 = vld [vmem:[%s3365_s28 + $0x2080] sm:$0xff] }
  0x7b   : > { %591 = vst [vmem:[%s3370_s29 + $0x670] sm:$0xff] %v590_v14  ;;  %v596_v17 = vld [vmem:[%s3365_s28 + $0x2088] sm:$0xff]  ;;  %593 = vst [vmem:[%s3370_s29 + $0x678] sm:$0xff] %v592_v15  ;;  %v598_v18 = vld [vmem:[%s3365_s28 + $0x2090] sm:$0xff] }
  0x7c   : > { %595 = vst [vmem:[%s3370_s29 + $0x680] sm:$0xff] %v594_v16  ;;  %597 = vst [vmem:[%s3370_s29 + $0x688] sm:$0xff] %v596_v17  ;;  %v600_v19 = vld [vmem:[%s3365_s28 + $0x2098] sm:$0xff]  ;;  %v602_v20 = vld [vmem:[%s3365_s28 + $0x20a0] sm:$0xff] }
  0x7d   : > { %599 = vst [vmem:[%s3370_s29 + $0x690] sm:$0xff] %v598_v18  ;;  %601 = vst [vmem:[%s3370_s29 + $0x698] sm:$0xff] %v600_v19  ;;  %v604_v21 = vld [vmem:[%s3365_s28 + $0x20a8] sm:$0xff]  ;;  %v606_v22 = vld [vmem:[%s3365_s28 + $0x20b0] sm:$0xff] }
  0x7e   : > { %603 = vst [vmem:[%s3370_s29 + $0x6a0] sm:$0xff] %v602_v20  ;;  %v608_v23 = vld [vmem:[%s3365_s28 + $0x20b8] sm:$0xff]  ;;  %605 = vst [vmem:[%s3370_s29 + $0x6a8] sm:$0xff] %v604_v21  ;;  %v610_v24 = vld [vmem:[%s3365_s28 + $0x21c0] sm:$0xff] }
  0x7f   : > { %607 = vst [vmem:[%s3370_s29 + $0x6b0] sm:$0xff] %v606_v22  ;;  %609 = vst [vmem:[%s3370_s29 + $0x6b8] sm:$0xff] %v608_v23  ;;  %v612_v25 = vld [vmem:[%s3365_s28 + $0x21c8] sm:$0xff]  ;;  %v614_v26 = vld [vmem:[%s3365_s28 + $0x21d0] sm:$0xff] }
  0x80   : > { %611 = vst [vmem:[%s3370_s29 + $0x6c0] sm:$0xff] %v610_v24  ;;  %613 = vst [vmem:[%s3370_s29 + $0x6c8] sm:$0xff] %v612_v25  ;;  %v616_v27 = vld [vmem:[%s3365_s28 + $0x21d8] sm:$0xff]  ;;  %v618_v28 = vld [vmem:[%s3365_s28 + $0x21e0] sm:$0xff] }
  0x81   : > { %615 = vst [vmem:[%s3370_s29 + $0x6d0] sm:$0xff] %v614_v26  ;;  %v620_v29 = vld [vmem:[%s3365_s28 + $0x21e8] sm:$0xff]  ;;  %617 = vst [vmem:[%s3370_s29 + $0x6d8] sm:$0xff] %v616_v27  ;;  %v622_v30 = vld [vmem:[%s3365_s28 + $0x21f0] sm:$0xff] }
  0x82   : > { %619 = vst [vmem:[%s3370_s29 + $0x6e0] sm:$0xff] %v618_v28  ;;  %621 = vst [vmem:[%s3370_s29 + $0x6e8] sm:$0xff] %v620_v29  ;;  %v624_v31 = vld [vmem:[%s3365_s28 + $0x21f8] sm:$0xff]  ;;  %v626_v32 = vld [vmem:[%s3365_s28 + $0x2300] sm:$0xff] }
  0x83   : > { %623 = vst [vmem:[%s3370_s29 + $0x6f0] sm:$0xff] %v622_v30  ;;  %625 = vst [vmem:[%s3370_s29 + $0x6f8] sm:$0xff] %v624_v31  ;;  %v628_v33 = vld [vmem:[%s3365_s28 + $0x2308] sm:$0xff]  ;;  %v630_v34 = vld [vmem:[%s3365_s28 + $0x2310] sm:$0xff] }
  0x84   : > { %627 = vst [vmem:[%s3370_s29 + $0x700] sm:$0xff] %v626_v32  ;;  %v632_v35 = vld [vmem:[%s3365_s28 + $0x2318] sm:$0xff]  ;;  %629 = vst [vmem:[%s3370_s29 + $0x708] sm:$0xff] %v628_v33  ;;  %v634_v36 = vld [vmem:[%s3365_s28 + $0x2320] sm:$0xff] }
  0x85   : > { %631 = vst [vmem:[%s3370_s29 + $0x710] sm:$0xff] %v630_v34  ;;  %633 = vst [vmem:[%s3370_s29 + $0x718] sm:$0xff] %v632_v35  ;;  %v636_v37 = vld [vmem:[%s3365_s28 + $0x2328] sm:$0xff]  ;;  %v638_v38 = vld [vmem:[%s3365_s28 + $0x2330] sm:$0xff] }
  0x86   : > { %635 = vst [vmem:[%s3370_s29 + $0x720] sm:$0xff] %v634_v36  ;;  %637 = vst [vmem:[%s3370_s29 + $0x728] sm:$0xff] %v636_v37  ;;  %v640_v39 = vld [vmem:[%s3365_s28 + $0x2338] sm:$0xff]  ;;  %v642_v40 = vld [vmem:[%s3365_s28 + $0x2440] sm:$0xff] }
  0x87   : > { %639 = vst [vmem:[%s3370_s29 + $0x730] sm:$0xff] %v638_v38  ;;  %v644_v41 = vld [vmem:[%s3365_s28 + $0x2448] sm:$0xff]  ;;  %641 = vst [vmem:[%s3370_s29 + $0x738] sm:$0xff] %v640_v39  ;;  %v646_v42 = vld [vmem:[%s3365_s28 + $0x2450] sm:$0xff] }
  0x88   : > { %643 = vst [vmem:[%s3370_s29 + $0x740] sm:$0xff] %v642_v40  ;;  %645 = vst [vmem:[%s3370_s29 + $0x748] sm:$0xff] %v644_v41  ;;  %v648_v43 = vld [vmem:[%s3365_s28 + $0x2458] sm:$0xff]  ;;  %v650_v44 = vld [vmem:[%s3365_s28 + $0x2460] sm:$0xff] }
  0x89   : > { %647 = vst [vmem:[%s3370_s29 + $0x750] sm:$0xff] %v646_v42  ;;  %649 = vst [vmem:[%s3370_s29 + $0x758] sm:$0xff] %v648_v43  ;;  %v652_v45 = vld [vmem:[%s3365_s28 + $0x2468] sm:$0xff]  ;;  %v654_v46 = vld [vmem:[%s3365_s28 + $0x2470] sm:$0xff] }
  0x8a   : > { %651 = vst [vmem:[%s3370_s29 + $0x760] sm:$0xff] %v650_v44  ;;  %v656_v47 = vld [vmem:[%s3365_s28 + $0x2478] sm:$0xff]  ;;  %653 = vst [vmem:[%s3370_s29 + $0x768] sm:$0xff] %v652_v45  ;;  %v658_v48 = vld [vmem:[%s3365_s28 + $0x2580] sm:$0xff] }
  0x8b   : > { %655 = vst [vmem:[%s3370_s29 + $0x770] sm:$0xff] %v654_v46  ;;  %657 = vst [vmem:[%s3370_s29 + $0x778] sm:$0xff] %v656_v47  ;;  %v660_v49 = vld [vmem:[%s3365_s28 + $0x2588] sm:$0xff]  ;;  %v662_v50 = vld [vmem:[%s3365_s28 + $0x2590] sm:$0xff] }
  0x8c   : > { %659 = vst [vmem:[%s3370_s29 + $0x780] sm:$0xff] %v658_v48  ;;  %661 = vst [vmem:[%s3370_s29 + $0x788] sm:$0xff] %v660_v49  ;;  %v664_v51 = vld [vmem:[%s3365_s28 + $0x2598] sm:$0xff]  ;;  %v666_v52 = vld [vmem:[%s3365_s28 + $0x25a0] sm:$0xff] }
  0x8d   : > { %663 = vst [vmem:[%s3370_s29 + $0x790] sm:$0xff] %v662_v50  ;;  %v668_v53 = vld [vmem:[%s3365_s28 + $0x25a8] sm:$0xff]  ;;  %665 = vst [vmem:[%s3370_s29 + $0x798] sm:$0xff] %v664_v51  ;;  %v670_v54 = vld [vmem:[%s3365_s28 + $0x25b0] sm:$0xff] }
  0x8e   : > { %667 = vst [vmem:[%s3370_s29 + $0x7a0] sm:$0xff] %v666_v52  ;;  %669 = vst [vmem:[%s3370_s29 + $0x7a8] sm:$0xff] %v668_v53  ;;  %v672_v55 = vld [vmem:[%s3365_s28 + $0x25b8] sm:$0xff]  ;;  %v674_v56 = vld [vmem:[%s3365_s28 + $0x26c0] sm:$0xff] }
  0x8f   : > { %671 = vst [vmem:[%s3370_s29 + $0x7b0] sm:$0xff] %v670_v54  ;;  %673 = vst [vmem:[%s3370_s29 + $0x7b8] sm:$0xff] %v672_v55  ;;  %v676_v57 = vld [vmem:[%s3365_s28 + $0x26c8] sm:$0xff]  ;;  %v678_v58 = vld [vmem:[%s3365_s28 + $0x26d0] sm:$0xff] }
  0x90   : > { %675 = vst [vmem:[%s3370_s29 + $0x7c0] sm:$0xff] %v674_v56  ;;  %v680_v59 = vld [vmem:[%s3365_s28 + $0x26d8] sm:$0xff]  ;;  %677 = vst [vmem:[%s3370_s29 + $0x7c8] sm:$0xff] %v676_v57  ;;  %v682_v60 = vld [vmem:[%s3365_s28 + $0x26e0] sm:$0xff] }
  0x91   : > { %679 = vst [vmem:[%s3370_s29 + $0x7d0] sm:$0xff] %v678_v58  ;;  %681 = vst [vmem:[%s3370_s29 + $0x7d8] sm:$0xff] %v680_v59  ;;  %v684_v61 = vld [vmem:[%s3365_s28 + $0x26e8] sm:$0xff]  ;;  %v686_v62 = vld [vmem:[%s3365_s28 + $0x26f0] sm:$0xff] }
  0x92   : > { %683 = vst [vmem:[%s3370_s29 + $0x7e0] sm:$0xff] %v682_v60  ;;  %685 = vst [vmem:[%s3370_s29 + $0x7e8] sm:$0xff] %v684_v61  ;;  %v688_v63 = vld [vmem:[%s3365_s28 + $0x26f8] sm:$0xff] }
  0x93   : > { %687 = vst [vmem:[%s3370_s29 + $0x7f0] sm:$0xff] %v686_v62  ;;  %689 = vst [vmem:[%s3370_s29 + $0x7f8] sm:$0xff] %v688_v63 }
  0x94 PF: > { %p2950_p8 = scmp.ge.s32.totalorder %s3295_s16, 1  ;;  %p702_p9 = scmp.lt.s32.totalorder %s3295_s16, 6 }
  0x96   : > { %p703_p10 = pnand %p2950_p8, %p702_p9 }
  0x97   : > { %s709_s30 = sand.u32 (!%p703_p10), 1, %s3279_s12   ;;  %s2953_s20 = sshll.u32 (!%p703_p10), %s3287_s14, 4 }
  0x98   : > { %706 = sbr.rel (%p703_p10) target bundleno = 628 (0x274), region = 51  ;;  %s2951_s8 = sshll.u32 (!%p703_p10), %s709_s30, 11 }
  0x99   : > { %s3894_s9 = scalar_lea.vmem (!%p703_p10), [#allocation2], %s2951_s8  ;;  %p4169_p11 = scmp.lt.s32.totalorder (!%p703_p10), %s2953_s20, 79 }
  0x9a   : > { %s2952_s27 = sshll.u32 (!%p703_p10), %s709_s30, 8 }
  0x9b   : > { %s4205_s12 = scalar_lea.vmem (!%p703_p10), [#allocation3], %s2952_s27 }
  0x9d   : > { %v757_v0 = vld [vmem:[%s4339_s0 + $0x8] sm:$0xff]  ;;  %v759_v1 = vld [vmem:[%s4339_s0 + $0x18] sm:$0xff]  ;;  %v874_v3 = vld [vmem:[%s3894_s9 + $0x380] sm:$0xff]  ;;  %s4352_s20 = smov (!%p4169_p11, %s2953_s20), 79  ;;  %s3216_s28 = sshll.u32 (%p3352_p6), %s3287_s14, 7 }
  0x9e   : > { %v3892_v2 = vpack.c.bf16 %v759_v1, %v757_v0  ;;  %v882_v4 = vld [vmem:[%s3894_s9 + $0x3c0] sm:$0xff]  ;;  %v875_v5 = vld [vmem:[%s3894_s9 + $0x388] sm:$0xff]  ;;  %s4186_s26 = scalar_lea.vmem %s4341_s2, %s4352_s20  ;;  %s4261_s4 = scalar_lea.vmem (%p3352_p6), %s4342_s3, %s3216_s28 }
  0x9f   : > { %v3067_v6 = vcombine.high %v874_v3, %v882_v4  ;;  %v883_v7 = vld [vmem:[%s3894_s9 + $0x3c8] sm:$0xff]  ;;  %v3066_v8 = vcombine.low %v874_v3, %v882_v4  ;;  %v858_v9 = vld [vmem:[%s3894_s9 + $0x300] sm:$0xff] }
  0xa0   : > { %2414 = vmatprep.mubr.bf16.mxu0 %v3892_v2  ;;  %2457 = vmatprep.mubr.bf16.mxu1 %v3892_v2  ;;  %v866_v10 = vld [vmem:[%s3894_s9 + $0x340] sm:$0xff]  ;;  %v3069_v11 = vcombine.high %v875_v5, %v883_v7  ;;  %v3068_v12 = vcombine.low %v875_v5, %v883_v7  ;;  %v859_v14 = vld [vmem:[%s3894_s9 + $0x308] sm:$0xff] }
  0xa1   : > { %v3051_v13 = vcombine.high %v858_v9, %v866_v10  ;;  %v867_v15 = vld [vmem:[%s3894_s9 + $0x348] sm:$0xff]  ;;  %v842_v16 = vld [vmem:[%s3894_s9 + $0x280] sm:$0xff]  ;;  %2382 = vmatprep.subr.bf16.mxu0 %v3067_v6  ;;  %v3050_v21 = vcombine.low %v858_v9, %v866_v10 }
  0xa2   : > { %v3053_v17 = vcombine.high %v859_v14, %v867_v15  ;;  %v850_v18 = vld [vmem:[%s3894_s9 + $0x2c0] sm:$0xff]  ;;  %v843_v19 = vld [vmem:[%s3894_s9 + $0x288] sm:$0xff]  ;;  %2425 = vmatprep.subr.bf16.mxu1 %v3069_v11  ;;  %2383 = vmatpush1.bf16.msra.mxu0 %v3066_v8  ;;  %v3052_v22 = vcombine.low %v859_v14, %v867_v15 }
  0xa3   : > { %v851_v20 = vld [vmem:[%s3894_s9 + $0x2c8] sm:$0xff]  ;;  %2426 = vmatpush1.bf16.msra.mxu1 %v3068_v12  ;;  %2384 = vmatprep.subr.bf16.mxu0 %v3051_v13  ;;  %v3035_v23 = vcombine.high %v842_v16, %v850_v18  ;;  %v826_v25 = vld [vmem:[%s3894_s9 + $0x200] sm:$0xff]  ;;  %v3034_v29 = vcombine.low %v842_v16, %v850_v18 }
  0xa4   : > { %2427 = vmatprep.subr.bf16.mxu1 %v3053_v17  ;;  %v3037_v24 = vcombine.high %v843_v19, %v851_v20  ;;  %v834_v26 = vld [vmem:[%s3894_s9 + $0x240] sm:$0xff]  ;;  %v827_v27 = vld [vmem:[%s3894_s9 + $0x208] sm:$0xff]  ;;  %v3036_v30 = vcombine.low %v843_v19, %v851_v20 }
  0xa5   : > { %v835_v28 = vld [vmem:[%s3894_s9 + $0x248] sm:$0xff]  ;;  %v3019_v31 = vcombine.high %v826_v25, %v834_v26  ;;  %v810_v33 = vld [vmem:[%s3894_s9 + $0x180] sm:$0xff]  ;;  %v3018_v37 = vcombine.low %v826_v25, %v834_v26 }
  0xa6   : > { %2385 = vmatpush1.bf16.msra.mxu0 %v3050_v21  ;;  %v3021_v32 = vcombine.high %v827_v27, %v835_v28  ;;  %v818_v34 = vld [vmem:[%s3894_s9 + $0x1c0] sm:$0xff]  ;;  %v811_v35 = vld [vmem:[%s3894_s9 + $0x188] sm:$0xff]  ;;  %v3020_v38 = vcombine.low %v827_v27, %v835_v28 }
  0xa7   : > { %2428 = vmatpush1.bf16.msra.mxu1 %v3052_v22  ;;  %2386 = vmatprep.subr.bf16.mxu0 %v3035_v23  ;;  %v819_v36 = vld [vmem:[%s3894_s9 + $0x1c8] sm:$0xff]  ;;  %v3003_v39 = vcombine.high %v810_v33, %v818_v34  ;;  %v794_v41 = vld [vmem:[%s3894_s9 + $0x100] sm:$0xff]  ;;  %v3002_v45 = vcombine.low %v810_v33, %v818_v34 }
  0xa8   : > { %2429 = vmatprep.subr.bf16.mxu1 %v3037_v24  ;;  %v3005_v40 = vcombine.high %v811_v35, %v819_v36  ;;  %v802_v42 = vld [vmem:[%s3894_s9 + $0x140] sm:$0xff]  ;;  %v795_v43 = vld [vmem:[%s3894_s9 + $0x108] sm:$0xff]  ;;  %v3004_v46 = vcombine.low %v811_v35, %v819_v36 }
  0xa9   : > { %v803_v44 = vld [vmem:[%s3894_s9 + $0x148] sm:$0xff]  ;;  %v2987_v47 = vcombine.high %v794_v41, %v802_v42  ;;  %v778_v49 = vld [vmem:[%s3894_s9 + $0x80] sm:$0xff]  ;;  %v2986_v53 = vcombine.low %v794_v41, %v802_v42 }
  0xaa   : > { %2387 = vmatpush1.bf16.msra.mxu0 %v3034_v29  ;;  %v2989_v48 = vcombine.high %v795_v43, %v803_v44  ;;  %v786_v50 = vld [vmem:[%s3894_s9 + $0xc0] sm:$0xff]  ;;  %v779_v51 = vld [vmem:[%s3894_s9 + $0x88] sm:$0xff]  ;;  %v2988_v54 = vcombine.low %v795_v43, %v803_v44 }
  0xab   : > { %2430 = vmatpush1.bf16.msra.mxu1 %v3036_v30  ;;  %2388 = vmatprep.subr.bf16.mxu0 %v3019_v31  ;;  %v787_v52 = vld [vmem:[%s3894_s9 + $0xc8] sm:$0xff]  ;;  %v2971_v55 = vcombine.high %v778_v49, %v786_v50  ;;  %v762_v57 = vld [vmem:[%s3894_s9] sm:$0xff]  ;;  %v2970_v61 = vcombine.low %v778_v49, %v786_v50 }
  0xac   : > { %2431 = vmatprep.subr.bf16.mxu1 %v3021_v32  ;;  %v2973_v56 = vcombine.high %v779_v51, %v787_v52  ;;  %v770_v58 = vld [vmem:[%s3894_s9 + $0x40] sm:$0xff]  ;;  %v763_v59 = vld [vmem:[%s3894_s9 + $0x8] sm:$0xff]  ;;  %v2972_v62 = vcombine.low %v779_v51, %v787_v52 }
  0xad   : > { %v771_v60 = vld [vmem:[%s3894_s9 + $0x48] sm:$0xff]  ;;  %v2955_v63 = vcombine.high %v762_v57, %v770_v58  ;;  %v1002_v1 = vld [vmem:[%s3894_s9 + $0x780] sm:$0xff]  ;;  %v2954_v6 = vcombine.low %v762_v57, %v770_v58 }
  0xae   : > { %2389 = vmatpush1.bf16.msra.mxu0 %v3018_v37  ;;  %v2957_v0 = vcombine.high %v763_v59, %v771_v60  ;;  %v1010_v3 = vld [vmem:[%s3894_s9 + $0x7c0] sm:$0xff]  ;;  %v1003_v4 = vld [vmem:[%s3894_s9 + $0x788] sm:$0xff]  ;;  %v2956_v7 = vcombine.low %v763_v59, %v771_v60 }
  0xaf   : > { %2432 = vmatpush1.bf16.msra.mxu1 %v3020_v38  ;;  %2390 = vmatprep.subr.bf16.mxu0 %v3003_v39  ;;  %v1011_v5 = vld [vmem:[%s3894_s9 + $0x7c8] sm:$0xff]  ;;  %v3195_v8 = vcombine.high %v1002_v1, %v1010_v3  ;;  %v986_v10 = vld [vmem:[%s3894_s9 + $0x700] sm:$0xff]  ;;  %v3194_v14 = vcombine.low %v1002_v1, %v1010_v3  ;;  %v876_v3 = vld [vmem:[%s3894_s9 + $0x390] sm:$0xff] }
  0xb0   : > { %2433 = vmatprep.subr.bf16.mxu1 %v3005_v40  ;;  %v3197_v9 = vcombine.high %v1003_v4, %v1011_v5  ;;  %v994_v11 = vld [vmem:[%s3894_s9 + $0x740] sm:$0xff]  ;;  %v987_v12 = vld [vmem:[%s3894_s9 + $0x708] sm:$0xff]  ;;  %v3196_v15 = vcombine.low %v1003_v4, %v1011_v5  ;;  %v884_v4 = vld [vmem:[%s3894_s9 + $0x3d0] sm:$0xff] }
  0xb1   : > { %v995_v13 = vld [vmem:[%s3894_s9 + $0x748] sm:$0xff]  ;;  %v3179_v16 = vcombine.high %v986_v10, %v994_v11  ;;  %v970_v18 = vld [vmem:[%s3894_s9 + $0x680] sm:$0xff]  ;;  %v3178_v22 = vcombine.low %v986_v10, %v994_v11  ;;  %v877_v5 = vld [vmem:[%s3894_s9 + $0x398] sm:$0xff]  ;;  %v3071_v11 = vcombine.high %v876_v3, %v884_v4 }
  0xb2   : > { %2391 = vmatpush1.bf16.msra.mxu0 %v3002_v45  ;;  %v3181_v17 = vcombine.high %v987_v12, %v995_v13  ;;  %v978_v19 = vld [vmem:[%s3894_s9 + $0x6c0] sm:$0xff]  ;;  %v971_v20 = vld [vmem:[%s3894_s9 + $0x688] sm:$0xff]  ;;  %v3180_v23 = vcombine.low %v987_v12, %v995_v13  ;;  %v860_v13 = vld [vmem:[%s3894_s9 + $0x310] sm:$0xff] }
  0xb3   : > { %2434 = vmatpush1.bf16.msra.mxu1 %v3004_v46  ;;  %2392 = vmatprep.subr.bf16.mxu0 %v2987_v47  ;;  %v979_v21 = vld [vmem:[%s3894_s9 + $0x6c8] sm:$0xff]  ;;  %v3163_v24 = vcombine.high %v970_v18, %v978_v19  ;;  %v954_v26 = vld [vmem:[%s3894_s9 + $0x600] sm:$0xff]  ;;  %v3162_v30 = vcombine.low %v970_v18, %v978_v19  ;;  %v3070_v18 = vcombine.low %v876_v3, %v884_v4 }
  0xb4   : > { %2435 = vmatprep.subr.bf16.mxu1 %v2989_v48  ;;  %v3165_v25 = vcombine.high %v971_v20, %v979_v21  ;;  %v962_v27 = vld [vmem:[%s3894_s9 + $0x640] sm:$0xff]  ;;  %v955_v28 = vld [vmem:[%s3894_s9 + $0x608] sm:$0xff]  ;;  %v3164_v31 = vcombine.low %v971_v20, %v979_v21 }
  0xb5   : > { %v963_v29 = vld [vmem:[%s3894_s9 + $0x648] sm:$0xff]  ;;  %v3147_v32 = vcombine.high %v954_v26, %v962_v27  ;;  %v938_v34 = vld [vmem:[%s3894_s9 + $0x580] sm:$0xff]  ;;  %v3146_v38 = vcombine.low %v954_v26, %v962_v27 }
  0xb6   : > { %2393 = vmatpush1.bf16.msra.mxu0 %v2986_v53  ;;  %v3149_v33 = vcombine.high %v955_v28, %v963_v29  ;;  %v946_v35 = vld [vmem:[%s3894_s9 + $0x5c0] sm:$0xff]  ;;  %v939_v36 = vld [vmem:[%s3894_s9 + $0x588] sm:$0xff]  ;;  %v3148_v39 = vcombine.low %v955_v28, %v963_v29 }
  0xb7   : > { %2436 = vmatpush1.bf16.msra.mxu1 %v2988_v54  ;;  %2394 = vmatprep.subr.bf16.mxu0 %v2971_v55  ;;  %v947_v37 = vld [vmem:[%s3894_s9 + $0x5c8] sm:$0xff]  ;;  %v3131_v40 = vcombine.high %v938_v34, %v946_v35  ;;  %v922_v42 = vld [vmem:[%s3894_s9 + $0x500] sm:$0xff]  ;;  %v3130_v46 = vcombine.low %v938_v34, %v946_v35 }
  0xb8   : > { %2437 = vmatprep.subr.bf16.mxu1 %v2973_v56  ;;  %v3133_v41 = vcombine.high %v939_v36, %v947_v37  ;;  %v930_v43 = vld [vmem:[%s3894_s9 + $0x540] sm:$0xff]  ;;  %v923_v44 = vld [vmem:[%s3894_s9 + $0x508] sm:$0xff]  ;;  %v3132_v47 = vcombine.low %v939_v36, %v947_v37 }
  0xb9   : > { %v931_v45 = vld [vmem:[%s3894_s9 + $0x548] sm:$0xff]  ;;  %v3115_v48 = vcombine.high %v922_v42, %v930_v43  ;;  %v906_v50 = vld [vmem:[%s3894_s9 + $0x480] sm:$0xff]  ;;  %v3114_v54 = vcombine.low %v922_v42, %v930_v43 }
  0xba   : > { %2395 = vmatpush1.bf16.msra.mxu0 %v2970_v61  ;;  %v3117_v49 = vcombine.high %v923_v44, %v931_v45  ;;  %v914_v51 = vld [vmem:[%s3894_s9 + $0x4c0] sm:$0xff]  ;;  %v907_v52 = vld [vmem:[%s3894_s9 + $0x488] sm:$0xff]  ;;  %v3116_v55 = vcombine.low %v923_v44, %v931_v45 }
  0xbb   : > { %2438 = vmatpush1.bf16.msra.mxu1 %v2972_v62  ;;  %2396 = vmatprep.subr.bf16.mxu0 %v2955_v63  ;;  %v915_v53 = vld [vmem:[%s3894_s9 + $0x4c8] sm:$0xff]  ;;  %v3099_v56 = vcombine.high %v906_v50, %v914_v51  ;;  %v890_v58 = vld [vmem:[%s3894_s9 + $0x400] sm:$0xff]  ;;  %v3098_v62 = vcombine.low %v906_v50, %v914_v51 }
  0xbc   : > { %2439 = vmatprep.subr.bf16.mxu1 %v2957_v0  ;;  %v3101_v57 = vcombine.high %v907_v52, %v915_v53  ;;  %v898_v59 = vld [vmem:[%s3894_s9 + $0x440] sm:$0xff]  ;;  %v891_v60 = vld [vmem:[%s3894_s9 + $0x408] sm:$0xff]  ;;  %v3100_v63 = vcombine.low %v907_v52, %v915_v53 }
  0xbd   : > { %v899_v61 = vld [vmem:[%s3894_s9 + $0x448] sm:$0xff]  ;;  %v3083_v0 = vcombine.high %v890_v58, %v898_v59 }
  0xbe   : > { %2397 = vmatpush1.bf16.msra.mxu0 %v2954_v6  ;;  %v3085_v1 = vcombine.high %v891_v60, %v899_v61  ;;  %v885_v6 = vld [vmem:[%s3894_s9 + $0x3d8] sm:$0xff]  ;;  %v3084_v10 = vcombine.low %v891_v60, %v899_v61 }
  0xbf   : > { %2440 = vmatpush1.bf16.msra.mxu1 %v2956_v7  ;;  %2398 = vmatprep.subr.bf16.mxu0 %v3195_v8  ;;  %v3082_v7 = vcombine.low %v890_v58, %v898_v59  ;;  %v756_v8 = vld [vmem:[%s4339_s0] sm:$0xff]  ;;  %v3073_v12 = vcombine.high %v877_v5, %v885_v6  ;;  %v3072_v19 = vcombine.low %v877_v5, %v885_v6 }
  0xc0   : > { %2441 = vmatprep.subr.bf16.mxu1 %v3197_v9  ;;  %v758_v9 = vld [vmem:[%s4339_s0 + $0x10] sm:$0xff] }
  0xc2   : > { %2399 = vmatpush2.bf16.msra.mxu0 %v3194_v14  ;;  %v868_v14 = vld [vmem:[%s3894_s9 + $0x350] sm:$0xff] }
  0xc3   : > { %2442 = vmatpush2.bf16.msra.mxu1 %v3196_v15  ;;  %2400 = vmatprep.subr.bf16.mxu0 %v3179_v16  ;;  %v3974_v15 = vpack.c.bf16 %v758_v9, %v756_v8  ;;  %v861_v16 = vld [vmem:[%s3894_s9 + $0x318] sm:$0xff]  ;;  %v3055_v20 = vcombine.high %v860_v13, %v868_v14  ;;  %v3054_v26 = vcombine.low %v860_v13, %v868_v14  ;;  %v1012_v8 = vld [vmem:[%s3894_s9 + $0x7d0] sm:$0xff] }
  0xc4   : > { %2443 = vmatprep.subr.bf16.mxu1 %v3181_v17  ;;  %v869_v17 = vld [vmem:[%s3894_s9 + $0x358] sm:$0xff] }
  0xc5   : > { %v3057_v21 = vcombine.high %v861_v16, %v869_v17  ;;  %v3056_v27 = vcombine.low %v861_v16, %v869_v17  ;;  %v1005_v9 = vld [vmem:[%s3894_s9 + $0x798] sm:$0xff]  ;;  %v988_v16 = vld [vmem:[%s3894_s9 + $0x710] sm:$0xff] }
  0xc6   : > { %2401 = vmatpush2.bf16.msra.mxu0 %v3178_v22  ;;  %v844_v22 = vld [vmem:[%s3894_s9 + $0x290] sm:$0xff] }
  0xc7   : > { %2444 = vmatpush2.bf16.msra.mxu1 %v3180_v23  ;;  %2402 = vmatprep.subr.bf16.mxu0 %v3163_v24  ;;  %v852_v23 = vld [vmem:[%s3894_s9 + $0x2d0] sm:$0xff]  ;;  %v845_v24 = vld [vmem:[%s3894_s9 + $0x298] sm:$0xff] }
  0xc8   : > { %2445 = vmatprep.subr.bf16.mxu1 %v3165_v25  ;;  %v853_v25 = vld [vmem:[%s3894_s9 + $0x2d8] sm:$0xff]  ;;  %v3039_v28 = vcombine.high %v844_v22, %v852_v23  ;;  %v3038_v34 = vcombine.low %v844_v22, %v852_v23  ;;  %v996_v17 = vld [vmem:[%s3894_s9 + $0x750] sm:$0xff] }
  0xc9   : > { %v3041_v29 = vcombine.high %v845_v24, %v853_v25  ;;  %v3040_v35 = vcombine.low %v845_v24, %v853_v25  ;;  %v3183_v22 = vcombine.high %v988_v16, %v996_v17  ;;  %v972_v24 = vld [vmem:[%s3894_s9 + $0x690] sm:$0xff] }
  0xca   : > { %2403 = vmatpush2.bf16.msra.mxu0 %v3162_v30  ;;  %v828_v30 = vld [vmem:[%s3894_s9 + $0x210] sm:$0xff] }
  0xcb   : > { %2446 = vmatpush2.bf16.msra.mxu1 %v3164_v31  ;;  %2404 = vmatprep.subr.bf16.mxu0 %v3147_v32  ;;  %v836_v31 = vld [vmem:[%s3894_s9 + $0x250] sm:$0xff]  ;;  %v829_v32 = vld [vmem:[%s3894_s9 + $0x218] sm:$0xff] }
  0xcc   : > { %2447 = vmatprep.subr.bf16.mxu1 %v3149_v33  ;;  %v837_v33 = vld [vmem:[%s3894_s9 + $0x258] sm:$0xff]  ;;  %v3023_v36 = vcombine.high %v828_v30, %v836_v31  ;;  %v3022_v42 = vcombine.low %v828_v30, %v836_v31  ;;  %v980_v25 = vld [vmem:[%s3894_s9 + $0x6d0] sm:$0xff] }
  0xcd   : > { %v3025_v37 = vcombine.high %v829_v32, %v837_v33  ;;  %v3024_v43 = vcombine.low %v829_v32, %v837_v33  ;;  %v3167_v30 = vcombine.high %v972_v24, %v980_v25  ;;  %v956_v32 = vld [vmem:[%s3894_s9 + $0x610] sm:$0xff] }
  0xce   : > { %2405 = vmatpush2.bf16.msra.mxu0 %v3146_v38  ;;  %v812_v38 = vld [vmem:[%s3894_s9 + $0x190] sm:$0xff] }
  0xcf   : > { %2448 = vmatpush2.bf16.msra.mxu1 %v3148_v39  ;;  %2406 = vmatprep.subr.bf16.mxu0 %v3131_v40  ;;  %v820_v39 = vld [vmem:[%s3894_s9 + $0x1d0] sm:$0xff]  ;;  %v813_v40 = vld [vmem:[%s3894_s9 + $0x198] sm:$0xff] }
  0xd0   : > { %2449 = vmatprep.subr.bf16.mxu1 %v3133_v41  ;;  %v821_v41 = vld [vmem:[%s3894_s9 + $0x1d8] sm:$0xff]  ;;  %v3007_v44 = vcombine.high %v812_v38, %v820_v39  ;;  %v3006_v50 = vcombine.low %v812_v38, %v820_v39  ;;  %v964_v33 = vld [vmem:[%s3894_s9 + $0x650] sm:$0xff] }
  0xd1   : > { %v3009_v45 = vcombine.high %v813_v40, %v821_v41  ;;  %v3008_v51 = vcombine.low %v813_v40, %v821_v41  ;;  %v3151_v38 = vcombine.high %v956_v32, %v964_v33  ;;  %v940_v40 = vld [vmem:[%s3894_s9 + $0x590] sm:$0xff] }
  0xd2   : > { %2407 = vmatpush2.bf16.msra.mxu0 %v3130_v46  ;;  %v796_v46 = vld [vmem:[%s3894_s9 + $0x110] sm:$0xff] }
  0xd3   : > { %2450 = vmatpush2.bf16.msra.mxu1 %v3132_v47  ;;  %2408 = vmatprep.subr.bf16.mxu0 %v3115_v48  ;;  %v804_v47 = vld [vmem:[%s3894_s9 + $0x150] sm:$0xff]  ;;  %v797_v48 = vld [vmem:[%s3894_s9 + $0x118] sm:$0xff] }
  0xd4   : > { %2451 = vmatprep.subr.bf16.mxu1 %v3117_v49  ;;  %v805_v49 = vld [vmem:[%s3894_s9 + $0x158] sm:$0xff]  ;;  %v2991_v52 = vcombine.high %v796_v46, %v804_v47  ;;  %v2990_v58 = vcombine.low %v796_v46, %v804_v47  ;;  %v948_v41 = vld [vmem:[%s3894_s9 + $0x5d0] sm:$0xff] }
  0xd5   : > { %v2993_v53 = vcombine.high %v797_v48, %v805_v49  ;;  %v2992_v59 = vcombine.low %v797_v48, %v805_v49  ;;  %v3135_v46 = vcombine.high %v940_v40, %v948_v41  ;;  %v924_v48 = vld [vmem:[%s3894_s9 + $0x510] sm:$0xff] }
  0xd6   : > { %2409 = vmatpush2.bf16.msra.mxu0 %v3114_v54  ;;  %v780_v54 = vld [vmem:[%s3894_s9 + $0x90] sm:$0xff] }
  0xd7   : > { %2452 = vmatpush2.bf16.msra.mxu1 %v3116_v55  ;;  %2410 = vmatprep.subr.bf16.mxu0 %v3099_v56  ;;  %v788_v55 = vld [vmem:[%s3894_s9 + $0xd0] sm:$0xff]  ;;  %v781_v56 = vld [vmem:[%s3894_s9 + $0x98] sm:$0xff] }
  0xd8   : > { %2453 = vmatprep.subr.bf16.mxu1 %v3101_v57  ;;  %v789_v57 = vld [vmem:[%s3894_s9 + $0xd8] sm:$0xff]  ;;  %v2975_v60 = vcombine.high %v780_v54, %v788_v55  ;;  %v2974_v3 = vcombine.low %v780_v54, %v788_v55  ;;  %v932_v49 = vld [vmem:[%s3894_s9 + $0x550] sm:$0xff] }
  0xd9   : > { %v2977_v61 = vcombine.high %v781_v56, %v789_v57  ;;  %v2976_v4 = vcombine.low %v781_v56, %v789_v57  ;;  %v3119_v54 = vcombine.high %v924_v48, %v932_v49  ;;  %v908_v56 = vld [vmem:[%s3894_s9 + $0x490] sm:$0xff] }
  0xda   : > { %2411 = vmatpush2.bf16.msra.mxu0 %v3098_v62  ;;  %v764_v62 = vld [vmem:[%s3894_s9 + $0x10] sm:$0xff] }
  0xdb   : > { %2454 = vmatpush2.bf16.msra.mxu1 %v3100_v63  ;;  %2412 = vmatprep.subr.bf16.mxu0 %v3083_v0  ;;  %v772_v63 = vld [vmem:[%s3894_s9 + $0x50] sm:$0xff]  ;;  %v765_v0 = vld [vmem:[%s3894_s9 + $0x18] sm:$0xff] }
  0xdc   : > { %2455 = vmatprep.subr.bf16.mxu1 %v3085_v1  ;;  %v773_v1 = vld [vmem:[%s3894_s9 + $0x58] sm:$0xff]  ;;  %v2959_v5 = vcombine.high %v764_v62, %v772_v63  ;;  %v916_v57 = vld [vmem:[%s3894_s9 + $0x4d0] sm:$0xff] }
  0xdd   : > { %v2961_v6 = vcombine.high %v765_v0, %v773_v1 }
  0xde   : > { %2413 = vmatpush2.bf16.msra.mxu0 %v3082_v7  ;;  %v1004_v7 = vld [vmem:[%s3894_s9 + $0x790] sm:$0xff] }
  0xdf   : > { %2456 = vmatpush2.bf16.msra.mxu1 %v3084_v10  ;;  %2468 = vmatprep.subr.bf16.mxu0 %v3071_v11  ;;  %v1013_v10 = vld [vmem:[%s3894_s9 + $0x7d8] sm:$0xff]  ;;  %v2958_v11 = vcombine.low %v764_v62, %v772_v63  ;;  %v3199_v13 = vcombine.high %v1004_v7, %v1012_v8  ;;  %v3103_v62 = vcombine.high %v908_v56, %v916_v57 }
  0xe0   : > { %2511 = vmatprep.subr.bf16.mxu1 %v3073_v12  ;;  %v2960_v12 = vcombine.low %v765_v0, %v773_v1  ;;  %v3201_v14 = vcombine.high %v1005_v9, %v1013_v10  ;;  %v892_v0 = vld [vmem:[%s3894_s9 + $0x410] sm:$0xff] }
  0xe1   : > { %2415 = vmatmul.mubr.bf16.vlgmr.msra.gmra.mxu0 %v3974_v15  ;;  %v900_v1 = vld [vmem:[%s3894_s9 + $0x450] sm:$0xff] }
  0xe2   : > { %2458 = vmatmul.mubr.bf16.vlgmr.msra.gmra.mxu1 %v3974_v15  ;;  %2469 = vmatpush1.bf16.msra.mxu0 %v3070_v18  ;;  %v989_v18 = vld [vmem:[%s3894_s9 + $0x718] sm:$0xff] }
  0xe3   : > { %2512 = vmatpush1.bf16.msra.mxu1 %v3072_v19  ;;  %2470 = vmatprep.subr.bf16.mxu0 %v3055_v20  ;;  %v997_v19 = vld [vmem:[%s3894_s9 + $0x758] sm:$0xff]  ;;  %v3198_v20 = vcombine.low %v1004_v7, %v1012_v8  ;;  %v3087_v7 = vcombine.high %v892_v0, %v900_v1 }
  0xe4   : > { %2513 = vmatprep.subr.bf16.mxu1 %v3057_v21  ;;  %2500 = vmatprep.mubr.bf16.mxu0 %v3892_v2  ;;  %v3200_v21 = vcombine.low %v1005_v9, %v1013_v10  ;;  %v3185_v23 = vcombine.high %v989_v18, %v997_v19  ;;  %v878_v9 = vld [vmem:[%s3894_s9 + $0x3a0] sm:$0xff] }
  0xe5   : > { %2543 = vmatprep.mubr.bf16.mxu1 %v3892_v2  ;;  %v886_v10 = vld [vmem:[%s3894_s9 + $0x3e0] sm:$0xff] }
  0xe6   : > { %2471 = vmatpush1.bf16.msra.mxu0 %v3054_v26  ;;  %v973_v26 = vld [vmem:[%s3894_s9 + $0x698] sm:$0xff] }
  0xe7   : > { %2514 = vmatpush1.bf16.msra.mxu1 %v3056_v27  ;;  %2472 = vmatprep.subr.bf16.mxu0 %v3039_v28  ;;  %v981_v27 = vld [vmem:[%s3894_s9 + $0x6d8] sm:$0xff]  ;;  %v3182_v28 = vcombine.low %v988_v16, %v996_v17  ;;  %v3075_v16 = vcombine.high %v878_v9, %v886_v10 }
  0xe8   : > { %2515 = vmatprep.subr.bf16.mxu1 %v3041_v29  ;;  %v3184_v29 = vcombine.low %v989_v18, %v997_v19  ;;  %v3169_v31 = vcombine.high %v973_v26, %v981_v27  ;;  %v862_v18 = vld [vmem:[%s3894_s9 + $0x320] sm:$0xff] }
  0xe9   : > { %v870_v19 = vld [vmem:[%s3894_s9 + $0x360] sm:$0xff] }
  0xea   : > { %2473 = vmatpush1.bf16.msra.mxu0 %v3038_v34  ;;  %v957_v34 = vld [vmem:[%s3894_s9 + $0x618] sm:$0xff] }
  0xeb   : > { %2516 = vmatpush1.bf16.msra.mxu1 %v3040_v35  ;;  %2474 = vmatprep.subr.bf16.mxu0 %v3023_v36  ;;  %v965_v35 = vld [vmem:[%s3894_s9 + $0x658] sm:$0xff]  ;;  %v3166_v36 = vcombine.low %v972_v24, %v980_v25  ;;  %v3059_v24 = vcombine.high %v862_v18, %v870_v19 }
  0xec   : > { %2517 = vmatprep.subr.bf16.mxu1 %v3025_v37  ;;  %v3168_v37 = vcombine.low %v973_v26, %v981_v27  ;;  %v3153_v39 = vcombine.high %v957_v34, %v965_v35  ;;  %v846_v26 = vld [vmem:[%s3894_s9 + $0x2a0] sm:$0xff] }
  0xed   : > { %v854_v27 = vld [vmem:[%s3894_s9 + $0x2e0] sm:$0xff] }
  0xee   : > { %2475 = vmatpush1.bf16.msra.mxu0 %v3022_v42  ;;  %v941_v42 = vld [vmem:[%s3894_s9 + $0x598] sm:$0xff] }
  0xef   : > { %2518 = vmatpush1.bf16.msra.mxu1 %v3024_v43  ;;  %2476 = vmatprep.subr.bf16.mxu0 %v3007_v44  ;;  %v949_v43 = vld [vmem:[%s3894_s9 + $0x5d8] sm:$0xff]  ;;  %v3150_v44 = vcombine.low %v956_v32, %v964_v33  ;;  %v3043_v32 = vcombine.high %v846_v26, %v854_v27 }
  0xf0   : > { %2519 = vmatprep.subr.bf16.mxu1 %v3009_v45  ;;  %v3152_v45 = vcombine.low %v957_v34, %v965_v35  ;;  %v3137_v47 = vcombine.high %v941_v42, %v949_v43  ;;  %v830_v34 = vld [vmem:[%s3894_s9 + $0x220] sm:$0xff] }
  0xf1   : > { %v838_v35 = vld [vmem:[%s3894_s9 + $0x260] sm:$0xff] }
  0xf2   : > { %2477 = vmatpush1.bf16.msra.mxu0 %v3006_v50  ;;  %v925_v50 = vld [vmem:[%s3894_s9 + $0x518] sm:$0xff] }
  0xf3   : > { %2520 = vmatpush1.bf16.msra.mxu1 %v3008_v51  ;;  %2478 = vmatprep.subr.bf16.mxu0 %v2991_v52  ;;  %v933_v51 = vld [vmem:[%s3894_s9 + $0x558] sm:$0xff]  ;;  %v3134_v52 = vcombine.low %v940_v40, %v948_v41  ;;  %v3027_v40 = vcombine.high %v830_v34, %v838_v35 }
  0xf4   : > { %2521 = vmatprep.subr.bf16.mxu1 %v2993_v53  ;;  %v3136_v53 = vcombine.low %v941_v42, %v949_v43  ;;  %v3121_v55 = vcombine.high %v925_v50, %v933_v51  ;;  %v814_v42 = vld [vmem:[%s3894_s9 + $0x1a0] sm:$0xff] }
  0xf5   : > { %v822_v43 = vld [vmem:[%s3894_s9 + $0x1e0] sm:$0xff] }
  0xf6   : > { %2479 = vmatpush1.bf16.msra.mxu0 %v2990_v58  ;;  %v909_v58 = vld [vmem:[%s3894_s9 + $0x498] sm:$0xff] }
  0xf7   : > { %2522 = vmatpush1.bf16.msra.mxu1 %v2992_v59  ;;  %2480 = vmatprep.subr.bf16.mxu0 %v2975_v60  ;;  %v917_v59 = vld [vmem:[%s3894_s9 + $0x4d8] sm:$0xff]  ;;  %v3118_v60 = vcombine.low %v924_v48, %v932_v49  ;;  %v3011_v48 = vcombine.high %v814_v42, %v822_v43 }
  0xf8   : > { %2523 = vmatprep.subr.bf16.mxu1 %v2977_v61  ;;  %v3120_v61 = vcombine.low %v925_v50, %v933_v51  ;;  %v3105_v63 = vcombine.high %v909_v58, %v917_v59  ;;  %v798_v50 = vld [vmem:[%s3894_s9 + $0x120] sm:$0xff] }
  0xf9   : > { %v806_v51 = vld [vmem:[%s3894_s9 + $0x160] sm:$0xff] }
  0xfa   : > { %2481 = vmatpush1.bf16.msra.mxu0 %v2974_v3  ;;  %v893_v3 = vld [vmem:[%s3894_s9 + $0x418] sm:$0xff] }
  0xfb   : > { %2524 = vmatpush1.bf16.msra.mxu1 %v2976_v4  ;;  %2482 = vmatprep.subr.bf16.mxu0 %v2959_v5  ;;  %v901_v4 = vld [vmem:[%s3894_s9 + $0x458] sm:$0xff]  ;;  %v3102_v5 = vcombine.low %v908_v56, %v916_v57  ;;  %v2995_v56 = vcombine.high %v798_v50, %v806_v51 }
  0xfc   : > { %2525 = vmatprep.subr.bf16.mxu1 %v2961_v6  ;;  %v3104_v6 = vcombine.low %v909_v58, %v917_v59  ;;  %v3089_v8 = vcombine.high %v893_v3, %v901_v4  ;;  %v782_v58 = vld [vmem:[%s3894_s9 + $0xa0] sm:$0xff] }
  0xfd   : > { %v790_v59 = vld [vmem:[%s3894_s9 + $0xe0] sm:$0xff] }
  0xfe   : > { %2483 = vmatpush1.bf16.msra.mxu0 %v2958_v11  ;;  %v879_v11 = vld [vmem:[%s3894_s9 + $0x3a8] sm:$0xff] }
  0xff   : > { %2526 = vmatpush1.bf16.msra.mxu1 %v2960_v12  ;;  %2484 = vmatprep.subr.bf16.mxu0 %v3199_v13  ;;  %v887_v12 = vld [vmem:[%s3894_s9 + $0x3e8] sm:$0xff]  ;;  %v3086_v13 = vcombine.low %v892_v0, %v900_v1  ;;  %v2979_v0 = vcombine.high %v782_v58, %v790_v59 }
 0x100   : > { %2527 = vmatprep.subr.bf16.mxu1 %v3201_v14  ;;  %v3088_v14 = vcombine.low %v893_v3, %v901_v4  ;;  %v3077_v17 = vcombine.high %v879_v11, %v887_v12  ;;  %v766_v3 = vld [vmem:[%s3894_s9 + $0x20] sm:$0xff] }
 0x101   : > { %v774_v4 = vld [vmem:[%s3894_s9 + $0x60] sm:$0xff] }
 0x102   : > { %2485 = vmatpush2.bf16.msra.mxu0 %v3198_v20  ;;  %v863_v20 = vld [vmem:[%s3894_s9 + $0x328] sm:$0xff] }
 0x103   : > { %2528 = vmatpush2.bf16.msra.mxu1 %v3200_v21  ;;  %2486 = vmatprep.subr.bf16.mxu0 %v3183_v22  ;;  %v871_v21 = vld [vmem:[%s3894_s9 + $0x368] sm:$0xff]  ;;  %v3074_v22 = vcombine.low %v878_v9, %v886_v10  ;;  %v2963_v9 = vcombine.high %v766_v3, %v774_v4 }
 0x104   : > { %2529 = vmatprep.subr.bf16.mxu1 %v3185_v23  ;;  %v3076_v23 = vcombine.low %v879_v11, %v887_v12  ;;  %v3061_v25 = vcombine.high %v863_v20, %v871_v21  ;;  %v1006_v11 = vld [vmem:[%s3894_s9 + $0x7a0] sm:$0xff] }
 0x105   : > { %v1014_v12 = vld [vmem:[%s3894_s9 + $0x7e0] sm:$0xff] }
 0x106   : > { %2487 = vmatpush2.bf16.msra.mxu0 %v3182_v28  ;;  %v847_v28 = vld [vmem:[%s3894_s9 + $0x2a8] sm:$0xff] }
 0x107   : > { %2530 = vmatpush2.bf16.msra.mxu1 %v3184_v29  ;;  %2488 = vmatprep.subr.bf16.mxu0 %v3167_v30  ;;  %v855_v29 = vld [vmem:[%s3894_s9 + $0x2e8] sm:$0xff]  ;;  %v3058_v30 = vcombine.low %v862_v18, %v870_v19  ;;  %v3203_v18 = vcombine.high %v1006_v11, %v1014_v12 }
 0x108   : > { %2531 = vmatprep.subr.bf16.mxu1 %v3169_v31  ;;  %v3060_v31 = vcombine.low %v863_v20, %v871_v21  ;;  %v3045_v33 = vcombine.high %v847_v28, %v855_v29  ;;  %v990_v20 = vld [vmem:[%s3894_s9 + $0x720] sm:$0xff] }
 0x109   : > { %v998_v21 = vld [vmem:[%s3894_s9 + $0x760] sm:$0xff] }
 0x10a   : > { %2489 = vmatpush2.bf16.msra.mxu0 %v3166_v36  ;;  %v831_v36 = vld [vmem:[%s3894_s9 + $0x228] sm:$0xff] }
 0x10b   : > { %2532 = vmatpush2.bf16.msra.mxu1 %v3168_v37  ;;  %2490 = vmatprep.subr.bf16.mxu0 %v3151_v38  ;;  %v839_v37 = vld [vmem:[%s3894_s9 + $0x268] sm:$0xff]  ;;  %v3042_v38 = vcombine.low %v846_v26, %v854_v27  ;;  %v3187_v26 = vcombine.high %v990_v20, %v998_v21 }
 0x10c   : > { %2533 = vmatprep.subr.bf16.mxu1 %v3153_v39  ;;  %v3044_v39 = vcombine.low %v847_v28, %v855_v29  ;;  %v3029_v41 = vcombine.high %v831_v36, %v839_v37  ;;  %v974_v28 = vld [vmem:[%s3894_s9 + $0x6a0] sm:$0xff] }
 0x10d   : > { %v982_v29 = vld [vmem:[%s3894_s9 + $0x6e0] sm:$0xff] }
 0x10e   : > { %2491 = vmatpush2.bf16.msra.mxu0 %v3150_v44  ;;  %v815_v44 = vld [vmem:[%s3894_s9 + $0x1a8] sm:$0xff] }
 0x10f   : > { %2534 = vmatpush2.bf16.msra.mxu1 %v3152_v45  ;;  %2492 = vmatprep.subr.bf16.mxu0 %v3135_v46  ;;  %v823_v45 = vld [vmem:[%s3894_s9 + $0x1e8] sm:$0xff]  ;;  %v3026_v46 = vcombine.low %v830_v34, %v838_v35  ;;  %v3171_v34 = vcombine.high %v974_v28, %v982_v29 }
 0x110   : > { %2535 = vmatprep.subr.bf16.mxu1 %v3137_v47  ;;  %v3028_v47 = vcombine.low %v831_v36, %v839_v37  ;;  %v3013_v49 = vcombine.high %v815_v44, %v823_v45  ;;  %v958_v36 = vld [vmem:[%s3894_s9 + $0x620] sm:$0xff] }
 0x111   : > { %v966_v37 = vld [vmem:[%s3894_s9 + $0x660] sm:$0xff] }
 0x112   : > { %2493 = vmatpush2.bf16.msra.mxu0 %v3134_v52  ;;  %v799_v52 = vld [vmem:[%s3894_s9 + $0x128] sm:$0xff] }
 0x113   : > { %2536 = vmatpush2.bf16.msra.mxu1 %v3136_v53  ;;  %2494 = vmatprep.subr.bf16.mxu0 %v3119_v54  ;;  %v807_v53 = vld [vmem:[%s3894_s9 + $0x168] sm:$0xff]  ;;  %v3010_v54 = vcombine.low %v814_v42, %v822_v43  ;;  %v3155_v42 = vcombine.high %v958_v36, %v966_v37 }
 0x114   : > { %2537 = vmatprep.subr.bf16.mxu1 %v3121_v55  ;;  %v3012_v55 = vcombine.low %v815_v44, %v823_v45  ;;  %v2997_v57 = vcombine.high %v799_v52, %v807_v53  ;;  %v942_v44 = vld [vmem:[%s3894_s9 + $0x5a0] sm:$0xff] }
 0x115   : > { %v950_v45 = vld [vmem:[%s3894_s9 + $0x5e0] sm:$0xff] }
 0x116   : > { %2495 = vmatpush2.bf16.msra.mxu0 %v3118_v60  ;;  %v783_v60 = vld [vmem:[%s3894_s9 + $0xa8] sm:$0xff] }
 0x117   : > { %2538 = vmatpush2.bf16.msra.mxu1 %v3120_v61  ;;  %2496 = vmatprep.subr.bf16.mxu0 %v3103_v62  ;;  %v791_v61 = vld [vmem:[%s3894_s9 + $0xe8] sm:$0xff]  ;;  %v2994_v62 = vcombine.low %v798_v50, %v806_v51  ;;  %v3139_v50 = vcombine.high %v942_v44, %v950_v45 }
 0x118   : > { %2539 = vmatprep.subr.bf16.mxu1 %v3105_v63  ;;  %v2996_v63 = vcombine.low %v799_v52, %v807_v53  ;;  %v2981_v1 = vcombine.high %v783_v60, %v791_v61  ;;  %v926_v52 = vld [vmem:[%s3894_s9 + $0x520] sm:$0xff] }
 0x119   : > { %v934_v53 = vld [vmem:[%s3894_s9 + $0x560] sm:$0xff] }
 0x11a   : > { %2497 = vmatpush2.bf16.msra.mxu0 %v3102_v5  ;;  %v767_v5 = vld [vmem:[%s3894_s9 + $0x28] sm:$0xff] }
 0x11b   : > { %2540 = vmatpush2.bf16.msra.mxu1 %v3104_v6  ;;  %2498 = vmatprep.subr.bf16.mxu0 %v3087_v7  ;;  %v775_v6 = vld [vmem:[%s3894_s9 + $0x68] sm:$0xff]  ;;  %v2978_v7 = vcombine.low %v782_v58, %v790_v59  ;;  %v3123_v58 = vcombine.high %v926_v52, %v934_v53 }
 0x11c   : > { %2541 = vmatprep.subr.bf16.mxu1 %v3089_v8  ;;  %v2980_v8 = vcombine.low %v783_v60, %v791_v61  ;;  %v2965_v10 = vcombine.high %v767_v5, %v775_v6  ;;  %v910_v60 = vld [vmem:[%s3894_s9 + $0x4a0] sm:$0xff] }
 0x11d   : > { %v918_v61 = vld [vmem:[%s3894_s9 + $0x4e0] sm:$0xff] }
 0x11e   : > { %2499 = vmatpush2.bf16.msra.mxu0 %v3086_v13  ;;  %v1007_v13 = vld [vmem:[%s3894_s9 + $0x7a8] sm:$0xff] }
 0x11f   : > { %2542 = vmatpush2.bf16.msra.mxu1 %v3088_v14  ;;  %2554 = vmatprep.subr.bf16.mxu0 %v3075_v16  ;;  %v1015_v14 = vld [vmem:[%s3894_s9 + $0x7e8] sm:$0xff]  ;;  %v2962_v16 = vcombine.low %v766_v3, %v774_v4  ;;  %v3107_v3 = vcombine.high %v910_v60, %v918_v61 }
 0x120   : > { %2597 = vmatprep.subr.bf16.mxu1 %v3077_v17  ;;  %v2964_v17 = vcombine.low %v767_v5, %v775_v6  ;;  %v3205_v19 = vcombine.high %v1007_v13, %v1015_v14  ;;  %v894_v5 = vld [vmem:[%s3894_s9 + $0x420] sm:$0xff] }
 0x121   : > { %2501 = vmatmul.mubr.bf16.vlgmr.msra.gmra.mxu0 %v3974_v15  ;;  %v902_v6 = vld [vmem:[%s3894_s9 + $0x460] sm:$0xff] }
 0x122   : > { %2544 = vmatmul.mubr.bf16.vlgmr.msra.gmra.mxu1 %v3974_v15  ;;  %2555 = vmatpush1.bf16.msra.mxu0 %v3074_v22  ;;  %v991_v22 = vld [vmem:[%s3894_s9 + $0x728] sm:$0xff] }
 0x123   : > { %2598 = vmatpush1.bf16.msra.mxu1 %v3076_v23  ;;  %2556 = vmatprep.subr.bf16.mxu0 %v3059_v24  ;;  %v999_v23 = vld [vmem:[%s3894_s9 + $0x768] sm:$0xff]  ;;  %v3202_v24 = vcombine.low %v1006_v11, %v1014_v12  ;;  %v3091_v11 = vcombine.high %v894_v5, %v902_v6 }
 0x124   : > { %2599 = vmatprep.subr.bf16.mxu1 %v3061_v25  ;;  %2586 = vmatprep.mubr.bf16.mxu0 %v3892_v2  ;;  %v3204_v25 = vcombine.low %v1007_v13, %v1015_v14  ;;  %v3189_v27 = vcombine.high %v991_v22, %v999_v23  ;;  %v880_v13 = vld [vmem:[%s3894_s9 + $0x3b0] sm:$0xff] }
 0x125   : > { %2629 = vmatprep.mubr.bf16.mxu1 %v3892_v2  ;;  %v888_v14 = vld [vmem:[%s3894_s9 + $0x3f0] sm:$0xff] }
 0x126   : > { %2557 = vmatpush1.bf16.msra.mxu0 %v3058_v30  ;;  %v975_v30 = vld [vmem:[%s3894_s9 + $0x6a8] sm:$0xff] }
 0x127   : > { %2600 = vmatpush1.bf16.msra.mxu1 %v3060_v31  ;;  %2558 = vmatprep.subr.bf16.mxu0 %v3043_v32  ;;  %v983_v31 = vld [vmem:[%s3894_s9 + $0x6e8] sm:$0xff]  ;;  %v3186_v32 = vcombine.low %v990_v20, %v998_v21  ;;  %v3079_v20 = vcombine.high %v880_v13, %v888_v14 }
 0x128   : > { %2601 = vmatprep.subr.bf16.mxu1 %v3045_v33  ;;  %v3188_v33 = vcombine.low %v991_v22, %v999_v23  ;;  %v3173_v35 = vcombine.high %v975_v30, %v983_v31  ;;  %v864_v22 = vld [vmem:[%s3894_s9 + $0x330] sm:$0xff] }
 0x129   : > { %v872_v23 = vld [vmem:[%s3894_s9 + $0x370] sm:$0xff] }
 0x12a   : > { %2559 = vmatpush1.bf16.msra.mxu0 %v3042_v38  ;;  %v959_v38 = vld [vmem:[%s3894_s9 + $0x628] sm:$0xff] }
 0x12b   : > { %2602 = vmatpush1.bf16.msra.mxu1 %v3044_v39  ;;  %2560 = vmatprep.subr.bf16.mxu0 %v3027_v40  ;;  %v967_v39 = vld [vmem:[%s3894_s9 + $0x668] sm:$0xff]  ;;  %v3170_v40 = vcombine.low %v974_v28, %v982_v29  ;;  %v3063_v28 = vcombine.high %v864_v22, %v872_v23 }
 0x12c   : > { %2603 = vmatprep.subr.bf16.mxu1 %v3029_v41  ;;  %v3172_v41 = vcombine.low %v975_v30, %v983_v31  ;;  %v3157_v43 = vcombine.high %v959_v38, %v967_v39  ;;  %v848_v30 = vld [vmem:[%s3894_s9 + $0x2b0] sm:$0xff] }
 0x12d   : > { %v856_v31 = vld [vmem:[%s3894_s9 + $0x2f0] sm:$0xff] }
 0x12e   : > { %2561 = vmatpush1.bf16.msra.mxu0 %v3026_v46  ;;  %v943_v46 = vld [vmem:[%s3894_s9 + $0x5a8] sm:$0xff] }
 0x12f   : > { %2604 = vmatpush1.bf16.msra.mxu1 %v3028_v47  ;;  %2562 = vmatprep.subr.bf16.mxu0 %v3011_v48  ;;  %v951_v47 = vld [vmem:[%s3894_s9 + $0x5e8] sm:$0xff]  ;;  %v3154_v48 = vcombine.low %v958_v36, %v966_v37  ;;  %v3047_v36 = vcombine.high %v848_v30, %v856_v31 }
 0x130   : > { %2605 = vmatprep.subr.bf16.mxu1 %v3013_v49  ;;  %v3156_v49 = vcombine.low %v959_v38, %v967_v39  ;;  %v3141_v51 = vcombine.high %v943_v46, %v951_v47  ;;  %v832_v38 = vld [vmem:[%s3894_s9 + $0x230] sm:$0xff] }
 0x131   : > { %v840_v39 = vld [vmem:[%s3894_s9 + $0x270] sm:$0xff] }
 0x132   : > { %2563 = vmatpush1.bf16.msra.mxu0 %v3010_v54  ;;  %v927_v54 = vld [vmem:[%s3894_s9 + $0x528] sm:$0xff] }
 0x133   : > { %2606 = vmatpush1.bf16.msra.mxu1 %v3012_v55  ;;  %2564 = vmatprep.subr.bf16.mxu0 %v2995_v56  ;;  %v935_v55 = vld [vmem:[%s3894_s9 + $0x568] sm:$0xff]  ;;  %v3138_v56 = vcombine.low %v942_v44, %v950_v45  ;;  %v3031_v44 = vcombine.high %v832_v38, %v840_v39 }
 0x134   : > { %2607 = vmatprep.subr.bf16.mxu1 %v2997_v57  ;;  %v3140_v57 = vcombine.low %v943_v46, %v951_v47  ;;  %v3125_v59 = vcombine.high %v927_v54, %v935_v55  ;;  %v816_v46 = vld [vmem:[%s3894_s9 + $0x1b0] sm:$0xff] }
 0x135   : > { %v824_v47 = vld [vmem:[%s3894_s9 + $0x1f0] sm:$0xff] }
 0x136   : > { %2565 = vmatpush1.bf16.msra.mxu0 %v2994_v62  ;;  %v911_v62 = vld [vmem:[%s3894_s9 + $0x4a8] sm:$0xff] }
 0x137   : > { %2608 = vmatpush1.bf16.msra.mxu1 %v2996_v63  ;;  %2566 = vmatprep.subr.bf16.mxu0 %v2979_v0  ;;  %v919_v63 = vld [vmem:[%s3894_s9 + $0x4e8] sm:$0xff]  ;;  %v3122_v0 = vcombine.low %v926_v52, %v934_v53  ;;  %v800_v53 = vld [vmem:[%s3894_s9 + $0x130] sm:$0xff] }
 0x138   : > { %2609 = vmatprep.subr.bf16.mxu1 %v2981_v1  ;;  %v3124_v1 = vcombine.low %v927_v54, %v935_v55  ;;  %v3109_v4 = vcombine.high %v911_v62, %v919_v63  ;;  %v808_v54 = vld [vmem:[%s3894_s9 + $0x170] sm:$0xff]  ;;  %v801_v55 = vld [vmem:[%s3894_s9 + $0x138] sm:$0xff] }
 0x13a   : > { %2567 = vmatpush1.bf16.msra.mxu0 %v2978_v7  ;;  %v895_v7 = vld [vmem:[%s3894_s9 + $0x428] sm:$0xff] }
 0x13b   : > { %2610 = vmatpush1.bf16.msra.mxu1 %v2980_v8  ;;  %2568 = vmatprep.subr.bf16.mxu0 %v2963_v9  ;;  %v903_v8 = vld [vmem:[%s3894_s9 + $0x468] sm:$0xff]  ;;  %v3106_v9 = vcombine.low %v910_v60, %v918_v61  ;;  %v784_v61 = vld [vmem:[%s3894_s9 + $0xb0] sm:$0xff] }
 0x13c   : > { %2611 = vmatprep.subr.bf16.mxu1 %v2965_v10  ;;  %v3108_v10 = vcombine.low %v911_v62, %v919_v63  ;;  %v3093_v12 = vcombine.high %v895_v7, %v903_v8  ;;  %v792_v62 = vld [vmem:[%s3894_s9 + $0xf0] sm:$0xff]  ;;  %v785_v63 = vld [vmem:[%s3894_s9 + $0xb8] sm:$0xff] }
 0x13e   : > { %2569 = vmatpush1.bf16.msra.mxu0 %v2962_v16  ;;  %v881_v16 = vld [vmem:[%s3894_s9 + $0x3b8] sm:$0xff] }
 0x13f   : > { %2612 = vmatpush1.bf16.msra.mxu1 %v2964_v17  ;;  %2570 = vmatprep.subr.bf16.mxu0 %v3203_v18  ;;  %v889_v17 = vld [vmem:[%s3894_s9 + $0x3f8] sm:$0xff]  ;;  %v3090_v18 = vcombine.low %v894_v5, %v902_v6  ;;  %v768_v6 = vld [vmem:[%s3894_s9 + $0x30] sm:$0xff] }
 0x140   : > { %2613 = vmatprep.subr.bf16.mxu1 %v3205_v19  ;;  %v3092_v19 = vcombine.low %v895_v7, %v903_v8  ;;  %v3081_v21 = vcombine.high %v881_v16, %v889_v17  ;;  %v776_v7 = vld [vmem:[%s3894_s9 + $0x70] sm:$0xff]  ;;  %v769_v8 = vld [vmem:[%s3894_s9 + $0x38] sm:$0xff] }
 0x142   : > { %2571 = vmatpush2.bf16.msra.mxu0 %v3202_v24  ;;  %v865_v24 = vld [vmem:[%s3894_s9 + $0x338] sm:$0xff] }
 0x143   : > { %2614 = vmatpush2.bf16.msra.mxu1 %v3204_v25  ;;  %2572 = vmatprep.subr.bf16.mxu0 %v3187_v26  ;;  %v873_v25 = vld [vmem:[%s3894_s9 + $0x378] sm:$0xff]  ;;  %v3078_v26 = vcombine.low %v880_v13, %v888_v14  ;;  %v1008_v14 = vld [vmem:[%s3894_s9 + $0x7b0] sm:$0xff] }
 0x144   : > { %2615 = vmatprep.subr.bf16.mxu1 %v3189_v27  ;;  %v3080_v27 = vcombine.low %v881_v16, %v889_v17  ;;  %v3065_v29 = vcombine.high %v865_v24, %v873_v25  ;;  %v1016_v16 = vld [vmem:[%s3894_s9 + $0x7f0] sm:$0xff]  ;;  %v1009_v17 = vld [vmem:[%s3894_s9 + $0x7b8] sm:$0xff] }
 0x146   : > { %2573 = vmatpush2.bf16.msra.mxu0 %v3186_v32  ;;  %v849_v32 = vld [vmem:[%s3894_s9 + $0x2b8] sm:$0xff] }
 0x147   : > { %2616 = vmatpush2.bf16.msra.mxu1 %v3188_v33  ;;  %2574 = vmatprep.subr.bf16.mxu0 %v3171_v34  ;;  %v857_v33 = vld [vmem:[%s3894_s9 + $0x2f8] sm:$0xff]  ;;  %v3062_v34 = vcombine.low %v864_v22, %v872_v23  ;;  %v992_v23 = vld [vmem:[%s3894_s9 + $0x730] sm:$0xff] }
 0x148   : > { %2617 = vmatprep.subr.bf16.mxu1 %v3173_v35  ;;  %v3064_v35 = vcombine.low %v865_v24, %v873_v25  ;;  %v3049_v37 = vcombine.high %v849_v32, %v857_v33  ;;  %v1000_v24 = vld [vmem:[%s3894_s9 + $0x770] sm:$0xff]  ;;  %v993_v25 = vld [vmem:[%s3894_s9 + $0x738] sm:$0xff] }
 0x14a   : > { %2575 = vmatpush2.bf16.msra.mxu0 %v3170_v40  ;;  %v833_v40 = vld [vmem:[%s3894_s9 + $0x238] sm:$0xff] }
 0x14b   : > { %2618 = vmatpush2.bf16.msra.mxu1 %v3172_v41  ;;  %2576 = vmatprep.subr.bf16.mxu0 %v3155_v42  ;;  %v841_v41 = vld [vmem:[%s3894_s9 + $0x278] sm:$0xff]  ;;  %v3046_v42 = vcombine.low %v848_v30, %v856_v31  ;;  %v976_v31 = vld [vmem:[%s3894_s9 + $0x6b0] sm:$0xff] }
 0x14c   : > { %2619 = vmatprep.subr.bf16.mxu1 %v3157_v43  ;;  %v3048_v43 = vcombine.low %v849_v32, %v857_v33  ;;  %v3033_v45 = vcombine.high %v833_v40, %v841_v41  ;;  %v984_v32 = vld [vmem:[%s3894_s9 + $0x6f0] sm:$0xff]  ;;  %v977_v33 = vld [vmem:[%s3894_s9 + $0x6b8] sm:$0xff] }
 0x14e   : > { %2577 = vmatpush2.bf16.msra.mxu0 %v3154_v48  ;;  %v817_v48 = vld [vmem:[%s3894_s9 + $0x1b8] sm:$0xff] }
 0x14f   : > { %2620 = vmatpush2.bf16.msra.mxu1 %v3156_v49  ;;  %2578 = vmatprep.subr.bf16.mxu0 %v3139_v50  ;;  %v825_v49 = vld [vmem:[%s3894_s9 + $0x1f8] sm:$0xff]  ;;  %v3030_v50 = vcombine.low %v832_v38, %v840_v39  ;;  %v960_v39 = vld [vmem:[%s3894_s9 + $0x630] sm:$0xff] }
 0x150   : > { %2621 = vmatprep.subr.bf16.mxu1 %v3141_v51  ;;  %v3015_v51 = vcombine.high %v816_v46, %v824_v47  ;;  %v3017_v52 = vcombine.high %v817_v48, %v825_v49 }
 0x152   : > { %2579 = vmatpush2.bf16.msra.mxu0 %v3138_v56  ;;  %v809_v56 = vld [vmem:[%s3894_s9 + $0x178] sm:$0xff] }
 0x153   : > { %2622 = vmatpush2.bf16.msra.mxu1 %v3140_v57  ;;  %2580 = vmatprep.subr.bf16.mxu0 %v3123_v58  ;;  %v3014_v57 = vcombine.low %v816_v46, %v824_v47  ;;  %v3016_v58 = vcombine.low %v817_v48, %v825_v49  ;;  %v3001_v60 = vcombine.high %v801_v55, %v809_v56  ;;  %v944_v47 = vld [vmem:[%s3894_s9 + $0x5b0] sm:$0xff]  ;;  %v945_v49 = vld [vmem:[%s3894_s9 + $0x5b8] sm:$0xff] }
 0x154   : > { %2623 = vmatprep.subr.bf16.mxu1 %v3125_v59  ;;  %v2999_v59 = vcombine.high %v800_v53, %v808_v54  ;;  %v952_v48 = vld [vmem:[%s3894_s9 + $0x5f0] sm:$0xff] }
 0x156   : > { %2581 = vmatpush2.bf16.msra.mxu0 %v3122_v0  ;;  %v793_v0 = vld [vmem:[%s3894_s9 + $0xf8] sm:$0xff] }
 0x157   : > { %2624 = vmatpush2.bf16.msra.mxu1 %v3124_v1  ;;  %2582 = vmatprep.subr.bf16.mxu0 %v3107_v3  ;;  %v2998_v1 = vcombine.low %v800_v53, %v808_v54  ;;  %v3000_v3 = vcombine.low %v801_v55, %v809_v56  ;;  %v2985_v5 = vcombine.high %v785_v63, %v793_v0  ;;  %v928_v54 = vld [vmem:[%s3894_s9 + $0x530] sm:$0xff]  ;;  %v929_v56 = vld [vmem:[%s3894_s9 + $0x538] sm:$0xff] }
 0x158   : > { %2625 = vmatprep.subr.bf16.mxu1 %v3109_v4  ;;  %v2983_v4 = vcombine.high %v784_v61, %v792_v62  ;;  %v936_v55 = vld [vmem:[%s3894_s9 + $0x570] sm:$0xff] }
 0x15a   : > { %2583 = vmatpush2.bf16.msra.mxu0 %v3106_v9  ;;  %v777_v9 = vld [vmem:[%s3894_s9 + $0x78] sm:$0xff] }
 0x15b   : > { %2626 = vmatpush2.bf16.msra.mxu1 %v3108_v10  ;;  %2584 = vmatprep.subr.bf16.mxu0 %v3091_v11  ;;  %v2982_v10 = vcombine.low %v784_v61, %v792_v62  ;;  %v2984_v11 = vcombine.low %v785_v63, %v793_v0  ;;  %v2969_v13 = vcombine.high %v769_v8, %v777_v9  ;;  %v912_v62 = vld [vmem:[%s3894_s9 + $0x4b0] sm:$0xff]  ;;  %v913_v0 = vld [vmem:[%s3894_s9 + $0x4b8] sm:$0xff] }
 0x15c   : > { %2627 = vmatprep.subr.bf16.mxu1 %v3093_v12  ;;  %v2967_v12 = vcombine.high %v768_v6, %v776_v7  ;;  %v920_v63 = vld [vmem:[%s3894_s9 + $0x4f0] sm:$0xff] }
 0x15e   : > { %2585 = vmatpush2.bf16.msra.mxu0 %v3090_v18  ;;  %v1017_v18 = vld [vmem:[%s3894_s9 + $0x7f8] sm:$0xff] }
 0x15f   : > { %2628 = vmatpush2.bf16.msra.mxu1 %v3092_v19  ;;  %2640 = vmatprep.subr.bf16.mxu0 %v3079_v20  ;;  %v2966_v19 = vcombine.low %v768_v6, %v776_v7  ;;  %v2968_v20 = vcombine.low %v769_v8, %v777_v9  ;;  %v3209_v22 = vcombine.high %v1009_v17, %v1017_v18  ;;  %v896_v8 = vld [vmem:[%s3894_s9 + $0x430] sm:$0xff] }
 0x160   : > { %2683 = vmatprep.subr.bf16.mxu1 %v3081_v21  ;;  %v3207_v21 = vcombine.high %v1008_v14, %v1016_v16  ;;  %v3111_v6 = vcombine.high %v912_v62, %v920_v63  ;;  %v904_v9 = vld [vmem:[%s3894_s9 + $0x470] sm:$0xff] }
 0x161   : > { %2587 = vmatmul.mubr.bf16.vlgmr.msra.gmra.mxu0 %v3974_v15 }
 0x162   : > { %2630 = vmatmul.mubr.bf16.vlgmr.msra.gmra.mxu1 %v3974_v15  ;;  %2641 = vmatpush1.bf16.msra.mxu0 %v3078_v26  ;;  %v1001_v26 = vld [vmem:[%s3894_s9 + $0x778] sm:$0xff] }
 0x163   : > { %2684 = vmatpush1.bf16.msra.mxu1 %v3080_v27  ;;  %2642 = vmatprep.subr.bf16.mxu0 %v3063_v28  ;;  %v3206_v27 = vcombine.low %v1008_v14, %v1016_v16  ;;  %v3208_v28 = vcombine.low %v1009_v17, %v1017_v18  ;;  %v3193_v30 = vcombine.high %v993_v25, %v1001_v26 }
 0x164   : > { %2685 = vmatprep.subr.bf16.mxu1 %v3065_v29  ;;  %2672 = vmatprep.mubr.bf16.mxu0 %v3892_v2  ;;  %v3191_v29 = vcombine.high %v992_v23, %v1000_v24  ;;  %v3095_v16 = vcombine.high %v896_v8, %v904_v9  ;;  %v3094_v18 = vcombine.low %v896_v8, %v904_v9 }
 0x165   : > { %2715 = vmatprep.mubr.bf16.mxu1 %v3892_v2  ;;  %v3032_v2 = vcombine.low %v833_v40, %v841_v41  ;;  %v968_v40 = vld [vmem:[%s3894_s9 + $0x670] sm:$0xff]  ;;  %v961_v41 = vld [vmem:[%s3894_s9 + $0x638] sm:$0xff] }
 0x166   : > { %2643 = vmatpush1.bf16.msra.mxu0 %v3062_v34  ;;  %v985_v34 = vld [vmem:[%s3894_s9 + $0x6f8] sm:$0xff] }
 0x167   : > { %2686 = vmatpush1.bf16.msra.mxu1 %v3064_v35  ;;  %2644 = vmatprep.subr.bf16.mxu0 %v3047_v36  ;;  %v3190_v35 = vcombine.low %v992_v23, %v1000_v24  ;;  %v3192_v36 = vcombine.low %v993_v25, %v1001_v26  ;;  %v3177_v38 = vcombine.high %v977_v33, %v985_v34 }
 0x168   : > { %2687 = vmatprep.subr.bf16.mxu1 %v3049_v37  ;;  %v3175_v37 = vcombine.high %v976_v31, %v984_v32 }
 0x16a   : > { %2645 = vmatpush1.bf16.msra.mxu0 %v3046_v42  ;;  %v969_v42 = vld [vmem:[%s3894_s9 + $0x678] sm:$0xff] }
 0x16b   : > { %2688 = vmatpush1.bf16.msra.mxu1 %v3048_v43  ;;  %2646 = vmatprep.subr.bf16.mxu0 %v3031_v44  ;;  %v3174_v43 = vcombine.low %v976_v31, %v984_v32  ;;  %v3176_v44 = vcombine.low %v977_v33, %v985_v34  ;;  %v3161_v46 = vcombine.high %v961_v41, %v969_v42 }
 0x16c   : > { %2689 = vmatprep.subr.bf16.mxu1 %v3033_v45  ;;  %v3159_v45 = vcombine.high %v960_v39, %v968_v40 }
 0x16e   : > { %2647 = vmatpush1.bf16.msra.mxu0 %v3030_v50  ;;  %v953_v50 = vld [vmem:[%s3894_s9 + $0x5f8] sm:$0xff] }
 0x16f   : > { %2690 = vmatpush1.bf16.msra.mxu1 %v3032_v2  ;;  %2648 = vmatprep.subr.bf16.mxu0 %v3015_v51  ;;  %v3158_v2 = vcombine.low %v960_v39, %v968_v40  ;;  %v3160_v51 = vcombine.low %v961_v41, %v969_v42  ;;  %v3145_v53 = vcombine.high %v945_v49, %v953_v50 }
 0x170   : > { %2691 = vmatprep.subr.bf16.mxu1 %v3017_v52  ;;  %v3143_v52 = vcombine.high %v944_v47, %v952_v48 }
 0x172   : > { %2649 = vmatpush1.bf16.msra.mxu0 %v3014_v57  ;;  %v937_v57 = vld [vmem:[%s3894_s9 + $0x578] sm:$0xff] }
 0x173   : > { %2692 = vmatpush1.bf16.msra.mxu1 %v3016_v58  ;;  %2650 = vmatprep.subr.bf16.mxu0 %v2999_v59  ;;  %v3142_v58 = vcombine.low %v944_v47, %v952_v48  ;;  %v3144_v59 = vcombine.low %v945_v49, %v953_v50  ;;  %v3129_v61 = vcombine.high %v929_v56, %v937_v57 }
 0x174   : > { %2693 = vmatprep.subr.bf16.mxu1 %v3001_v60  ;;  %v3127_v60 = vcombine.high %v928_v54, %v936_v55 }
 0x176   : > { %2651 = vmatpush1.bf16.msra.mxu0 %v2998_v1  ;;  %v921_v1 = vld [vmem:[%s3894_s9 + $0x4f8] sm:$0xff] }
 0x177   : > { %2694 = vmatpush1.bf16.msra.mxu1 %v3000_v3  ;;  %2652 = vmatprep.subr.bf16.mxu0 %v2983_v4  ;;  %v3126_v3 = vcombine.low %v928_v54, %v936_v55  ;;  %v1022_v4 = vlaneseq  ;;  %v3113_v7 = vcombine.high %v913_v0, %v921_v1  ;;  %v3112_v14 = vcombine.low %v913_v0, %v921_v1 }
 0x178   : > { %2695 = vmatprep.subr.bf16.mxu1 %v2985_v5  ;;  %v3128_v5 = vcombine.low %v929_v56, %v937_v57 }
 0x17a   : > { %2653 = vmatpush1.bf16.msra.mxu0 %v2982_v10  ;;  %v897_v10 = vld [vmem:[%s3894_s9 + $0x438] sm:$0xff] }
 0x17b   : > { %2696 = vmatpush1.bf16.msra.mxu1 %v2984_v11  ;;  %2654 = vmatprep.subr.bf16.mxu0 %v2967_v12  ;;  %v905_v11 = vld [vmem:[%s3894_s9 + $0x478] sm:$0xff]  ;;  %v3110_v12 = vcombine.low %v912_v62, %v920_v63 }
 0x17c   : > { %2697 = vmatprep.subr.bf16.mxu1 %v2969_v13  ;;  %v4181_v13 = vshrl.u32 %v1022_v4, 7  ;;  %v3097_v17 = vcombine.high %v897_v10, %v905_v11  ;;  %v1019_v4 = vld [vmem:[%s4186_s26 + $0x8] sm:$0xff] }
 0x17e   : > { %2655 = vmatpush1.bf16.msra.mxu0 %v2966_v19  ;;  %v1024_v19 = vsub.s32 0, %v4181_v13  ;;  %v1028_v23 = vsub.s32 1, %v4181_v13  ;;  %v1036_v24 = vsub.s32 3, %v4181_v13  ;;  %v1052_v47 = vsub.s32 7, %v4181_v13 }
 0x17f   : > { %2698 = vmatpush1.bf16.msra.mxu1 %v2968_v20  ;;  %2656 = vmatprep.subr.bf16.mxu0 %v3207_v21  ;;  %v3096_v20 = vcombine.low %v897_v10, %v905_v11  ;;  %v1018_v21 = vld [vmem:[%s4186_s26] sm:$0xff] }
 0x180   : > { %2699 = vmatprep.subr.bf16.mxu1 %v3209_v22  ;;  %v1032_v22 = vsub.s32 2, %v4181_v13  ;;  %v1025_v25 = vrot.slane %v1018_v21, %v1024_v19  ;;  %v1069_v9 = vrot.slane %v1019_v4, %v1036_v24 }
 0x182   : > { %2657 = vmatpush2.bf16.msra.mxu0 %v3206_v27  ;;  %v1033_v26 = vrot.slane %v1018_v21, %v1032_v22  ;;  %v1029_v27 = vrot.slane %v1018_v21, %v1028_v23 }
 0x183   : > { %2700 = vmatpush2.bf16.msra.mxu1 %v3208_v28  ;;  %2658 = vmatprep.subr.bf16.mxu0 %v3191_v29  ;;  %v1037_v29 = vrot.slane %v1018_v21, %v1036_v24 }
 0x184   : > { %2701 = vmatprep.subr.bf16.mxu1 %v3193_v30 }
 0x186   : > { %2659 = vmatpush2.bf16.msra.mxu0 %v3190_v35 }
 0x187   : > { %2702 = vmatpush2.bf16.msra.mxu1 %v3192_v36  ;;  %2660 = vmatprep.subr.bf16.mxu0 %v3175_v37 }
 0x188   : > { %2703 = vmatprep.subr.bf16.mxu1 %v3177_v38 }
 0x18a   : > { %2661 = vmatpush2.bf16.msra.mxu0 %v3174_v43 }
 0x18b   : > { %2704 = vmatpush2.bf16.msra.mxu1 %v3176_v44  ;;  %2662 = vmatprep.subr.bf16.mxu0 %v3159_v45  ;;  %v1040_v44 = vsub.s32 4, %v4181_v13  ;;  %v1048_v45 = vsub.s32 6, %v4181_v13 }
 0x18c   : > { %2705 = vmatprep.subr.bf16.mxu1 %v3161_v46  ;;  %v1044_v46 = vsub.s32 5, %v4181_v13 }
 0x18d   : > { %v1041_v48 = vrot.slane %v1018_v21, %v1040_v44  ;;  %v1049_v49 = vrot.slane %v1018_v21, %v1048_v45 }
 0x18e   : > { %2663 = vmatpush2.bf16.msra.mxu0 %v3158_v2  ;;  %v1045_v50 = vrot.slane %v1018_v21, %v1044_v46 }
 0x18f   : > { %2706 = vmatpush2.bf16.msra.mxu1 %v3160_v51  ;;  %2664 = vmatprep.subr.bf16.mxu0 %v3143_v52  ;;  %v1053_v51 = vrot.slane %v1018_v21, %v1052_v47 }
 0x190   : > { %2707 = vmatprep.subr.bf16.mxu1 %v3145_v53 }
 0x192   : > { %2665 = vmatpush2.bf16.msra.mxu0 %v3142_v58 }
 0x193   : > { %2708 = vmatpush2.bf16.msra.mxu1 %v3144_v59  ;;  %2666 = vmatprep.subr.bf16.mxu0 %v3127_v60 }
 0x194   : > { %2709 = vmatprep.subr.bf16.mxu1 %v3129_v61 }
 0x196   : > { %2667 = vmatpush2.bf16.msra.mxu0 %v3126_v3 }
 0x197   : > { %2710 = vmatpush2.bf16.msra.mxu1 %v3128_v5  ;;  %2668 = vmatprep.subr.bf16.mxu0 %v3111_v6  ;;  %v1057_v5 = vrot.slane %v1019_v4, %v1024_v19  ;;  %v1065_v6 = vrot.slane %v1019_v4, %v1032_v22 }
 0x198   : > { %2711 = vmatprep.subr.bf16.mxu1 %v3113_v7  ;;  %v1061_v7 = vrot.slane %v1019_v4, %v1028_v23 }
 0x19a   : > { %2669 = vmatpush2.bf16.msra.mxu0 %v3110_v12 }
 0x19b   : > { %2712 = vmatpush2.bf16.msra.mxu1 %v3112_v14  ;;  %2670 = vmatprep.subr.bf16.mxu0 %v3095_v16 }
 0x19c   : > { %2713 = vmatprep.subr.bf16.mxu1 %v3097_v17 }
 0x19e   : > { %2671 = vmatpush2.bf16.msra.mxu0 %v3094_v18 }
 0x19f   : > { %2714 = vmatpush2.bf16.msra.mxu1 %v3096_v20 }
 0x1a1   : > { %v2416_v28 = vpop.f32.mrf.mxu0  ;;  %2673 = vmatmul.mubr.bf16.vlgmr.msra.gmra.mxu0 %v3974_v15 }
 0x1a2   : > { %v2417_v30 = vadd.f32 %v2416_v28, %v1025_v25  ;;  %v2459_v31 = vpop.f32.mrf.mxu1  ;;  %2716 = vmatmul.mubr.bf16.vlgmr.msra.gmra.mxu1 %v3974_v15  ;;  %v1077_v28 = vrot.slane %v1019_v4, %v1044_v46 }
 0x1a3   : > { %v2460_v32 = vadd.f32 %v2459_v31, %v1033_v26  ;;  %v2418_v33 = vpop.f32.mrf.mxu0 }
 0x1a4   : > { %2726 = vst [vmem:[%s4205_s12] sm:$0xff] %v2417_v30  ;;  %v2419_v34 = vadd.f32 %v2418_v33, %v1029_v27  ;;  %v2461_v35 = vpop.f32.mrf.mxu1  ;;  %v1085_v30 = vrot.slane %v1019_v4, %v1052_v47 }
 0x1a5   : > { %2728 = vst [vmem:[%s4205_s12 + $0x10] sm:$0xff] %v2460_v32  ;;  %v2462_v36 = vadd.f32 %v2461_v35, %v1037_v29  ;;  %v2420_v37 = vpop.f32.mrf.mxu0 }
 0x1a6   : > { %2727 = vst [vmem:[%s4205_s12 + $0x8] sm:$0xff] %v2419_v34  ;;  %v2421_v15 = vadd.f32 %v2420_v37, %v1025_v25  ;;  %v2463_v38 = vpop.f32.mrf.mxu1 }
 0x1a7   : > { %2729 = vst [vmem:[%s4205_s12 + $0x18] sm:$0xff] %v2462_v36  ;;  %v2464_v39 = vadd.f32 %v2463_v38, %v1033_v26  ;;  %v2422_v40 = vpop.f32.mrf.mxu0  ;;  %v1073_v26 = vrot.slane %v1019_v4, %v1040_v44 }
 0x1a8   : > { %2742 = vst [vmem:[%s4205_s12 + $0x80] sm:$0xff] %v2421_v15  ;;  %v2423_v41 = vadd.f32 %v2422_v40, %v1029_v27  ;;  %v2465_v42 = vpop.f32.mrf.mxu1  ;;  %v1081_v27 = vrot.slane %v1019_v4, %v1048_v45 }
 0x1a9   : > { %2744 = vst [vmem:[%s4205_s12 + $0x90] sm:$0xff] %v2464_v39  ;;  %v2466_v43 = vadd.f32 %v2465_v42, %v1037_v29 }
 0x1aa   : > { %2743 = vst [vmem:[%s4205_s12 + $0x88] sm:$0xff] %v2423_v41 }
 0x1ab   : > { %2745 = vst [vmem:[%s4205_s12 + $0x98] sm:$0xff] %v2466_v43  ;;  %v2783_v45 = vld [vmem:[%s4205_s12] sm:$0xff] (%p3352_p6) }
 0x1ac   : > { %v2787_v47 = vld [vmem:[%s4205_s12 + $0x10] sm:$0xff] (%p3352_p6)  ;;  %2784 = vst [vmem:[%s4261_s4] sm:$0xff] (%p3352_p6), %v2783_v45 }
 0x1ad   : > { %v2785_v46 = vld [vmem:[%s4205_s12 + $0x8] sm:$0xff] (%p3352_p6)  ;;  %2788 = vst [vmem:[%s4261_s4 + $0x10] sm:$0xff] (%p3352_p6), %v2787_v47 }
 0x1ae   : > { %2786 = vst [vmem:[%s4261_s4 + $0x8] sm:$0xff] (%p3352_p6), %v2785_v46 }
 0x1e1   : > { %v2502_v2 = vpop.f32.mrf.mxu0 }
 0x1e2   : > { %v2503_v52 = vadd.f32 %v2502_v2, %v1041_v48  ;;  %v2545_v53 = vpop.f32.mrf.mxu1 }
 0x1e3   : > { %v2546_v54 = vadd.f32 %v2545_v53, %v1049_v49  ;;  %v2504_v55 = vpop.f32.mrf.mxu0 }
 0x1e4   : > { %2730 = vst [vmem:[%s4205_s12 + $0x20] sm:$0xff] %v2503_v52  ;;  %v2505_v56 = vadd.f32 %v2504_v55, %v1045_v50  ;;  %v2547_v57 = vpop.f32.mrf.mxu1 }
 0x1e5   : > { %2732 = vst [vmem:[%s4205_s12 + $0x30] sm:$0xff] %v2546_v54  ;;  %v2548_v58 = vadd.f32 %v2547_v57, %v1053_v51  ;;  %v2506_v59 = vpop.f32.mrf.mxu0 }
 0x1e6   : > { %2731 = vst [vmem:[%s4205_s12 + $0x28] sm:$0xff] %v2505_v56  ;;  %v2507_v60 = vadd.f32 %v2506_v59, %v1041_v48  ;;  %v2549_v61 = vpop.f32.mrf.mxu1  ;;  %v2789_v48 = vld [vmem:[%s4205_s12 + $0x18] sm:$0xff] (%p3352_p6) }
 0x1e7   : > { %2733 = vst [vmem:[%s4205_s12 + $0x38] sm:$0xff] %v2548_v58  ;;  %v2550_v62 = vadd.f32 %v2549_v61, %v1049_v49  ;;  %v2508_v63 = vpop.f32.mrf.mxu0  ;;  %2790 = vst [vmem:[%s4261_s4 + $0x18] sm:$0xff] (%p3352_p6), %v2789_v48  ;;  %v2817_v61 = vld [vmem:[%s4205_s12 + $0x88] sm:$0xff] (%p3352_p6) }
 0x1e8   : > { %2746 = vst [vmem:[%s4205_s12 + $0xa0] sm:$0xff] %v2507_v60  ;;  %v2509_v0 = vadd.f32 %v2508_v63, %v1045_v50  ;;  %v2551_v1 = vpop.f32.mrf.mxu1  ;;  %v2815_v60 = vld [vmem:[%s4205_s12 + $0x80] sm:$0xff] (%p3352_p6)  ;;  %2818 = vst [vmem:[%s4261_s4 + $0x288] sm:$0xff] (%p3352_p6), %v2817_v61  ;;  %v2821_v63 = vld [vmem:[%s4205_s12 + $0x98] sm:$0xff] (%p3352_p6) }
 0x1e9   : > { %2748 = vst [vmem:[%s4205_s12 + $0xb0] sm:$0xff] %v2550_v62  ;;  %v2552_v3 = vadd.f32 %v2551_v1, %v1053_v51  ;;  %2816 = vst [vmem:[%s4261_s4 + $0x280] sm:$0xff] (%p3352_p6), %v2815_v60  ;;  %v2819_v62 = vld [vmem:[%s4205_s12 + $0x90] sm:$0xff] (%p3352_p6) }
 0x1ea   : > { %2747 = vst [vmem:[%s4205_s12 + $0xa8] sm:$0xff] %v2509_v0  ;;  %2820 = vst [vmem:[%s4261_s4 + $0x290] sm:$0xff] (%p3352_p6), %v2819_v62 }
 0x1eb   : > { %2749 = vst [vmem:[%s4205_s12 + $0xb8] sm:$0xff] %v2552_v3  ;;  %v2791_v49 = vld [vmem:[%s4205_s12 + $0x20] sm:$0xff] (%p3352_p6)  ;;  %2822 = vst [vmem:[%s4261_s4 + $0x298] sm:$0xff] (%p3352_p6), %v2821_v63 }
 0x1ec   : > { %2792 = vst [vmem:[%s4261_s4 + $0x20] sm:$0xff] (%p3352_p6), %v2791_v49  ;;  %v2795_v2 = vld [vmem:[%s4205_s12 + $0x30] sm:$0xff] (%p3352_p6) }
 0x1ed   : > { %v2793_v50 = vld [vmem:[%s4205_s12 + $0x28] sm:$0xff] (%p3352_p6)  ;;  %2796 = vst [vmem:[%s4261_s4 + $0x30] sm:$0xff] (%p3352_p6), %v2795_v2 }
 0x1ee   : > { %2794 = vst [vmem:[%s4261_s4 + $0x28] sm:$0xff] (%p3352_p6), %v2793_v50  ;;  %v2797_v51 = vld [vmem:[%s4205_s12 + $0x38] sm:$0xff] (%p3352_p6) }
 0x1ef   : > { %2798 = vst [vmem:[%s4261_s4 + $0x38] sm:$0xff] (%p3352_p6), %v2797_v51  ;;  %v2823_v0 = vld [vmem:[%s4205_s12 + $0xa0] sm:$0xff] (%p3352_p6) }
 0x1f0   : > { %2824 = vst [vmem:[%s4261_s4 + $0x2a0] sm:$0xff] (%p3352_p6), %v2823_v0  ;;  %v2827_v3 = vld [vmem:[%s4205_s12 + $0xb0] sm:$0xff] (%p3352_p6) }
 0x1f1   : > { %v2825_v1 = vld [vmem:[%s4205_s12 + $0xa8] sm:$0xff] (%p3352_p6)  ;;  %2828 = vst [vmem:[%s4261_s4 + $0x2b0] sm:$0xff] (%p3352_p6), %v2827_v3 }
 0x1f2   : > { %v2829_v4 = vld [vmem:[%s4205_s12 + $0xb8] sm:$0xff] (%p3352_p6)  ;;  %2826 = vst [vmem:[%s4261_s4 + $0x2a8] sm:$0xff] (%p3352_p6), %v2825_v1 }
 0x1f3   : > { %2830 = vst [vmem:[%s4261_s4 + $0x2b8] sm:$0xff] (%p3352_p6), %v2829_v4 }
 0x221   : > { %v2588_v8 = vpop.f32.mrf.mxu0 }
 0x222   : > { %v2589_v10 = vadd.f32 %v2588_v8, %v1057_v5  ;;  %v2631_v11 = vpop.f32.mrf.mxu1 }
 0x223   : > { %v2632_v12 = vadd.f32 %v2631_v11, %v1065_v6  ;;  %v2590_v14 = vpop.f32.mrf.mxu0 }
 0x224   : > { %2734 = vst [vmem:[%s4205_s12 + $0x40] sm:$0xff] %v2589_v10  ;;  %v2591_v16 = vadd.f32 %v2590_v14, %v1061_v7  ;;  %v2633_v17 = vpop.f32.mrf.mxu1 }
 0x225   : > { %2736 = vst [vmem:[%s4205_s12 + $0x50] sm:$0xff] %v2632_v12  ;;  %v2634_v18 = vadd.f32 %v2633_v17, %v1069_v9  ;;  %v2592_v19 = vpop.f32.mrf.mxu0 }
 0x226   : > { %2735 = vst [vmem:[%s4205_s12 + $0x48] sm:$0xff] %v2591_v16  ;;  %v2593_v20 = vadd.f32 %v2592_v19, %v1057_v5  ;;  %v2635_v21 = vpop.f32.mrf.mxu1 }
 0x227   : > { %2737 = vst [vmem:[%s4205_s12 + $0x58] sm:$0xff] %v2634_v18  ;;  %v2636_v13 = vadd.f32 %v2635_v21, %v1065_v6  ;;  %v2594_v22 = vpop.f32.mrf.mxu0 }
 0x228   : > { %2750 = vst [vmem:[%s4205_s12 + $0xc0] sm:$0xff] %v2593_v20  ;;  %v2595_v23 = vadd.f32 %v2594_v22, %v1061_v7  ;;  %v2637_v24 = vpop.f32.mrf.mxu1 }
 0x229   : > { %2752 = vst [vmem:[%s4205_s12 + $0xd0] sm:$0xff] %v2636_v13  ;;  %v2638_v25 = vadd.f32 %v2637_v24, %v1069_v9 }
 0x22a   : > { %2751 = vst [vmem:[%s4205_s12 + $0xc8] sm:$0xff] %v2595_v23 }
 0x22b   : > { %2753 = vst [vmem:[%s4205_s12 + $0xd8] sm:$0xff] %v2638_v25  ;;  %v2799_v52 = vld [vmem:[%s4205_s12 + $0x40] sm:$0xff] (%p3352_p6) }
 0x22c   : > { %2800 = vst [vmem:[%s4261_s4 + $0x40] sm:$0xff] (%p3352_p6), %v2799_v52  ;;  %v2803_v54 = vld [vmem:[%s4205_s12 + $0x50] sm:$0xff] (%p3352_p6) }
 0x22d   : > { %v2801_v53 = vld [vmem:[%s4205_s12 + $0x48] sm:$0xff] (%p3352_p6)  ;;  %2804 = vst [vmem:[%s4261_s4 + $0x50] sm:$0xff] (%p3352_p6), %v2803_v54 }
 0x22e   : > { %v2805_v55 = vld [vmem:[%s4205_s12 + $0x58] sm:$0xff] (%p3352_p6)  ;;  %2802 = vst [vmem:[%s4261_s4 + $0x48] sm:$0xff] (%p3352_p6), %v2801_v53 }
 0x22f   : > { %2806 = vst [vmem:[%s4261_s4 + $0x58] sm:$0xff] (%p3352_p6), %v2805_v55  ;;  %v2831_v5 = vld [vmem:[%s4205_s12 + $0xc0] sm:$0xff] (%p3352_p6) }
 0x230   : > { %v2835_v7 = vld [vmem:[%s4205_s12 + $0xd0] sm:$0xff] (%p3352_p6)  ;;  %2832 = vst [vmem:[%s4261_s4 + $0x2c0] sm:$0xff] (%p3352_p6), %v2831_v5 }
 0x231   : > { %v2833_v6 = vld [vmem:[%s4205_s12 + $0xc8] sm:$0xff] (%p3352_p6)  ;;  %2836 = vst [vmem:[%s4261_s4 + $0x2d0] sm:$0xff] (%p3352_p6), %v2835_v7 }
 0x232   : > { %2834 = vst [vmem:[%s4261_s4 + $0x2c8] sm:$0xff] (%p3352_p6), %v2833_v6  ;;  %v2837_v8 = vld [vmem:[%s4205_s12 + $0xd8] sm:$0xff] (%p3352_p6) }
 0x233   : > { %2838 = vst [vmem:[%s4261_s4 + $0x2d8] sm:$0xff] (%p3352_p6), %v2837_v8 }
 0x261   : > { %v2674_v29 = vpop.f32.mrf.mxu0 }
 0x262   : > { %v2675_v31 = vadd.f32 %v2674_v29, %v1073_v26  ;;  %v2717_v32 = vpop.f32.mrf.mxu1 }
 0x263   : > { %v2718_v33 = vadd.f32 %v2717_v32, %v1081_v27  ;;  %v2676_v34 = vpop.f32.mrf.mxu0 }
 0x264   : > { %2738 = vst [vmem:[%s4205_s12 + $0x60] sm:$0xff] %v2675_v31  ;;  %v2677_v35 = vadd.f32 %v2676_v34, %v1077_v28  ;;  %v2719_v36 = vpop.f32.mrf.mxu1 }
 0x265   : > { %2740 = vst [vmem:[%s4205_s12 + $0x70] sm:$0xff] %v2718_v33  ;;  %v2720_v37 = vadd.f32 %v2719_v36, %v1085_v30  ;;  %v2678_v15 = vpop.f32.mrf.mxu0 }
 0x266   : > { %2739 = vst [vmem:[%s4205_s12 + $0x68] sm:$0xff] %v2677_v35  ;;  %v2679_v38 = vadd.f32 %v2678_v15, %v1073_v26  ;;  %v2721_v39 = vpop.f32.mrf.mxu1 }
 0x267   : > { %2741 = vst [vmem:[%s4205_s12 + $0x78] sm:$0xff] %v2720_v37  ;;  %v2722_v40 = vadd.f32 %v2721_v39, %v1081_v27  ;;  %v2680_v41 = vpop.f32.mrf.mxu0  ;;  %2764 = sbr.rel (!%p3352_p6) target bundleno = 628 (0x274), region = 59 }
 0x268   : > { %2754 = vst [vmem:[%s4205_s12 + $0xe0] sm:$0xff] %v2679_v38  ;;  %v2681_v42 = vadd.f32 %v2680_v41, %v1077_v28  ;;  %v2723_v43 = vpop.f32.mrf.mxu1 }
 0x269   : > { %2756 = vst [vmem:[%s4205_s12 + $0xf0] sm:$0xff] %v2722_v40  ;;  %v2724_v44 = vadd.f32 %v2723_v43, %v1085_v30 }
 0x26a   : > { %2755 = vst [vmem:[%s4205_s12 + $0xe8] sm:$0xff] %v2681_v42 }
 0x26b   : > { %2757 = vst [vmem:[%s4205_s12 + $0xf8] sm:$0xff] %v2724_v44  ;;  %v2807_v56 = vld [vmem:[%s4205_s12 + $0x60] sm:$0xff] (%p3352_p6) }
 0x26c   : > { %v2811_v58 = vld [vmem:[%s4205_s12 + $0x70] sm:$0xff]  ;;  %2808 = vst [vmem:[%s4261_s4 + $0x60] sm:$0xff] %v2807_v56 }
 0x26d   : > { %v2809_v57 = vld [vmem:[%s4205_s12 + $0x68] sm:$0xff]  ;;  %2812 = vst [vmem:[%s4261_s4 + $0x70] sm:$0xff] %v2811_v58 }
 0x26e   : > { %2810 = vst [vmem:[%s4261_s4 + $0x68] sm:$0xff] %v2809_v57  ;;  %v2813_v59 = vld [vmem:[%s4205_s12 + $0x78] sm:$0xff] }
 0x26f   : > { %2814 = vst [vmem:[%s4261_s4 + $0x78] sm:$0xff] %v2813_v59  ;;  %v2839_v9 = vld [vmem:[%s4205_s12 + $0xe0] sm:$0xff] }
 0x270   : > { %2840 = vst [vmem:[%s4261_s4 + $0x2e0] sm:$0xff] %v2839_v9  ;;  %v2843_v11 = vld [vmem:[%s4205_s12 + $0xf0] sm:$0xff] }
 0x271   : > { %v2841_v10 = vld [vmem:[%s4205_s12 + $0xe8] sm:$0xff]  ;;  %2844 = vst [vmem:[%s4261_s4 + $0x2f0] sm:$0xff] %v2843_v11 }
 0x272   : > { %2842 = vst [vmem:[%s4261_s4 + $0x2e8] sm:$0xff] %v2841_v10  ;;  %v2845_v12 = vld [vmem:[%s4205_s12 + $0xf8] sm:$0xff] }
 0x273   : > { %2846 = vst [vmem:[%s4261_s4 + $0x2f8] sm:$0xff] %v2845_v12 }
 0x274 PF: > { %s13_s16 = sadd.s32 1, %s3295_s16   ;;  %s4345_s12 = smov %s3283_s13 }
 0x275   : > { %p10_p12 = scmp.ge.s32.totalorder %s13_s16, 7   ;;  %s4346_s13 = smov %s3357_s22 }
 0x276   : > { %s4347_s14 = smov %s3291_s15  ;;  %s4348_s15 = smov %s4350_s17 }
 0x277   :  { %12 = sbr.rel (!%p10_p12) target bundleno = 3 (0x3), region = 119 }

// kernel: bigram_lm_forward.2
= control target key start
LH: loop header
LB: loop body
LE: loop exit
PB: predicated region body
PF: predicated region fallthrough
CT: control target
= control target key end

     0   :  { %s6632_s0 = inlined_call_operand.vmem [shape: f32[2,8,256], index: 0, kind: input, shape index: {}, may-alias: {0,15}]   ;;  %s6633_s1 = inlined_call_operand.vmem [shape: f32[8,8], index: 1, kind: input, shape index: {}]   ;;  %s6634_s2 = inlined_call_operand.vmem [shape: f32[4,1,256], index: 2, kind: input, shape index: {}]   ;;  %s6635_s3 = inlined_call_operand.vmem [shape: f32[4,1,256], index: 3, kind: input, shape index: {}]   ;;  %s6636_s4 = inlined_call_operand.hbm [shape: bf16[4,256,768], index: 4, kind: input, shape index: {}]   ;;  %s6637_s5 = inlined_call_operand.hbm [shape: bf16[4,256,256], index: 5, kind: input, shape index: {}]   ;;  %s6638_s6 = inlined_call_operand.vmem [shape: f32[4,1,256], index: 6, kind: input, shape index: {}]   ;;  %s6639_s7 = inlined_call_operand.vmem [shape: f32[4,1,256], index: 7, kind: input, shape index: {}]   ;;  %s6640_s8 = inlined_call_operand.vmem [shape: f32[4,1,256], index: 8, kind: input, shape index: {}]   ;;  %s6641_s9 = inlined_call_operand.hbm [shape: bf16[4,256,1024], index: 9, kind: input, shape index: {}]   ;;  %s6642_s10 = inlined_call_operand.vmem [shape: f32[4,1,1024], index: 10, kind: input, shape index: {}]   ;;  %s6643_s11 = inlined_call_operand.hbm [shape: bf16[4,1024,256], index: 11, kind: input, shape index: {}]   ;;  %s6644_s12 = inlined_call_operand.vmem [shape: f32[4,1,256], index: 12, kind: input, shape index: {}]   ;;  %s6645_s13 = inlined_call_operand.hbm [shape: f32[1,256], index: 13, kind: input, shape index: {}]   ;;  %s6646_s14 = inlined_call_operand.hbm [shape: f32[1,256], index: 14, kind: input, shape index: {}]   ;;  %s6647_s15 = inlined_call_operand.vmem [shape: f32[2,8,256], index: 15, kind: output, shape index: {}, may-alias: {0,15}]  }
   0x1   :  { %6652 = sst [smem:[#allocation18_spill]] %s6636_s4 }
   0x2   :  { %6653 = sst [smem:[#allocation19_spill]] %s6637_s5 }
   0x3   :  { %6654 = sst [smem:[#allocation20_spill]] %s6642_s10 }
   0x4   :  { %6655 = sst [smem:[#allocation21_spill]] %s6643_s11 }
   0x5   :  { %6656 = sst [smem:[#allocation22_spill]] %s6644_s12 }
   0x6   :  { %20 = vsyncpa [#allocation3], 0 }
   0x7   :  { %21 = vsyncpa [#allocation5], 0 }
   0x8   :  { %22 = vsyncpa [#allocation8], 0 }
   0x9   :  { %23 = vsyncpa [#allocation11], 0  ;;  %s5882_s18 = smov 0   ;;  %s5884_s19 = smov 0  }
   0xa   :  { %s5886_s20 = smov 0   ;;  %s5888_s21 = smov 0  }
   0xb   :  { %s5890_s22 = smov 0  }
   0xc LB: > { %6657 = sst [smem:[#allocation16_spill]] %s5785_s22  ;;  %s5787_s23 = smov [#allocation4]   ;;  %s5785_s22 = sphi %s5890_s22, %s6676_s22   ;;  %s5781_s21 = sphi %s5888_s21, %s6675_s21   ;;  %s5777_s20 = sphi %s5886_s20, %s6674_s20   ;;  %s5773_s19 = sphi %s5884_s19, %s6673_s19   ;;  %s5769_s18 = sphi %s5882_s18, %s6672_s18  }
   0xd   : > { %s455_s24 = sshll.u32 %s5787_s23, 4  ;;  %s4554_s25 = sadd.s32 4294967295, %s5785_s22   ;;  %s456_s24 = int_to_ptr.vmem [resolvable:$true] %s455_s24 }
   0xe   : > { %p4556_p0 = scmp.ge.s32.totalorder %s5785_s22, 1  ;;  %p427_p1 = scmp.lt.s32.totalorder %s5785_s22, 9 }
   0xf   : > { %p5910_p2 = scmp.eq.s32.totalorder %s4554_s25, 0  ;;  %s5788_s28 = smov [#allocation7]  }
  0x10   : > { %p5914_p3 = pnand %p4556_p0, %p427_p1  ;;  %s481_s29 = sshll.u32 %s5788_s28, 4  ;;  %s482_s29 = int_to_ptr.vmem [resolvable:$true] %s481_s29 }
  0x11   : > { %s6658_s26 = scalar_select %p5910_p2, 1, 0 }
  0x12   : > { %s6659_s27 = scalar_select %p5914_p3, 1, 0 }
  0x13   : > { %p5078_p4 = pneg %p5914_p3  ;;  %s5586_s17 = scalar_lea.vmem %s456_s24, 16384 }
  0x14   : > { %p5587_p7 = scmp.ne.s32.totalorder %s456_s24, %s5586_s17  ;;  %p5594_p10 = scmp.lt.s32.totalorder %s456_s24, %s456_s24 }
  0x15   : > { %p5922_p5 = pnand %p5910_p2, %p5078_p4  ;;  %p5595_p11 = scmp.lt.s32.totalorder %s5586_s17, %s5586_s17 }
  0x17   : > { %p5928_p6 = pneg %p5922_p5  ;;  %p5596_p12 = por %p5595_p11, %p5594_p10 }
  0x19   : > { %p5589_p8 = pnand %p5587_p7, %p5928_p6 }
  0x1b   : > { %p5590_p9 = pneg %p5589_p8 }
  0x1d   : > { %p5597_p13 = pnand %p5596_p12, %p5590_p9 }
  0x1f   : > { %5600 = shalt.err (!%p5597_p13)
}
  0x20   : > { %s5789_s23 = smov 128   ;;  %s5790_s25 = smov 8  }
  0x21   : > { %s6662_s5 = sld [smem:[#allocation19_spill]]  ;;  %s5612_s12 = scalar_lea.vmem %s482_s29, 65536 }
  0x22   : > { %p5613_p0 = scmp.ne.s32.totalorder %s482_s29, %s5612_s12  ;;  %p5620_p7 = scmp.lt.s32.totalorder %s482_s29, %s482_s29 }
  0x23   : > { %p5621_p8 = scmp.lt.s32.totalorder %s5612_s12, %s5612_s12 }
  0x24   : > { %p5615_p1 = pnand %p5613_p0, %p5928_p6 }
  0x25   : > { %p5622_p2 = por %p5621_p8, %p5620_p7 }
  0x26   : > { %p5616_p4 = pneg %p5615_p1 }
  0x27   : > { %5084 = dma.hbm_to_vmem [thread:$0]  (!%p5922_p5), %s6662_s5, 16384, %s456_s24, [#allocation5], %s5789_s23, %s5789_s23, %s5790_s25  }
  0x28   : > { %p5623_p10 = pnand %p5622_p2, %p5616_p4 }
  0x2a   : > { %5626 = shalt.err (!%p5623_p10)
}
  0x2b   : > { %s6663_s11 = sld [smem:[#allocation21_spill]]  ;;  %s38_s22 = sadd.s32 1, %s5777_s20 }
  0x2c   : > { %p39_p9 = scmp.ge.s32.totalorder %s38_s22, 4  ;;  %s41_s24 = sadd.s32 1, %s5781_s21 }
  0x2d   : > { %s5791_s12 = smov [#allocation2]  }
  0x2e   : > { %s6678_s22 = smov (%p39_p9, %s38_s22), 0  ;;  %s6680_s24 = smov (!%p39_p9, %s41_s24), %s5781_s21 }
  0x2f   : > { %s442_s28 = sshll.u32 %s5791_s12, 4  ;;  %p43_p2 = scmp.ge.s32.totalorder %s6680_s24, 2  ;;  %s443_s28 = int_to_ptr.vmem [resolvable:$true] %s442_s28 }
  0x30   : > { %s5638_s5 = scalar_lea.vmem %s443_s28, 49152  ;;  %p5646_p0 = scmp.lt.s32.totalorder %s443_s28, %s443_s28 }
  0x31   : > { %5090 = dma.hbm_to_vmem [thread:$0]  (!%p5922_p5), %s6663_s11, 65536, %s482_s29, [#allocation8], %s5789_s23, %s5789_s23, %s5790_s25  }
  0x32   : > { %p5639_p11 = scmp.ne.s32.totalorder %s443_s28, %s5638_s5  ;;  %p5647_p1 = scmp.lt.s32.totalorder %s5638_s5, %s5638_s5 }
  0x34   : > { %p5641_p12 = pnand %p5639_p11, %p5928_p6  ;;  %p5648_p4 = por %p5647_p1, %p5646_p0 }
  0x36   : > { %p5642_p13 = pneg %p5641_p12 }
  0x38   : > { %p5649_p7 = pnand %p5648_p4, %p5642_p13 }
  0x3a   : > { %5652 = shalt.err (!%p5649_p7)
}
  0x3b   : > { %s5792_s10 = smov 384   ;;  %s5793_s29 = smov 24  }
  0x3c   : > { %s6664_s4 = sld [smem:[#allocation18_spill]]  ;;  %s6682_s24 = smov (%p43_p2, %s6680_s24), 0 }
  0x3d   : > { %6665 = sst [smem:[#allocation17_spill]] %s6682_s24  ;;  %s5794_s17 = smov [#allocation6]  }
  0x3e   : > { %s468_s12 = sshll.u32 %s5794_s17, 4  ;;  %s469_s12 = int_to_ptr.vmem [resolvable:$true] %s468_s12 }
  0x3f   : > { %s5664_s11 = scalar_lea.vmem %s469_s12, 65536  ;;  %p5672_p11 = scmp.lt.s32.totalorder %s469_s12, %s469_s12 }
  0x40   : > { %p5665_p8 = scmp.ne.s32.totalorder %s469_s12, %s5664_s11  ;;  %p5673_p12 = scmp.lt.s32.totalorder %s5664_s11, %s5664_s11 }
  0x42   : > { %5081 = dma.hbm_to_vmem [thread:$0]  (!%p5922_p5), %s6664_s4, 49152, %s443_s28, [#allocation3], %s5792_s10, %s5792_s10, %s5793_s29  }
  0x43   : > { %p5667_p10 = pnand %p5665_p8, %p5928_p6  ;;  %p5674_p13 = por %p5673_p12, %p5672_p11 }
  0x45   : > { %p5668_p9 = pneg %p5667_p10 }
  0x47   : > { %p5675_p0 = pnand %p5674_p13, %p5668_p9 }
  0x49   : > { %5678 = shalt.err (!%p5675_p0)
}
  0x4a   : > { %s5795_s5 = smov 512   ;;  %s5796_s28 = smov 32  }
  0x4b   : > { %5087 = dma.hbm_to_vmem [thread:$0]  (!%p5922_p5), %s6641_s9, 65536, %s469_s12, [#allocation5], %s5795_s5, %s5795_s5, %s5796_s28  }
  0x4c   : > { %s5797_s23 = smov [#allocation9]   ;;  %s5798_s17 = smov [#allocation10]  }
  0x4d   : > { %s495_s25 = sshll.u32 %s5797_s23, 4  ;;  %s506_s4 = sshll.u32 %s5798_s17, 4  ;;  %s496_s25 = int_to_ptr.vmem [resolvable:$true] %s495_s25  ;;  %s507_s4 = int_to_ptr.vmem [resolvable:$true] %s506_s4 }
  0x4e   : > { %s5690_s24 = scalar_lea.vmem %s496_s25, 32  ;;  %p5698_p7 = scmp.lt.s32.totalorder %s496_s25, %s496_s25 }
  0x4f   : > { %p5691_p2 = scmp.ne.s32.totalorder %s496_s25, %s5690_s24  ;;  %p5699_p8 = scmp.lt.s32.totalorder %s5690_s24, %s5690_s24 }
  0x51   : > { %p5693_p1 = pnand %p5691_p2, %p5928_p6  ;;  %p5700_p10 = por %p5699_p8, %p5698_p7 }
  0x53   : > { %p5694_p4 = pneg %p5693_p1 }
  0x55   : > { %p5701_p9 = pnand %p5700_p10, %p5694_p4 }
  0x57   : > { %5704 = shalt.err (!%p5701_p9)
}
  0x58   : > { %5093 = dma.hbm_to_vmem [thread:$0]  (!%p5922_p5), %s6645_s13, 32, %s496_s25, [#allocation8]  }
  0x59   : > { %s5716_s12 = scalar_lea.vmem %s507_s4, 32  ;;  %p5724_p0 = scmp.lt.s32.totalorder %s507_s4, %s507_s4 }
  0x5a   : > { %p5717_p11 = scmp.ne.s32.totalorder %s507_s4, %s5716_s12  ;;  %p5725_p2 = scmp.lt.s32.totalorder %s5716_s12, %s5716_s12 }
  0x5c   : > { %p5719_p12 = pnand %p5717_p11, %p5928_p6  ;;  %p5726_p1 = por %p5725_p2, %p5724_p0 }
  0x5e   : > { %p5720_p13 = pneg %p5719_p12 }
  0x60   : > { %p5727_p3 = pnand %p5726_p1, %p5720_p13 }
  0x62   : > { %5730 = shalt.err (!%p5727_p3)
}
  0x63   : > { %5096 = dma.hbm_to_vmem [thread:$0]  (!%p5922_p5), %s6646_s14, 32, %s507_s4, [#allocation11]  }
  0x64   : > { %p6666_p4 = scmp.ne.s32.totalorder %s6659_s27, 0 }
  0x65   : > { %p6667_p7 = scmp.ne.s32.totalorder (!%p6666_p4), %s6658_s26, 0 }
  0x66   : > { %576 = sbr.rel (%p6666_p4) target bundleno = 2881 (0xb41), region = 80 }
  0x6b   : > { %5752 = dma.done.wait (%p6667_p7), [#allocation3], 49152  }
  0x6c   : > { %5754 = vsyncadd (%p6667_p7), [#allocation3], 4294918144 }
  0x6d   : > { %5756 = dma.done.wait (%p6667_p7), [#allocation5], 81920  }
  0x6e   : > { %5758 = vsyncadd (%p6667_p7), [#allocation5], 4294885376 }
  0x6f   : > { %5760 = dma.done.wait (%p6667_p7), [#allocation8], 65568  }
  0x70   : > { %5762 = vsyncadd (%p6667_p7), [#allocation8], 4294901728 }
  0x71   : > { %5764 = dma.done.wait (%p6667_p7), [#allocation11], 32  }
  0x72   : > { %5766 = vsyncadd (%p6667_p7), [#allocation11], 4294967264  ;;  %p672_p3 = scmp.lt.s32.totalorder %s5773_s19, 1  ;;  %p711_p5 = scmp.eq.s32.totalorder %s5769_s18, 0  ;;  %vm5800_vm1 = vmmov 0   ;;  %vm1471_vm2 = vcmask 523264  }
  0x73   : > { %p677_p6 = scmp.lt.s32.totalorder %s5769_s18, 3  ;;  %s5801_s30 = smov 64   ;;  %vm1567_vm3 = vcmask 1043456   ;;  %vm1550_vm4 = vcmask 64512  }
  0x74   : > { %s6684_s19 = smov (!%p672_p3, %s5773_s19), 1  ;;  %s4991_s29 = sshll.u32 %s5769_s18, 8 }
  0x75   : > { %s716_s4 = scalar_select %p711_p5, 1, 0 }
  0x76   : > { %s4988_s27 = sshll.u32 %s6684_s19, 4  ;;  %s4990_s19 = smul.u32 768, %s5769_s18 }
  0x77   : > { %s676_s28 = scalar_lea.vmem %s6632_s0, %s4988_s27  ;;  %s6009_s25 = scalar_lea.vmem %s6647_s15, %s4988_s27  ;;  %v717_v0 = vstv %s716_s4 }
  0x78   : > { %vm718_vm0 = vcmp.eq.s32.totalorder %v717_v0, 1  ;;  %v712_v1 = vld [vmem:[%s676_s28] sm:$0xff]  ;;  %v713_v2 = vld [vmem:[%s676_s28 + $0x8] sm:$0xff]  ;;  %s6020_s26 = scalar_lea.vmem [#allocation2], %s4990_s19  ;;  %s6230_s23 = scalar_lea.vmem [#allocation4], %s4991_s29 }
  0x79   : > { %v714_v3 = vld [vmem:[%s6009_s25] sm:$0xff]  ;;  %v715_v4 = vld [vmem:[%s6009_s25 + $0x8] sm:$0xff]  ;;  %v5172_v10 = vld [vmem:[%s6020_s26 + $0x15c] ss:$24 sps:$4 sm:$0xff]   ;;  %s6099_s17 = scalar_select %p677_p6, %s5769_s18, 3 }
  0x7a   : > { %v6013_v5 = vsel %vm718_vm0, %v712_v1, %v714_v3  ;;  %v6015_v6 = vsel %vm718_vm0, %v713_v2, %v715_v4  ;;  %v5169_v8 = vld [vmem:[%s6020_s26 + $0x154] ss:$24 sps:$4 sm:$0xff]   ;;  %v5171_v9 = vld [vmem:[%s6020_s26 + $0x150] ss:$24 sps:$4 sm:$0xff]   ;;  %v5175_v12 = vld [vmem:[%s6020_s26 + $0x124] ss:$24 sps:$4 sm:$0xff]   ;;  %1388 = vmatprep.subr.bf16.mxu1 %v5172_v10 }
  0x7b   : > { %v723_v7 = vadd.f32 %v6015_v6, %v6013_v5  ;;  %1347 = vmatprep.subr.bf16.mxu0 %v5169_v8  ;;  %v5174_v11 = vld [vmem:[%s6020_s26 + $0x158] ss:$24 sps:$4 sm:$0xff]   ;;  %v5178_v14 = vld [vmem:[%s6020_s26 + $0x12c] ss:$24 sps:$4 sm:$0xff]   ;;  %v5180_v15 = vld [vmem:[%s6020_s26 + $0x128] ss:$24 sps:$4 sm:$0xff]  }
  0x7c   : > { %1348 = vmatpush1.bf16.msra.mxu0 %v5171_v9  ;;  %v5177_v13 = vld [vmem:[%s6020_s26 + $0x120] ss:$24 sps:$4 sm:$0xff]   ;;  %1389 = vmatpush1.bf16.msra.mxu1 %v5174_v11  ;;  %v5181_v16 = vld [vmem:[%s6020_s26 + $0xf4] ss:$24 sps:$4 sm:$0xff]   ;;  %v5183_v17 = vld [vmem:[%s6020_s26 + $0xf0] ss:$24 sps:$4 sm:$0xff]  }
  0x7d   : > { %724 = vadd.xlane.f32.xlu0 %v723_v7  ;;  %1349 = vmatprep.subr.bf16.mxu0 %v5175_v12  ;;  %v5184_v18 = vld [vmem:[%s6020_s26 + $0xfc] ss:$24 sps:$4 sm:$0xff]   ;;  %v5186_v20 = vld [vmem:[%s6020_s26 + $0xf8] ss:$24 sps:$4 sm:$0xff]   ;;  %v5190_v21 = vld [vmem:[%s6020_s26 + $0xcc] ss:$24 sps:$4 sm:$0xff]  }
  0x7e   : > { %1390 = vmatprep.subr.bf16.mxu1 %v5178_v14  ;;  %v5187_v19 = vld [vmem:[%s6020_s26 + $0xc4] ss:$24 sps:$4 sm:$0xff]   ;;  %v5189_v22 = vld [vmem:[%s6020_s26 + $0xc0] ss:$24 sps:$4 sm:$0xff]   ;;  %v5193_v23 = vld [vmem:[%s6020_s26 + $0x94] ss:$24 sps:$4 sm:$0xff]  }
  0x7f   : > { %v5192_v24 = vld [vmem:[%s6020_s26 + $0xc8] ss:$24 sps:$4 sm:$0xff]   ;;  %v5196_v25 = vld [vmem:[%s6020_s26 + $0x9c] ss:$24 sps:$4 sm:$0xff]   ;;  %v5198_v28 = vld [vmem:[%s6020_s26 + $0x98] ss:$24 sps:$4 sm:$0xff]  }
  0x80   : > { %1350 = vmatpush1.bf16.msra.mxu0 %v5177_v13  ;;  %1391 = vmatpush1.bf16.msra.mxu1 %v5180_v15  ;;  %v5195_v26 = vld [vmem:[%s6020_s26 + $0x90] ss:$24 sps:$4 sm:$0xff]   ;;  %v5199_v27 = vld [vmem:[%s6020_s26 + $0x64] ss:$24 sps:$4 sm:$0xff]   ;;  %v5201_v30 = vld [vmem:[%s6020_s26 + $0x60] ss:$24 sps:$4 sm:$0xff]  }
  0x81   : > { %1351 = vmatprep.subr.bf16.mxu0 %v5181_v16  ;;  %1392 = vmatprep.subr.bf16.mxu1 %v5184_v18  ;;  %v5202_v29 = vld [vmem:[%s6020_s26 + $0x6c] ss:$24 sps:$4 sm:$0xff]   ;;  %v5204_v32 = vld [vmem:[%s6020_s26 + $0x68] ss:$24 sps:$4 sm:$0xff]   ;;  %v5208_v33 = vld [vmem:[%s6020_s26 + $0x3c] ss:$24 sps:$4 sm:$0xff]  }
  0x82   : > { %v5205_v31 = vld [vmem:[%s6020_s26 + $0x34] ss:$24 sps:$4 sm:$0xff]   ;;  %v5207_v34 = vld [vmem:[%s6020_s26 + $0x30] ss:$24 sps:$4 sm:$0xff]   ;;  %v5211_v36 = vld [vmem:[%s6020_s26 + $0x4] ss:$24 sps:$4 sm:$0xff]  }
  0x83   : > { %v5210_v35 = vld [vmem:[%s6020_s26 + $0x38] ss:$24 sps:$4 sm:$0xff]   ;;  %v5214_v38 = vld [vmem:[%s6020_s26 + $0xc] ss:$24 sps:$4 sm:$0xff]   ;;  %v5216_v40 = vld [vmem:[%s6020_s26 + $0x8] ss:$24 sps:$4 sm:$0xff]  }
  0x84   : > { %1352 = vmatpush1.bf16.msra.mxu0 %v5183_v17  ;;  %1393 = vmatpush1.bf16.msra.mxu1 %v5186_v20  ;;  %v5213_v37 = vld [vmem:[%s6020_s26] ss:$24 sps:$4 sm:$0xff]   ;;  %v5217_v39 = vld [vmem:[%s6020_s26 + $0x2d4] ss:$24 sps:$4 sm:$0xff]   ;;  %v5219_v42 = vld [vmem:[%s6020_s26 + $0x2d0] ss:$24 sps:$4 sm:$0xff]  }
  0x85   : > { %1353 = vmatprep.subr.bf16.mxu0 %v5187_v19  ;;  %1394 = vmatprep.subr.bf16.mxu1 %v5190_v21  ;;  %v5220_v41 = vld [vmem:[%s6020_s26 + $0x2dc] ss:$24 sps:$4 sm:$0xff]   ;;  %v5222_v44 = vld [vmem:[%s6020_s26 + $0x2d8] ss:$24 sps:$4 sm:$0xff]   ;;  %v5226_v45 = vld [vmem:[%s6020_s26 + $0x2ac] ss:$24 sps:$4 sm:$0xff]   ;;  %v741_v21 = vlaneseq }
  0x86   : > { %v5223_v43 = vld [vmem:[%s6020_s26 + $0x2a4] ss:$24 sps:$4 sm:$0xff]   ;;  %v5225_v46 = vld [vmem:[%s6020_s26 + $0x2a0] ss:$24 sps:$4 sm:$0xff]   ;;  %v5229_v55 = vld [vmem:[%s6020_s26 + $0x274] ss:$24 sps:$4 sm:$0xff]  }
  0x87   : > { %v5228_v54 = vld [vmem:[%s6020_s26 + $0x2a8] ss:$24 sps:$4 sm:$0xff]   ;;  %v5232_v57 = vld [vmem:[%s6020_s26 + $0x27c] ss:$24 sps:$4 sm:$0xff]   ;;  %v5234_v58 = vld [vmem:[%s6020_s26 + $0x278] ss:$24 sps:$4 sm:$0xff]  }
  0x88   : > { %1354 = vmatpush1.bf16.msra.mxu0 %v5189_v22  ;;  %1395 = vmatpush1.bf16.msra.mxu1 %v5192_v24  ;;  %v5231_v56 = vld [vmem:[%s6020_s26 + $0x270] ss:$24 sps:$4 sm:$0xff]   ;;  %v5235_v59 = vld [vmem:[%s6020_s26 + $0x244] ss:$24 sps:$4 sm:$0xff]   ;;  %v5237_v60 = vld [vmem:[%s6020_s26 + $0x240] ss:$24 sps:$4 sm:$0xff]  }
  0x89   : > { %1355 = vmatprep.subr.bf16.mxu0 %v5193_v23  ;;  %1396 = vmatprep.subr.bf16.mxu1 %v5196_v25  ;;  %v5238_v61 = vld [vmem:[%s6020_s26 + $0x24c] ss:$24 sps:$4 sm:$0xff]   ;;  %v5240_v62 = vld [vmem:[%s6020_s26 + $0x248] ss:$24 sps:$4 sm:$0xff]   ;;  %v5244_v0 = vld [vmem:[%s6020_s26 + $0x21c] ss:$24 sps:$4 sm:$0xff]  }
  0x8a   : > { %v5241_v63 = vld [vmem:[%s6020_s26 + $0x214] ss:$24 sps:$4 sm:$0xff]   ;;  %v5243_v1 = vld [vmem:[%s6020_s26 + $0x210] ss:$24 sps:$4 sm:$0xff]   ;;  %v5247_v3 = vld [vmem:[%s6020_s26 + $0x1e4] ss:$24 sps:$4 sm:$0xff]  }
  0x8b   : > { %v5246_v2 = vld [vmem:[%s6020_s26 + $0x218] ss:$24 sps:$4 sm:$0xff]   ;;  %v5250_v4 = vld [vmem:[%s6020_s26 + $0x1ec] ss:$24 sps:$4 sm:$0xff]   ;;  %v5252_v8 = vld [vmem:[%s6020_s26 + $0x1e8] ss:$24 sps:$4 sm:$0xff]  }
  0x8c   : > { %1356 = vmatpush1.bf16.msra.mxu0 %v5195_v26  ;;  %1397 = vmatpush1.bf16.msra.mxu1 %v5198_v28  ;;  %v5249_v7 = vld [vmem:[%s6020_s26 + $0x1e0] ss:$24 sps:$4 sm:$0xff]   ;;  %v5253_v9 = vld [vmem:[%s6020_s26 + $0x1b4] ss:$24 sps:$4 sm:$0xff]   ;;  %v5255_v11 = vld [vmem:[%s6020_s26 + $0x1b0] ss:$24 sps:$4 sm:$0xff]  }
  0x8d   : > { %1357 = vmatprep.subr.bf16.mxu0 %v5199_v27  ;;  %1398 = vmatprep.subr.bf16.mxu1 %v5202_v29  ;;  %v5256_v10 = vld [vmem:[%s6020_s26 + $0x1bc] ss:$24 sps:$4 sm:$0xff]   ;;  %v5258_v12 = vld [vmem:[%s6020_s26 + $0x1b8] ss:$24 sps:$4 sm:$0xff]   ;;  %v5262_v14 = vld [vmem:[%s6020_s26 + $0x18c] ss:$24 sps:$4 sm:$0xff]  }
  0x8e   : > { %v5259_v13 = vld [vmem:[%s6020_s26 + $0x184] ss:$24 sps:$4 sm:$0xff]   ;;  %v5261_v15 = vld [vmem:[%s6020_s26 + $0x180] ss:$24 sps:$4 sm:$0xff]   ;;  %s6102_s11 = sshll.u32 %s6099_s17, 1  ;;  %v6104_v22 = vshrl.u32 %v741_v21, 7 }
  0x8f   : > { %v5264_v16 = vld [vmem:[%s6020_s26 + $0x188] ss:$24 sps:$4 sm:$0xff]   ;;  %v5267_v17 = vld [vmem:[%s6020_s26 + $0x164] ss:$24 sps:$4 sm:$0xff]   ;;  %s680_s24 = scalar_lea.vmem %s6634_s2, %s6102_s11  ;;  %s684_s27 = scalar_lea.vmem %s6635_s3, %s6102_s11 }
  0x90   : > { %1358 = vmatpush1.bf16.msra.mxu0 %v5201_v30  ;;  %1399 = vmatpush1.bf16.msra.mxu1 %v5204_v32  ;;  %v6115_v23 = vsub.s32 1, %v6104_v22  ;;  %v6118_v24 = vsub.s32 0, %v6104_v22  ;;  %v721_v25 = vld [vmem:[%s680_s24] sm:$0x3]  ;;  %s688_s10 = scalar_lea.vmem %s6638_s6, %s6102_s11  ;;  %s4992_s12 = sshll.u32 %s5769_s18, 10 }
  0x91   : > { %1359 = vmatprep.subr.bf16.mxu0 %v5205_v31  ;;  %1400 = vmatprep.subr.bf16.mxu1 %v5208_v33  ;;  %v722_v26 = vld [vmem:[%s684_s27] sm:$0x3]  ;;  %s6285_s24 = scalar_lea.vmem [#allocation6], %s4992_s12  ;;  %s6367_s5 = scalar_lea.vmem [#allocation7], %s4992_s12 }
  0x92   : > { %v748_v27 = vrot.slane %v721_v25, %v6115_v23  ;;  %v744_v28 = vrot.slane %v721_v25, %v6118_v24  ;;  %v761_v31 = vrot.slane %v722_v26, %v6115_v23  ;;  %v757_v33 = vrot.slane %v722_v26, %v6118_v24  ;;  %s696_s29 = scalar_lea.vmem %s6640_s8, %s6102_s11  ;;  %p4984_p8 = scmp.ne.s32.totalorder %s5769_s18, 3 }
  0x94   : > { %1360 = vmatpush1.bf16.msra.mxu0 %v5207_v34  ;;  %1401 = vmatpush1.bf16.msra.mxu1 %v5210_v35 }
  0x95   : > { %1361 = vmatprep.subr.bf16.mxu0 %v5211_v36  ;;  %1402 = vmatprep.subr.bf16.mxu1 %v5214_v38 }
  0x98   : > { %1362 = vmatpush1.bf16.msra.mxu0 %v5213_v37  ;;  %1403 = vmatpush1.bf16.msra.mxu1 %v5216_v40 }
  0x99   : > { %1363 = vmatprep.subr.bf16.mxu0 %v5217_v39  ;;  %1404 = vmatprep.subr.bf16.mxu1 %v5220_v41  ;;  %v5265_v39 = vld [vmem:[%s6020_s26 + $0x160] ss:$24 sps:$4 sm:$0xff]   ;;  %v5270_v41 = vld [vmem:[%s6020_s26 + $0x134] ss:$24 sps:$4 sm:$0xff]  }
  0x9c   : > { %1364 = vmatpush2.bf16.msra.mxu0 %v5219_v42  ;;  %1405 = vmatpush2.bf16.msra.mxu1 %v5222_v44  ;;  %v5268_v42 = vld [vmem:[%s6020_s26 + $0x130] ss:$24 sps:$4 sm:$0xff]   ;;  %v5271_v44 = vld [vmem:[%s6020_s26 + $0x100] ss:$24 sps:$4 sm:$0xff]  }
  0x9d   : > { %1365 = vmatprep.subr.bf16.mxu0 %v5223_v43  ;;  %1406 = vmatprep.subr.bf16.mxu1 %v5226_v45  ;;  %v5273_v43 = vld [vmem:[%s6020_s26 + $0x104] ss:$24 sps:$4 sm:$0xff]   ;;  %v5276_v45 = vld [vmem:[%s6020_s26 + $0xd4] ss:$24 sps:$4 sm:$0xff]  }
  0xa0   : > { %1366 = vmatpush2.bf16.msra.mxu0 %v5225_v46  ;;  %1407 = vmatpush2.bf16.msra.mxu1 %v5228_v54  ;;  %v5274_v46 = vld [vmem:[%s6020_s26 + $0xd0] ss:$24 sps:$4 sm:$0xff]  }
  0xa1   : > { %1367 = vmatprep.subr.bf16.mxu0 %v5229_v55  ;;  %1408 = vmatprep.subr.bf16.mxu1 %v5232_v57  ;;  %v5286_v54 = vld [vmem:[%s6020_s26 + $0x10] ss:$24 sps:$4 sm:$0xff]   ;;  %v5291_v55 = vld [vmem:[%s6020_s26 + $0x2e4] ss:$24 sps:$4 sm:$0xff]   ;;  %v5294_v57 = vld [vmem:[%s6020_s26 + $0x2b4] ss:$24 sps:$4 sm:$0xff]  }
  0xa4   : > { %1368 = vmatpush2.bf16.msra.mxu0 %v5231_v56  ;;  %1409 = vmatpush2.bf16.msra.mxu1 %v5234_v58  ;;  %v5289_v56 = vld [vmem:[%s6020_s26 + $0x2e0] ss:$24 sps:$4 sm:$0xff]   ;;  %v5292_v58 = vld [vmem:[%s6020_s26 + $0x2b0] ss:$24 sps:$4 sm:$0xff]  }
  0xa5   : > { %1369 = vmatprep.subr.bf16.mxu0 %v5235_v59  ;;  %1410 = vmatprep.subr.bf16.mxu1 %v5238_v61  ;;  %v5297_v59 = vld [vmem:[%s6020_s26 + $0x284] ss:$24 sps:$4 sm:$0xff]   ;;  %v5300_v61 = vld [vmem:[%s6020_s26 + $0x254] ss:$24 sps:$4 sm:$0xff]  }
  0xa8   : > { %1370 = vmatpush2.bf16.msra.mxu0 %v5237_v60  ;;  %1411 = vmatpush2.bf16.msra.mxu1 %v5240_v62  ;;  %v5295_v60 = vld [vmem:[%s6020_s26 + $0x280] ss:$24 sps:$4 sm:$0xff]   ;;  %v5298_v62 = vld [vmem:[%s6020_s26 + $0x250] ss:$24 sps:$4 sm:$0xff]  }
  0xa9   : > { %1371 = vmatprep.subr.bf16.mxu0 %v5241_v63  ;;  %1412 = vmatprep.subr.bf16.mxu1 %v5244_v0  ;;  %v5303_v63 = vld [vmem:[%s6020_s26 + $0x224] ss:$24 sps:$4 sm:$0xff]   ;;  %v5301_v0 = vld [vmem:[%s6020_s26 + $0x220] ss:$24 sps:$4 sm:$0xff]  }
  0xac   : > { %1372 = vmatpush2.bf16.msra.mxu0 %v5243_v1  ;;  %1413 = vmatpush2.bf16.msra.mxu1 %v5246_v2  ;;  %v5306_v1 = vld [vmem:[%s6020_s26 + $0x1f4] ss:$24 sps:$4 sm:$0xff]   ;;  %v5304_v2 = vld [vmem:[%s6020_s26 + $0x1f0] ss:$24 sps:$4 sm:$0xff]  }
  0xad   : > { %1373 = vmatprep.subr.bf16.mxu0 %v5247_v3  ;;  %1414 = vmatprep.subr.bf16.mxu1 %v5250_v4  ;;  %v5309_v3 = vld [vmem:[%s6020_s26 + $0x1c4] ss:$24 sps:$4 sm:$0xff]   ;;  %v5307_v4 = vld [vmem:[%s6020_s26 + $0x1c0] ss:$24 sps:$4 sm:$0xff]  }
  0xb0   : > { %1374 = vmatpush2.bf16.msra.mxu0 %v5249_v7  ;;  %1415 = vmatpush2.bf16.msra.mxu1 %v5252_v8  ;;  %v5312_v7 = vld [vmem:[%s6020_s26 + $0x194] ss:$24 sps:$4 sm:$0xff]   ;;  %v5310_v8 = vld [vmem:[%s6020_s26 + $0x190] ss:$24 sps:$4 sm:$0xff]  }
  0xb1   : > { %1375 = vmatprep.subr.bf16.mxu0 %v5253_v9  ;;  %1416 = vmatprep.subr.bf16.mxu1 %v5256_v10  ;;  %v5799_v9 = vmov 0.0  }
  0xb4   : > { %1376 = vmatpush2.bf16.msra.mxu0 %v5255_v11  ;;  %1417 = vmatpush2.bf16.msra.mxu1 %v5258_v12 }
  0xb5   : > { %1377 = vmatprep.subr.bf16.mxu0 %v5259_v13  ;;  %1418 = vmatprep.subr.bf16.mxu1 %v5262_v14 }
  0xb8   : > { %1378 = vmatpush2.bf16.msra.mxu0 %v5261_v15  ;;  %1419 = vmatpush2.bf16.msra.mxu1 %v5264_v16 }
  0xb9   : > { %1429 = vmatprep.subr.bf16.mxu0 %v5267_v17  ;;  %5010 = vmatprep.subr.mxu1 %v5799_v9 }
 0x106   : > { %v725_v47 = vpop.xlane.xlu0 %724 }
 0x107   : > { %v727_v48 = vmul.f32 0.00390625, %v725_v47  ;;  %v5279_v47 = vld [vmem:[%s6020_s26 + $0xa4] ss:$24 sps:$4 sm:$0xff]  }
 0x109   : > { %v6062_v49 = vsub.f32 %v6013_v5, %v727_v48  ;;  %v6065_v50 = vsub.f32 %v6015_v6, %v727_v48  ;;  %v5277_v48 = vld [vmem:[%s6020_s26 + $0xa0] ss:$24 sps:$4 sm:$0xff]  }
 0x10b   : > { %v730_v51 = vmul.f32 %v6062_v49, %v6062_v49  ;;  %v731_v52 = vmul.f32 %v6065_v50, %v6065_v50 }
 0x10d   : > { %v732_v53 = vadd.f32 %v731_v52, %v730_v51  ;;  %v5285_v51 = vld [vmem:[%s6020_s26 + $0x44] ss:$24 sps:$4 sm:$0xff]   ;;  %v5283_v52 = vld [vmem:[%s6020_s26 + $0x40] ss:$24 sps:$4 sm:$0xff]  }
 0x10f   : > { %733 = vadd.xlane.f32.xlu0 %v732_v53  ;;  %v5288_v53 = vld [vmem:[%s6020_s26 + $0x14] ss:$24 sps:$4 sm:$0xff]  }
 0x198   : > { %v734_v18 = vpop.xlane.xlu0 %733 }
 0x199   : > { %v735_v19 = vmul.f32 0.00390625, %v734_v18 }
 0x19b   : > { %v736_v20 = vadd.f32 1e-05, %v735_v19 }
 0x19d   : > { %5553 = vrsqrt.f32 %v736_v20 }
 0x1aa   : > { %v5554_v29 = vpop.eup %5553 }
 0x1ab   : > { %v739_v30 = vmul.f32 %v5554_v29, %v6065_v50  ;;  %v738_v32 = vmul.f32 %v5554_v29, %v6062_v49  ;;  %v5282_v49 = vld [vmem:[%s6020_s26 + $0x74] ss:$24 sps:$4 sm:$0xff]   ;;  %v5280_v50 = vld [vmem:[%s6020_s26 + $0x70] ss:$24 sps:$4 sm:$0xff]  }
 0x1ad   : > { %v752_v34 = vmul.f32 %v748_v27, %v739_v30  ;;  %v751_v35 = vmul.f32 %v744_v28, %v738_v32  ;;  %v1470_v32 = vld [vmem:[%s6633_s1] sm:$0xff] }
 0x1af   : > { %v765_v36 = vadd.f32 %v761_v31, %v752_v34  ;;  %v764_v37 = vadd.f32 %v757_v33, %v751_v35 }
 0x1b1   : > { %v767_v38 = vpack.c.bf16 %v765_v36, %v765_v36  ;;  %v6127_v40 = vpack.c.bf16 %v764_v37, %v764_v37 }
 0x1b3   : > { %1379 = vmatprep.mubr.bf16.mxu0 %v767_v38  ;;  %1420 = vmatprep.mubr.bf16.mxu1 %v767_v38 }
 0x1b4   : > { %1380 = vmatmul.mubr.bf16.vlgmr.msra.gmra.mxu0 %v6127_v40  ;;  %1421 = vmatmul.mubr.bf16.vlgmr.msra.gmra.mxu1 %v6127_v40 }
 0x1b5   : > { %1430 = vmatpush1.bf16.msra.mxu0 %v5265_v39  ;;  %1461 = vmatprep.mubr.bf16.mxu0 %v767_v38 }
 0x1b6   : > { %1431 = vmatprep.subr.bf16.mxu0 %v5270_v41  ;;  %5012 = vmatprep.mubr.msk.f32.mxu1 %vm5800_vm1, %v5799_v9 }
 0x1b9   : > { %1432 = vmatpush1.bf16.msra.mxu0 %v5268_v42 }
 0x1ba   : > { %1433 = vmatprep.subr.bf16.mxu0 %v5273_v43 }
 0x1bd   : > { %1434 = vmatpush1.bf16.msra.mxu0 %v5271_v44 }
 0x1be   : > { %1435 = vmatprep.subr.bf16.mxu0 %v5276_v45 }
 0x1c1   : > { %1436 = vmatpush1.bf16.msra.mxu0 %v5274_v46 }
 0x1c2   : > { %1437 = vmatprep.subr.bf16.mxu0 %v5279_v47 }
 0x1c5   : > { %1438 = vmatpush1.bf16.msra.mxu0 %v5277_v48 }
 0x1c6   : > { %1439 = vmatprep.subr.bf16.mxu0 %v5282_v49 }
 0x1c9   : > { %1440 = vmatpush1.bf16.msra.mxu0 %v5280_v50 }
 0x1ca   : > { %1441 = vmatprep.subr.bf16.mxu0 %v5285_v51 }
 0x1cd   : > { %1442 = vmatpush1.bf16.msra.mxu0 %v5283_v52 }
 0x1ce   : > { %1443 = vmatprep.subr.bf16.mxu0 %v5288_v53 }
 0x1d1   : > { %1444 = vmatpush1.bf16.msra.mxu0 %v5286_v54 }
 0x1d2   : > { %1445 = vmatprep.subr.bf16.mxu0 %v5291_v55 }
 0x1d5   : > { %1446 = vmatpush2.bf16.msra.mxu0 %v5289_v56 }
 0x1d6   : > { %1447 = vmatprep.subr.bf16.mxu0 %v5294_v57 }
 0x1d9   : > { %1448 = vmatpush2.bf16.msra.mxu0 %v5292_v58 }
 0x1da   : > { %1449 = vmatprep.subr.bf16.mxu0 %v5297_v59 }
 0x1dd   : > { %1450 = vmatpush2.bf16.msra.mxu0 %v5295_v60 }
 0x1de   : > { %1451 = vmatprep.subr.bf16.mxu0 %v5300_v61 }
 0x1e1   : > { %1452 = vmatpush2.bf16.msra.mxu0 %v5298_v62 }
 0x1e2   : > { %1453 = vmatprep.subr.bf16.mxu0 %v5303_v63 }
 0x1e5   : > { %1454 = vmatpush2.bf16.msra.mxu0 %v5301_v0 }
 0x1e6   : > { %1455 = vmatprep.subr.bf16.mxu0 %v5306_v1 }
 0x1e9   : > { %1456 = vmatpush2.bf16.msra.mxu0 %v5304_v2 }
 0x1ea   : > { %1457 = vmatprep.subr.bf16.mxu0 %v5309_v3 }
 0x1ed   : > { %1458 = vmatpush2.bf16.msra.mxu0 %v5307_v4 }
 0x1ee   : > { %1459 = vmatprep.subr.bf16.mxu0 %v5312_v7 }
 0x1f1   : > { %1460 = vmatpush2.bf16.msra.mxu0 %v5310_v8 }
 0x1f2   : > { %5015 = vmatprep.subr.bf16.mxu0 %v5799_v9 }
 0x1f4   : > { %1462 = vmatmul.mubr.bf16.vlgmr.msra.gmra.mxu0 %v6127_v40 }
 0x1f5   : > { %5017 = vmatprep.mubr.msk.bf16.mxu0 %vm5800_vm1, %v5799_v9 }
 0x274   : > { %v1381_v10 = vpop.f32.mrf.mxu0  ;;  %v1422_v11 = vpop.f32.mrf.mxu1 }
 0x275   : > { %1613 = vrot.lane.b32.xlu1 %v1422_v11, %s5801_s30  ;;  %5011 = vmatpush3.xpose.msk.msra.mxu1 %vm1471_vm2, %v1422_v11 }
 0x276   : > { %v1383_v12 = vpop.f32.mrf.mxu0  ;;  %v1424_v13 = vpop.f32.mrf.mxu1  ;;  %5021 = vmatprep.subr.mxu1 %v5799_v9 }
 0x277   : > { %1891 = vrot.lane.b32.xlu0 %v1424_v13, %s5801_s30 }
 0x278   : > { %v1385_v14 = vpop.f32.mrf.mxu0  ;;  %v1426_v15 = vpop.f32.mrf.mxu1  ;;  %5013 = vmatmul.mubr.msk.f32.vlgmr.msra.gmra.mxu1 %vm1471_vm2, %v1381_v10 }
 0x279   : > { %1611 = vrot.lane.b32.xlu1 %v1381_v10, %s5801_s30  ;;  %5023 = vmatprep.mubr.msk.f32.mxu1 %vm5800_vm1, %v5799_v9 }
 0x27a   : > { %v1386_v16 = vpop.f32.mrf.mxu0  ;;  %v1427_v17 = vpop.f32.mrf.mxu1 }
 0x27d   : > { %1889 = vrot.lane.b32.xlu1 %v1383_v12, %s5801_s30 }
 0x2b4   : > { %v1463_v18 = vpop.f32.mrf.mxu0 }
 0x2b5   : > { %v6177_v19 = vpack.c.bf16 %v1463_v18, %v1463_v18 }
 0x2b6   : > { %v6179_v20 = vpop.f32.mrf.mxu0 }
 0x2b7   : > { %v1569_v21 = vsel %vm1567_vm3, %v6177_v19, 0  ;;  %v1842_v7 = vpack.c.bf16 %v6179_v20, %v6179_v20 }
 0x2b8   : > { %v1467_v25 = vpop.f32.mrf.mxu0  ;;  %5016 = vmatpush3.bf16.msra.mxu0 %v1569_v21 }
 0x2b9   : > { %5026 = vmatprep.subr.bf16.mxu0 %v5799_v9 }
 0x2ba   : > { %v1468_v26 = vpop.f32.mrf.mxu0 }
 0x2e7   : > { %v1614_v27 = vpop.permute.xlu1 %1613 }
 0x2e8   : > { %5022 = vmatpush3.xpose.msk.msra.mxu1 %vm1471_vm2, %v1614_v27 }
 0x2e9   : > { %5032 = vmatprep.subr.mxu1 %v5799_v9  ;;  %v1892_v29 = vpop.permute.xlu0 %1891 }
 0x2eb   : > { %v1612_v28 = vpop.permute.xlu1 %1611 }
 0x2ec   : > { %5024 = vmatmul.mubr.msk.f32.vlgmr.msra.gmra.mxu1 %vm1471_vm2, %v1612_v28  ;;  %v1847_v28 = vsel %vm1567_vm3, %v1842_v7, 0 }
 0x2ed   : > { %5033 = vmatpush3.xpose.msk.msra.mxu1 %vm1471_vm2, %v1424_v13  ;;  %5034 = vmatprep.mubr.msk.f32.mxu1 %vm5800_vm1, %v5799_v9 }
 0x2ee   : > { %5043 = vmatprep.subr.mxu1 %v5799_v9 }
 0x2ef   : > { %v1890_v30 = vpop.permute.xlu1 %1889 }
 0x2f0   : > { %5035 = vmatmul.mubr.msk.f32.vlgmr.msra.gmra.mxu1 %vm1471_vm2, %v1383_v12 }
 0x2f1   : > { %5044 = vmatpush3.xpose.msk.msra.mxu1 %vm1471_vm2, %v1892_v29  ;;  %5045 = vmatprep.mubr.msk.f32.mxu1 %vm5800_vm1, %v5799_v9 }
 0x2f2   : > { %5048 = vmatprep.subr.bf16.mxu1 %v5799_v9 }
 0x2f4   : > { %5046 = vmatmul.mubr.msk.f32.vlgmr.msra.gmra.mxu1 %vm1471_vm2, %v1890_v30 }
 0x2f5   : > { %5050 = vmatprep.mubr.msk.bf16.mxu1 %vm5800_vm1, %v5799_v9 }
 0x338   : > { %v1544_v31 = vpop.f32.mrf.mxu1 }
 0x339   : > { %v1548_v33 = vmul.f32 0.0625, %v1544_v31 }
 0x33a   : > { %v5014_v34 = vpop.f32.mrf.mxu1 }
 0x33b   : > { %v1549_v35 = vadd.f32 %v1548_v33, %v1470_v32 }
 0x33d   : > { %v1551_v36 = vsel %vm1550_vm4, %v1549_v35, -inf }
 0x33e   : > { %1552 = vmax.xlane.f32.xlu1 %v1551_v36 }
 0x3ac   : > { %v1685_v37 = vpop.f32.mrf.mxu1 }
 0x3ad   : > { %v1689_v38 = vmul.f32 0.0625, %v1685_v37 }
 0x3ae   : > { %v5025_v39 = vpop.f32.mrf.mxu1 }
 0x3af   : > { %v1690_v40 = vadd.f32 %v1689_v38, %v1470_v32 }
 0x3b0   : > { %v1824_v41 = vpop.f32.mrf.mxu1 }
 0x3b1   : > { %v1828_v42 = vmul.f32 0.0625, %v1824_v41  ;;  %v1691_v43 = vsel %vm1550_vm4, %v1690_v40, -inf  ;;  %v5318_v41 = vld [vmem:[%s6230_s23 + $0x64] ss:$8 sps:$4 sm:$0xff]  }
 0x3b2   : > { %1692 = vmax.xlane.f32.xlu1 %v1691_v43  ;;  %v5036_v44 = vpop.f32.mrf.mxu1  ;;  %v5321_v43 = vld [vmem:[%s6230_s23 + $0x54] ss:$8 sps:$4 sm:$0xff]  }
 0x3b3   : > { %v1829_v45 = vadd.f32 %v1828_v42, %v1470_v32  ;;  %v5316_v42 = vld [vmem:[%s6230_s23 + $0x60] ss:$8 sps:$4 sm:$0xff]   ;;  %v5319_v44 = vld [vmem:[%s6230_s23 + $0x50] ss:$8 sps:$4 sm:$0xff]  }
 0x3b4   : > { %v1963_v46 = vpop.f32.mrf.mxu1 }
 0x3b5   : > { %v1967_v47 = vmul.f32 0.0625, %v1963_v46  ;;  %v1830_v48 = vsel %vm1550_vm4, %v1829_v45, -inf  ;;  %v5322_v46 = vld [vmem:[%s6230_s23 + $0x40] ss:$8 sps:$4 sm:$0xff]  }
 0x3b6   : > { %1831 = vmax.xlane.f32.xlu1 %v1830_v48  ;;  %v5047_v49 = vpop.f32.mrf.mxu1  ;;  %v5325_v48 = vld [vmem:[%s6230_s23 + $0x30] ss:$8 sps:$4 sm:$0xff]  }
 0x3b7   : > { %v1968_v50 = vadd.f32 %v1967_v47, %v1470_v32  ;;  %v5327_v47 = vld [vmem:[%s6230_s23 + $0x34] ss:$8 sps:$4 sm:$0xff]   ;;  %v5330_v49 = vld [vmem:[%s6230_s23 + $0x24] ss:$8 sps:$4 sm:$0xff]  }
 0x3b9   : > { %v1969_v51 = vsel %vm1550_vm4, %v1968_v50, -inf }
 0x3ba   : > { %1970 = vmax.xlane.f32.xlu0 %v1969_v51  ;;  %v5333_v51 = vld [vmem:[%s6230_s23 + $0x14] ss:$8 sps:$4 sm:$0xff]  }
 0x3c7   : > { %v1553_v52 = vpop.xlane.xlu1 %1552 }
 0x3c8   : > { %v1554_v53 = vsub.f32 %v1549_v35, %v1553_v52  ;;  %v5331_v52 = vld [vmem:[%s6230_s23 + $0x10] ss:$8 sps:$4 sm:$0xff]  }
 0x3ca   : > { %v1555_v54 = vmul.f32 1.442695, %v1554_v53  ;;  %v5336_v53 = vld [vmem:[%s6230_s23 + $0x4] ss:$8 sps:$4 sm:$0xff]  }
 0x3cc   : > { %5555 = vpow2.f32 %v1555_v54  ;;  %v5334_v54 = vld [vmem:[%s6230_s23] ss:$8 sps:$4 sm:$0xff]  }
 0x3d9   : > { %v5556_v55 = vpop.eup %5555 }
 0x3da   : > { %v1557_v56 = vsel %vm1550_vm4, %v5556_v55, 0.0 }
 0x3db   : > { %1558 = vadd.xlane.f32.xlu1 %v1557_v56  ;;  %v5337_v56 = vld [vmem:[%s6230_s23 + $0xf0] ss:$8 sps:$4 sm:$0xff]  }
 0x43b   : > { %v1693_v57 = vpop.xlane.xlu1 %1692 }
 0x43c   : > { %v1694_v58 = vsub.f32 %v1690_v40, %v1693_v57  ;;  %v5315_v40 = vld [vmem:[%s6230_s23 + $0x74] ss:$8 sps:$4 sm:$0xff]   ;;  %v5342_v57 = vld [vmem:[%s6230_s23 + $0xe4] ss:$8 sps:$4 sm:$0xff]  }
 0x43e   : > { %v1695_v59 = vmul.f32 1.442695, %v1694_v58  ;;  %v5340_v58 = vld [vmem:[%s6230_s23 + $0xe0] ss:$8 sps:$4 sm:$0xff]  }
 0x43f   : > { %v1832_v3 = vpop.xlane.xlu1 %1831 }
 0x440   : > { %5557 = vpow2.f32 %v1695_v59  ;;  %v1833_v10 = vsub.f32 %v1829_v45, %v1832_v3  ;;  %v5324_v45 = vld [vmem:[%s6230_s23 + $0x44] ss:$8 sps:$4 sm:$0xff]   ;;  %v5345_v59 = vld [vmem:[%s6230_s23 + $0xd4] ss:$8 sps:$4 sm:$0xff]  }
 0x441   : > { %v5357_v3 = vld [vmem:[%s6230_s23 + $0x94] ss:$8 sps:$4 sm:$0xff]  }
 0x442   : > { %v1834_v13 = vmul.f32 1.442695, %v1833_v10  ;;  %v5358_v10 = vld [vmem:[%s6230_s23 + $0x80] ss:$8 sps:$4 sm:$0xff]  }
 0x443   : > { %v1971_v60 = vpop.xlane.xlu0 %1970 }
 0x444   : > { %v1972_v61 = vsub.f32 %v1968_v50, %v1971_v60  ;;  %v5328_v50 = vld [vmem:[%s6230_s23 + $0x20] ss:$8 sps:$4 sm:$0xff]   ;;  %v5343_v60 = vld [vmem:[%s6230_s23 + $0xd0] ss:$8 sps:$4 sm:$0xff]  }
 0x446   : > { %v1973_v62 = vmul.f32 1.442695, %v1972_v61  ;;  %v5348_v61 = vld [vmem:[%s6230_s23 + $0xc4] ss:$8 sps:$4 sm:$0xff]  }
 0x448   : > { %5559 = vpow2.f32 %v1973_v62  ;;  %v5346_v62 = vld [vmem:[%s6230_s23 + $0xc0] ss:$8 sps:$4 sm:$0xff]  }
 0x44d   : > { %v5558_v63 = vpop.eup %5557 }
 0x44e   : > { %v1697_v0 = vsel %vm1550_vm4, %v5558_v63, 0.0 }
 0x44f   : > { %1698 = vadd.xlane.f32.xlu0 %v1697_v0  ;;  %v5349_v0 = vld [vmem:[%s6230_s23 + $0xb0] ss:$8 sps:$4 sm:$0xff]  }
 0x455   : > { %v5560_v1 = vpop.eup %5559 }
 0x456   : > { %v1975_v2 = vsel %vm1550_vm4, %v5560_v1, 0.0 }
 0x457   : > { %1976 = vadd.xlane.f32.xlu1 %v1975_v2  ;;  %v5352_v2 = vld [vmem:[%s6230_s23 + $0xa0] ss:$8 sps:$4 sm:$0xff]  }
 0x464   : > { %v1559_v4 = vpop.xlane.xlu1 %1558 }
 0x465   : > { %5561 = vrcp.f32 %v1559_v4  ;;  %1704 = vrot.lane.b32.xlu0 %v6177_v19, %s5801_s30  ;;  %v5355_v4 = vld [vmem:[%s6230_s23 + $0x90] ss:$8 sps:$4 sm:$0xff]  }
 0x466   : > { %5563 = vpow2.f32 %v1834_v13 }
 0x468   : > { %1982 = vrot.lane.b32.xlu1 %v1842_v7, %s5801_s30  ;;  %v5360_v7 = vld [vmem:[%s6230_s23 + $0x84] ss:$8 sps:$4 sm:$0xff]  }
 0x472   : > { %v5562_v8 = vpop.eup %5561 }
 0x473   : > { %v1561_v11 = vmul.f32 %v5562_v8, %v5556_v55  ;;  %v5564_v14 = vpop.eup %5563  ;;  %v5339_v55 = vld [vmem:[%s6230_s23 + $0xf4] ss:$8 sps:$4 sm:$0xff]  }
 0x474   : > { %v1836_v15 = vsel %vm1550_vm4, %v5564_v14, 0.0 }
 0x475   : > { %v1562_v12 = vpack.c.bf16 %v1561_v11, %v1561_v11 }
 0x477   : > { %5018 = vmatmul.mubr.msk.bf16.vlgmr.msra.gmra.mxu0 %vm1550_vm4, %v1562_v12 }
 0x478   : > { %5028 = vmatprep.mubr.msk.bf16.mxu0 %vm5800_vm1, %v5799_v9 }
 0x48c   : > { %1837 = vadd.xlane.f32.xlu1 %v1836_v15 }
 0x4d8   : > { %v1699_v16 = vpop.xlane.xlu0 %1698 }
 0x4d9   : > { %5565 = vrcp.f32 %v1699_v16 }
 0x4dc   : > { %v1705_v17 = vpop.permute.xlu0 %1704 }
 0x4dd   : > { %v1710_v18 = vsel %vm1567_vm3, %v1705_v17, 0 }
 0x4de   : > { %5027 = vmatpush3.bf16.msra.mxu0 %v1710_v18 }
 0x4df   : > { %5037 = vmatprep.subr.bf16.mxu0 %v5799_v9 }
 0x4e0   : > { %v1977_v19 = vpop.xlane.xlu1 %1976 }
 0x4e1   : > { %5567 = vrcp.f32 %v1977_v19 }
 0x4e4   : > { %v1983_v20 = vpop.permute.xlu1 %1982 }
 0x4e5   : > { %v1988_v21 = vsel %vm1567_vm3, %v1983_v20, 0 }
 0x4e6   : > { %v5566_v25 = vpop.eup %5565  ;;  %5049 = vmatpush3.bf16.msra.mxu1 %v1988_v21 }
 0x4e7   : > { %v1701_v26 = vmul.f32 %v5566_v25, %v5558_v63  ;;  %2249 = vmatprep.subr.bf16.mxu1 %v5315_v40  ;;  %v5351_v63 = vld [vmem:[%s6230_s23 + $0xb4] ss:$8 sps:$4 sm:$0xff]  }
 0x4e9   : > { %v1702_v27 = vpack.c.bf16 %v1701_v26, %v1701_v26 }
 0x4eb   : > { %5029 = vmatmul.mubr.msk.bf16.vlgmr.msra.gmra.mxu0 %vm1550_vm4, %v1702_v27 }
 0x4ec   : > { %5038 = vmatpush3.bf16.msra.mxu0 %v1847_v28  ;;  %5039 = vmatprep.mubr.msk.bf16.mxu0 %vm5800_vm1, %v5799_v9  ;;  %v5313_v9 = vld [vmem:[%s6230_s23 + $0x70] ss:$8 sps:$4 sm:$0xff]  }
 0x4ee   : > { %v5568_v29 = vpop.eup %5567 }
 0x4ef   : > { %v1979_v30 = vmul.f32 %v5568_v29, %v5560_v1  ;;  %v5354_v1 = vld [vmem:[%s6230_s23 + $0xa4] ss:$8 sps:$4 sm:$0xff]   ;;  %s4578_s23 = sshll.u32 %s6099_s17, 3 }
 0x4f1   : > { %v1980_v31 = vpack.c.bf16 %v1979_v30, %v1979_v30 }
 0x4f3   : > { %5051 = vmatmul.mubr.msk.bf16.vlgmr.msra.gmra.mxu1 %vm1550_vm4, %v1980_v31 }
 0x4f4   : > { %2250 = vmatpush1.bf16.msra.mxu1 %v5313_v9 }
 0x4f5   : > { %2251 = vmatprep.subr.bf16.mxu1 %v5318_v41 }
 0x4f8   : > { %2252 = vmatpush1.bf16.msra.mxu1 %v5316_v42 }
 0x4f9   : > { %2253 = vmatprep.subr.bf16.mxu1 %v5321_v43 }
 0x4fc   : > { %2254 = vmatpush1.bf16.msra.mxu1 %v5319_v44  ;;  %v2398_v44 = vld [vmem:[%s6285_s24 + $0x1c8] sm:$0xff] }
 0x4fd   : > { %2255 = vmatprep.subr.bf16.mxu1 %v5324_v45 }
 0x500   : > { %2256 = vmatpush1.bf16.msra.mxu1 %v5322_v46 }
 0x501   : > { %2257 = vmatprep.subr.bf16.mxu1 %v5327_v47  ;;  %v2402_v47 = vld [vmem:[%s6285_s24 + $0x1e8] sm:$0xff] }
 0x504   : > { %2258 = vmatpush1.bf16.msra.mxu1 %v5325_v48  ;;  %v2389_v48 = vld [vmem:[%s6285_s24 + $0x180] sm:$0xff] }
 0x505   : > { %2259 = vmatprep.subr.bf16.mxu1 %v5330_v49  ;;  %v2393_v49 = vld [vmem:[%s6285_s24 + $0x1a0] sm:$0xff] }
 0x508   : > { %2260 = vmatpush1.bf16.msra.mxu1 %v5328_v50  ;;  %v4785_v50 = vcombine.low %v2398_v44, %v2402_v47 }
 0x509   : > { %2261 = vmatprep.subr.bf16.mxu1 %v5333_v51  ;;  %v4786_v51 = vcombine.high %v2398_v44, %v2402_v47  ;;  %v2462_v47 = vld [vmem:[%s6285_s24 + $0x3c8] sm:$0xff] }
 0x50c   : > { %2262 = vmatpush1.bf16.msra.mxu1 %v5331_v52  ;;  %v4776_v52 = vcombine.high %v2389_v48, %v2393_v49 }
 0x50d   : > { %2263 = vmatprep.subr.bf16.mxu1 %v5336_v53  ;;  %v2390_v53 = vld [vmem:[%s6285_s24 + $0x188] sm:$0xff] }
 0x510   : > { %2264 = vmatpush1.bf16.msra.mxu1 %v5334_v54  ;;  %v2394_v54 = vld [vmem:[%s6285_s24 + $0x1a8] sm:$0xff] }
 0x511   : > { %2265 = vmatprep.subr.bf16.mxu1 %v5339_v55  ;;  %v2381_v55 = vld [vmem:[%s6285_s24 + $0x140] sm:$0xff] }
 0x514   : > { %2266 = vmatpush2.bf16.msra.mxu1 %v5337_v56  ;;  %v4778_v56 = vcombine.high %v2390_v53, %v2394_v54 }
 0x515   : > { %v1838_v32 = vpop.xlane.xlu1 %1837  ;;  %2267 = vmatprep.subr.bf16.mxu1 %v5342_v57  ;;  %v2385_v57 = vld [vmem:[%s6285_s24 + $0x160] sm:$0xff] }
 0x516   : > { %5569 = vrcp.f32 %v1838_v32 }
 0x518   : > { %2268 = vmatpush2.bf16.msra.mxu1 %v5340_v58  ;;  %v2382_v58 = vld [vmem:[%s6285_s24 + $0x148] sm:$0xff] }
 0x519   : > { %2269 = vmatprep.subr.bf16.mxu1 %v5345_v59  ;;  %v2386_v59 = vld [vmem:[%s6285_s24 + $0x168] sm:$0xff] }
 0x51c   : > { %2270 = vmatpush2.bf16.msra.mxu1 %v5343_v60  ;;  %v4775_v60 = vcombine.low %v2389_v48, %v2393_v49  ;;  %v2466_v48 = vld [vmem:[%s6285_s24 + $0x3e8] sm:$0xff] }
 0x51d   : > { %2271 = vmatprep.subr.bf16.mxu1 %v5348_v61  ;;  %v4777_v61 = vcombine.low %v2390_v53, %v2394_v54  ;;  %v2453_v53 = vld [vmem:[%s6285_s24 + $0x380] sm:$0xff] }
 0x51e   : > { %v2457_v54 = vld [vmem:[%s6285_s24 + $0x3a0] sm:$0xff] }
 0x520   : > { %2272 = vmatpush2.bf16.msra.mxu1 %v5346_v62  ;;  %v4768_v62 = vcombine.high %v2381_v55, %v2385_v57 }
 0x521   : > { %2273 = vmatprep.subr.bf16.mxu1 %v5351_v63  ;;  %v4770_v63 = vcombine.high %v2382_v58, %v2386_v59 }
 0x523   : > { %v5570_v33 = vpop.eup %5569 }
 0x524   : > { %v1840_v34 = vmul.f32 %v5570_v33, %v5564_v14  ;;  %2274 = vmatpush2.bf16.msra.mxu1 %v5349_v0  ;;  %v2077_v33 = vld [vmem:[%s688_s10] sm:$0x3]  ;;  %s6668_s10 = sld [smem:[#allocation20_spill]] }
 0x525   : > { %2275 = vmatprep.subr.bf16.mxu1 %v5354_v1  ;;  %v2373_v0 = vld [vmem:[%s6285_s24 + $0x100] sm:$0xff] }
 0x526   : > { %v1841_v35 = vpack.c.bf16 %v1840_v34, %v1840_v34  ;;  %v2082_v34 = vrot.slane %v2077_v33, %v6118_v24  ;;  %v2377_v1 = vld [vmem:[%s6285_s24 + $0x120] sm:$0xff] }
 0x528   : > { %5040 = vmatmul.mubr.msk.bf16.vlgmr.msra.gmra.mxu0 %vm1550_vm4, %v1841_v35  ;;  %2276 = vmatpush2.bf16.msra.mxu1 %v5352_v2  ;;  %v2086_v35 = vrot.slane %v2077_v33, %v6115_v23  ;;  %v2374_v2 = vld [vmem:[%s6285_s24 + $0x108] sm:$0xff] }
 0x529   : > { %2277 = vmatprep.subr.bf16.mxu1 %v5357_v3  ;;  %v2378_v3 = vld [vmem:[%s6285_s24 + $0x128] sm:$0xff] }
 0x52a   : > { %v2354_v33 = vld [vmem:[%s6285_s24 + $0x68] sm:$0xff]  ;;  %s700_s12 = scalar_lea.vmem %s6668_s10, %s4578_s23 }
 0x52c   : > { %2278 = vmatpush2.bf16.msra.mxu1 %v5355_v4  ;;  %v4767_v4 = vcombine.low %v2381_v55, %v2385_v57  ;;  %v2454_v55 = vld [vmem:[%s6285_s24 + $0x388] sm:$0xff] }
 0x52d   : > { %2279 = vmatprep.subr.bf16.mxu1 %v5360_v7  ;;  %v4769_v7 = vcombine.low %v2382_v58, %v2386_v59  ;;  %v4849_v58 = vcombine.low %v2462_v47, %v2466_v48  ;;  %v4840_v59 = vcombine.high %v2453_v53, %v2457_v54 }
 0x530   : > { %2280 = vmatpush2.bf16.msra.mxu1 %v5358_v10  ;;  %v4762_v10 = vcombine.high %v2374_v2, %v2378_v3 }
 0x531   : > { %3192 = vmatprep.subr.bf16.mxu1 %v4786_v51 }
 0x537   : > { %v6227_v36 = vpop.f32.mrf.mxu0 }
 0x539   : > { %v5019_v37 = vpop.f32.mrf.mxu0 }
 0x53b   : > { %v1608_v38 = vpop.f32.mrf.mxu0 }
 0x53d   : > { %v5020_v39 = vpop.f32.mrf.mxu0 }
 0x5ab   : > { %v1746_v8 = vpop.f32.mrf.mxu0 }
 0x5ad   : > { %v5030_v11 = vpop.f32.mrf.mxu0 }
 0x5ae   : > { %v2365_v11 = vld [vmem:[%s6285_s24 + $0xc0] sm:$0xff] }
 0x5af   : > { %v1749_v12 = vpop.f32.mrf.mxu0 }
 0x5b0   : > { %v2369_v12 = vld [vmem:[%s6285_s24 + $0xe0] sm:$0xff] }
 0x5b1   : > { %v5031_v13 = vpop.f32.mrf.mxu0 }
 0x5b2   : > { %v2366_v13 = vld [vmem:[%s6285_s24 + $0xc8] sm:$0xff] }
 0x5b3   : > { %v2024_v14 = vpop.f32.mrf.mxu1 }
 0x5b4   : > { %v5164_v15 = vpack.i.bf16 %v1746_v8, %v2024_v14  ;;  %v4760_v8 = vcombine.high %v2373_v0, %v2377_v1  ;;  %v2370_v14 = vld [vmem:[%s6285_s24 + $0xe8] sm:$0xff] }
 0x5b5   : > { %v5052_v16 = vpop.f32.mrf.mxu1 }
 0x5b6   : > { %5165 = vrot.lane.b32.xlu0 %v5164_v15, %s5801_s30  ;;  %v4759_v15 = vcombine.low %v2373_v0, %v2377_v1  ;;  %v4761_v16 = vcombine.low %v2374_v2, %v2378_v3  ;;  %s692_s30 = scalar_lea.vmem %s6639_s7, %s6102_s11 }
 0x5b7   : > { %v2027_v17 = vpop.f32.mrf.mxu1 }
 0x5b8   : > { %v4752_v17 = vcombine.high %v2365_v11, %v2369_v12 }
 0x5b9   : > { %v5053_v18 = vpop.f32.mrf.mxu1 }
 0x5ba   : > { %v4754_v18 = vcombine.high %v2366_v13, %v2370_v14 }
 0x5e8   : > { %v1883_v19 = vpop.f32.mrf.mxu0 }
 0x5ea   : > { %v5041_v20 = vpop.f32.mrf.mxu0 }
 0x5eb   : > { %v2361_v20 = vld [vmem:[%s6285_s24 + $0xa0] sm:$0xff] }
 0x5ec   : > { %v1886_v21 = vpop.f32.mrf.mxu0 }
 0x5ed   : > { %v2358_v21 = vld [vmem:[%s6285_s24 + $0x88] sm:$0xff] }
 0x5ee   : > { %v5042_v25 = vpop.f32.mrf.mxu0 }
 0x5ef   : > { %v2362_v25 = vld [vmem:[%s6285_s24 + $0xa8] sm:$0xff] }
 0x628   : > { %v5166_v26 = vpop.permute.xlu0 %5165 }
 0x629   : > { %v5168_v27 = vunpack.i.h.bf16 %v5166_v26  ;;  %v5167_v28 = vunpack.i.l.bf16 %v5166_v26  ;;  %v4751_v26 = vcombine.low %v2365_v11, %v2369_v12  ;;  %v2446_v11 = vld [vmem:[%s6285_s24 + $0x348] sm:$0xff] }
 0x62b   : > { %v2038_v29 = vsel %vm1471_vm2, %v6227_v36, %v5168_v27  ;;  %v2039_v30 = vsel %vm1471_vm2, %v1883_v19, %v5167_v28  ;;  %v2357_v19 = vld [vmem:[%s6285_s24 + $0x80] sm:$0xff]  ;;  %v4753_v27 = vcombine.low %v2366_v13, %v2370_v14  ;;  %v2450_v13 = vld [vmem:[%s6285_s24 + $0x368] sm:$0xff] }
 0x62c   : > { %v2040_v31 = vpack.c.bf16 %v2038_v29, %v2038_v29  ;;  %v2041_v32 = vpack.c.bf16 %v2039_v30, %v2039_v30  ;;  %v4744_v28 = vcombine.high %v2357_v19, %v2361_v20  ;;  %v4746_v29 = vcombine.high %v2358_v21, %v2362_v25  ;;  %v2349_v30 = vld [vmem:[%s6285_s24 + $0x40] sm:$0xff] }
 0x62e   : > { %2281 = vmatprep.mubr.bf16.mxu1 %v2041_v32  ;;  %v2350_v32 = vld [vmem:[%s6285_s24 + $0x48] sm:$0xff] }
 0x62f   : > { %2282 = vmatmul.mubr.bf16.vlgmr.msra.gmra.mxu1 %v2040_v31  ;;  %v2353_v31 = vld [vmem:[%s6285_s24 + $0x60] sm:$0xff] }
 0x630   : > { %3193 = vmatpush1.bf16.msra.mxu1 %v4785_v50 }
 0x631   : > { %3194 = vmatprep.subr.bf16.mxu1 %v4778_v56  ;;  %v2458_v56 = vld [vmem:[%s6285_s24 + $0x3a8] sm:$0xff] }
 0x634   : > { %3195 = vmatpush1.bf16.msra.mxu1 %v4777_v61  ;;  %v4839_v61 = vcombine.low %v2453_v53, %v2457_v54 }
 0x635   : > { %3196 = vmatprep.subr.bf16.mxu1 %v4770_v63 }
 0x638   : > { %3197 = vmatpush1.bf16.msra.mxu1 %v4769_v7 }
 0x639   : > { %3198 = vmatprep.subr.bf16.mxu1 %v4762_v10  ;;  %v2449_v10 = vld [vmem:[%s6285_s24 + $0x360] sm:$0xff] }
 0x63c   : > { %3199 = vmatpush1.bf16.msra.mxu1 %v4761_v16  ;;  %v4834_v16 = vcombine.high %v2446_v11, %v2450_v13 }
 0x63d   : > { %3200 = vmatprep.subr.bf16.mxu1 %v4754_v18  ;;  %v2441_v18 = vld [vmem:[%s6285_s24 + $0x320] sm:$0xff] }
 0x640   : > { %3201 = vmatpush1.bf16.msra.mxu1 %v4753_v27  ;;  %v2433_v27 = vld [vmem:[%s6285_s24 + $0x2e0] sm:$0xff] }
 0x641   : > { %3202 = vmatprep.subr.bf16.mxu1 %v4746_v29 }
 0x6ef   : > { %v2283_v37 = vpop.f32.mrf.mxu1 }
 0x6f0   : > { %v2284_v38 = vadd.f32 %v2283_v37, %v2082_v34  ;;  %v4743_v34 = vcombine.low %v2357_v19, %v2361_v20  ;;  %v4736_v37 = vcombine.high %v2349_v30, %v2353_v31  ;;  %v2438_v19 = vld [vmem:[%s6285_s24 + $0x308] sm:$0xff] }
 0x6f1   : > { %v2285_v36 = vpop.f32.mrf.mxu1 }
 0x6f2   : > { %v2286_v39 = vadd.f32 %v2285_v36, %v2086_v35  ;;  %v6275_v40 = vadd.f32 %v2284_v38, %v6013_v5  ;;  %v2397_v5 = vld [vmem:[%s6285_s24 + $0x1c0] sm:$0xff]  ;;  %v4745_v35 = vcombine.low %v2358_v21, %v2362_v25  ;;  %v4738_v38 = vcombine.high %v2350_v32, %v2354_v33  ;;  %v2442_v25 = vld [vmem:[%s6285_s24 + $0x328] sm:$0xff] }
 0x6f3   : > { %v2287_v9 = vpop.f32.mrf.mxu1  ;;  %v2341_v36 = vld [vmem:[%s6285_s24] sm:$0xff]  ;;  %v4826_v29 = vcombine.high %v2438_v19, %v2442_v25 }
 0x6f4   : > { %v6278_v41 = vadd.f32 %v2286_v39, %v6015_v6  ;;  %v2401_v6 = vld [vmem:[%s6285_s24 + $0x1e0] sm:$0xff]  ;;  %v2342_v9 = vld [vmem:[%s6285_s24 + $0x8] sm:$0xff]  ;;  %3203 = vmatpush1.bf16.msra.mxu1 %v4745_v35 }
 0x6f5   : > { %v2288_v42 = vpop.f32.mrf.mxu1  ;;  %v4783_v45 = vcombine.low %v2397_v5, %v2401_v6  ;;  %v4784_v46 = vcombine.high %v2397_v5, %v2401_v6  ;;  %v2345_v39 = vld [vmem:[%s6285_s24 + $0x20] sm:$0xff]  ;;  %v4737_v5 = vcombine.low %v2350_v32, %v2354_v33  ;;  %3204 = vmatprep.subr.bf16.mxu1 %v4738_v38  ;;  %v2434_v32 = vld [vmem:[%s6285_s24 + $0x2e8] sm:$0xff] }
 0x6f6   : > { %v2294_v43 = vadd.f32 %v6278_v41, %v6275_v40  ;;  %v2346_v42 = vld [vmem:[%s6285_s24 + $0x28] sm:$0xff]  ;;  %v4728_v6 = vcombine.high %v2341_v36, %v2345_v39  ;;  %v4727_v49 = vcombine.low %v2341_v36, %v2345_v39  ;;  %v2421_v33 = vld [vmem:[%s6285_s24 + $0x280] sm:$0xff] }
 0x6f7   : > { %3151 = vmatprep.subr.bf16.mxu0 %v4784_v46  ;;  %v4730_v44 = vcombine.high %v2342_v9, %v2346_v42  ;;  %v2465_v46 = vld [vmem:[%s6285_s24 + $0x3e0] sm:$0xff]  ;;  %v4729_v50 = vcombine.low %v2342_v9, %v2346_v42  ;;  %v2426_v38 = vld [vmem:[%s6285_s24 + $0x2a8] sm:$0xff] }
 0x6f8   : > { %2295 = vadd.xlane.f32.xlu0 %v2294_v43  ;;  %3152 = vmatpush1.bf16.msra.mxu0 %v4783_v45  ;;  %v4735_v43 = vcombine.low %v2349_v30, %v2353_v31  ;;  %v2461_v45 = vld [vmem:[%s6285_s24 + $0x3c0] sm:$0xff]  ;;  %v2430_v31 = vld [vmem:[%s6285_s24 + $0x2c8] sm:$0xff] }
 0x6f9   : > { %3153 = vmatprep.subr.bf16.mxu0 %v4776_v52  ;;  %3205 = vmatpush1.bf16.msra.mxu1 %v4737_v5  ;;  %v4848_v51 = vcombine.high %v2461_v45, %v2465_v46  ;;  %v4850_v52 = vcombine.high %v2462_v47, %v2466_v48  ;;  %v4847_v57 = vcombine.low %v2461_v45, %v2465_v46  ;;  %v2425_v35 = vld [vmem:[%s6285_s24 + $0x2a0] sm:$0xff] }
 0x6fa   : > { %3206 = vmatprep.subr.bf16.mxu1 %v4730_v44  ;;  %v4817_v39 = vcombine.low %v2430_v31, %v2434_v32  ;;  %v4808_v9 = vcombine.high %v2421_v33, %v2425_v35  ;;  %v2417_v5 = vld [vmem:[%s6285_s24 + $0x260] sm:$0xff]  ;;  %v2418_v44 = vld [vmem:[%s6285_s24 + $0x268] sm:$0xff]  ;;  %v4807_v45 = vcombine.low %v2421_v33, %v2425_v35  ;;  %v2384_v35 = vld [vmem:[%s6285_s24 + $0x158] sm:$0xff] }
 0x6fc   : > { %3154 = vmatpush1.bf16.msra.mxu0 %v4775_v60  ;;  %v4842_v60 = vcombine.high %v2454_v55, %v2458_v56 }
 0x6fd   : > { %3155 = vmatprep.subr.bf16.mxu0 %v4768_v62  ;;  %3207 = vmatpush1.bf16.msra.mxu1 %v4729_v50  ;;  %v4841_v62 = vcombine.low %v2454_v55, %v2458_v56  ;;  %v2409_v50 = vld [vmem:[%s6285_s24 + $0x220] sm:$0xff] }
 0x6fe   : > { %3208 = vmatprep.subr.bf16.mxu1 %v4850_v52  ;;  %v2410_v52 = vld [vmem:[%s6285_s24 + $0x228] sm:$0xff] }
 0x700   : > { %3156 = vmatpush1.bf16.msra.mxu0 %v4767_v4 }
 0x701   : > { %3157 = vmatprep.subr.bf16.mxu0 %v4760_v8  ;;  %3209 = vmatpush2.bf16.msra.mxu1 %v4849_v58  ;;  %v2445_v8 = vld [vmem:[%s6285_s24 + $0x340] sm:$0xff] }
 0x702   : > { %3210 = vmatprep.subr.bf16.mxu1 %v4842_v60  ;;  %v4832_v12 = vcombine.high %v2445_v8, %v2449_v10  ;;  %v4831_v14 = vcombine.low %v2445_v8, %v2449_v10  ;;  %v2403_v60 = vld [vmem:[%s6285_s24 + $0x1f0] sm:$0xff] }
 0x704   : > { %3158 = vmatpush1.bf16.msra.mxu0 %v4759_v15  ;;  %v4833_v15 = vcombine.low %v2446_v11, %v2450_v13  ;;  %v2292_v11 = vld [vmem:[%s692_s30] sm:$0x3] }
 0x705   : > { %3159 = vmatprep.subr.bf16.mxu0 %v4752_v17  ;;  %3211 = vmatpush2.bf16.msra.mxu1 %v4841_v62  ;;  %v2437_v17 = vld [vmem:[%s6285_s24 + $0x300] sm:$0xff]  ;;  %v2318_v13 = vrot.slane %v2292_v11, %v6115_v23 }
 0x706   : > { %3212 = vmatprep.subr.bf16.mxu1 %v4834_v16  ;;  %v4823_v20 = vcombine.low %v2437_v17, %v2441_v18  ;;  %v4824_v21 = vcombine.high %v2437_v17, %v2441_v18 }
 0x708   : > { %3160 = vmatpush1.bf16.msra.mxu0 %v4751_v26  ;;  %v2429_v26 = vld [vmem:[%s6285_s24 + $0x2c0] sm:$0xff] }
 0x709   : > { %3161 = vmatprep.subr.bf16.mxu0 %v4744_v28  ;;  %3213 = vmatpush2.bf16.msra.mxu1 %v4833_v15  ;;  %v4825_v28 = vcombine.low %v2438_v19, %v2442_v25  ;;  %v4816_v30 = vcombine.high %v2429_v26, %v2433_v27  ;;  %v4815_v36 = vcombine.low %v2429_v26, %v2433_v27  ;;  %v2391_v25 = vld [vmem:[%s6285_s24 + $0x190] sm:$0xff]  ;;  %v2392_v27 = vld [vmem:[%s6285_s24 + $0x198] sm:$0xff] }
 0x70a   : > { %3214 = vmatprep.subr.bf16.mxu1 %v4826_v29  ;;  %v2395_v26 = vld [vmem:[%s6285_s24 + $0x1b0] sm:$0xff] }
 0x70c   : > { %3162 = vmatpush1.bf16.msra.mxu0 %v4743_v34  ;;  %v4818_v34 = vcombine.high %v2430_v31, %v2434_v32 }
 0x70d   : > { %3163 = vmatprep.subr.bf16.mxu0 %v4736_v37  ;;  %v2422_v37 = vld [vmem:[%s6285_s24 + $0x288] sm:$0xff]  ;;  %3215 = vmatpush2.bf16.msra.mxu1 %v4825_v28  ;;  %v2396_v28 = vld [vmem:[%s6285_s24 + $0x1b8] sm:$0xff] }
 0x70e   : > { %3216 = vmatprep.subr.bf16.mxu1 %v4818_v34  ;;  %v4810_v42 = vcombine.high %v2422_v37, %v2426_v38  ;;  %v4809_v46 = vcombine.low %v2422_v37, %v2426_v38  ;;  %v4782_v33 = vcombine.high %v2392_v27, %v2396_v28  ;;  %v2387_v34 = vld [vmem:[%s6285_s24 + $0x170] sm:$0xff]  ;;  %v2388_v37 = vld [vmem:[%s6285_s24 + $0x178] sm:$0xff]  ;;  %v4779_v38 = vcombine.low %v2391_v25, %v2395_v26 }
 0x710   : > { %3164 = vmatpush1.bf16.msra.mxu0 %v4735_v43  ;;  %v2413_v43 = vld [vmem:[%s6285_s24 + $0x240] sm:$0xff] }
 0x711   : > { %3165 = vmatprep.subr.bf16.mxu0 %v4728_v6  ;;  %v2414_v6 = vld [vmem:[%s6285_s24 + $0x248] sm:$0xff]  ;;  %3217 = vmatpush2.bf16.msra.mxu1 %v4817_v39  ;;  %v4800_v47 = vcombine.high %v2413_v43, %v2417_v5  ;;  %v4799_v53 = vcombine.low %v2413_v43, %v2417_v5  ;;  %v2379_v43 = vld [vmem:[%s6285_s24 + $0x130] sm:$0xff]  ;;  %v2376_v5 = vld [vmem:[%s6285_s24 + $0x118] sm:$0xff] }
 0x712   : > { %3218 = vmatprep.subr.bf16.mxu1 %v4810_v42  ;;  %v4802_v48 = vcombine.high %v2414_v6, %v2418_v44  ;;  %v4801_v54 = vcombine.low %v2414_v6, %v2418_v44  ;;  %v2375_v42 = vld [vmem:[%s6285_s24 + $0x110] sm:$0xff]  ;;  %v2380_v6 = vld [vmem:[%s6285_s24 + $0x138] sm:$0xff] }
 0x714   : > { %3166 = vmatpush1.bf16.msra.mxu0 %v4727_v49  ;;  %v2405_v49 = vld [vmem:[%s6285_s24 + $0x200] sm:$0xff] }
 0x715   : > { %3167 = vmatprep.subr.bf16.mxu0 %v4848_v51  ;;  %v2406_v51 = vld [vmem:[%s6285_s24 + $0x208] sm:$0xff]  ;;  %3219 = vmatpush2.bf16.msra.mxu1 %v4809_v46  ;;  %v4792_v55 = vcombine.high %v2405_v49, %v2409_v50  ;;  %v4764_v46 = vcombine.high %v2375_v42, %v2379_v43 }
 0x716   : > { %3220 = vmatprep.subr.bf16.mxu1 %v4802_v48  ;;  %v4794_v56 = vcombine.high %v2406_v51, %v2410_v52  ;;  %v4793_v58 = vcombine.low %v2406_v51, %v2410_v52  ;;  %v2367_v48 = vld [vmem:[%s6285_s24 + $0xd0] sm:$0xff]  ;;  %v2372_v51 = vld [vmem:[%s6285_s24 + $0xf8] sm:$0xff]  ;;  %v4763_v52 = vcombine.low %v2375_v42, %v2379_v43 }
 0x717   : > { %v2448_v42 = vld [vmem:[%s6285_s24 + $0x358] sm:$0xff] }
 0x718   : > { %3168 = vmatpush2.bf16.msra.mxu0 %v4847_v57  ;;  %v4791_v57 = vcombine.low %v2405_v49, %v2409_v50  ;;  %v2371_v49 = vld [vmem:[%s6285_s24 + $0xf0] sm:$0xff]  ;;  %v2368_v50 = vld [vmem:[%s6285_s24 + $0xd8] sm:$0xff] }
 0x719   : > { %3169 = vmatprep.subr.bf16.mxu0 %v4840_v59  ;;  %3221 = vmatpush2.bf16.msra.mxu1 %v4801_v54  ;;  %v2399_v59 = vld [vmem:[%s6285_s24 + $0x1d0] sm:$0xff]  ;;  %v4756_v54 = vcombine.high %v2367_v48, %v2371_v49  ;;  %v2452_v43 = vld [vmem:[%s6285_s24 + $0x378] sm:$0xff] }
 0x71a   : > { %3222 = vmatprep.subr.bf16.mxu1 %v4794_v56  ;;  %v4788_v62 = vcombine.high %v2399_v59, %v2403_v60  ;;  %v2359_v56 = vld [vmem:[%s6285_s24 + $0x90] sm:$0xff] }
 0x71c   : > { %3170 = vmatpush2.bf16.msra.mxu0 %v4839_v61  ;;  %v2400_v61 = vld [vmem:[%s6285_s24 + $0x1d8] sm:$0xff] }
 0x71d   : > { %3171 = vmatprep.subr.bf16.mxu0 %v4832_v12  ;;  %3223 = vmatpush2.bf16.msra.mxu1 %v4793_v58  ;;  %v2293_v12 = vld [vmem:[%s696_s29] sm:$0x3]  ;;  %v2360_v58 = vld [vmem:[%s6285_s24 + $0x98] sm:$0xff] }
 0x71e   : > { %v2331_v17 = vrot.slane %v2293_v12, %v6115_v23  ;;  %v2327_v19 = vrot.slane %v2293_v12, %v6118_v24 }
 0x720   : > { %3172 = vmatpush2.bf16.msra.mxu0 %v4831_v14  ;;  %v2314_v14 = vrot.slane %v2292_v11, %v6118_v24 }
 0x721   : > { %3173 = vmatprep.subr.bf16.mxu0 %v4824_v21 }
 0x724   : > { %3174 = vmatpush2.bf16.msra.mxu0 %v4823_v20 }
 0x725   : > { %3175 = vmatprep.subr.bf16.mxu0 %v4816_v30 }
 0x728   : > { %3176 = vmatpush2.bf16.msra.mxu0 %v4815_v36  ;;  %v4781_v36 = vcombine.low %v2392_v27, %v2396_v28  ;;  %v2468_v27 = vld [vmem:[%s6285_s24 + $0x3f8] sm:$0xff] }
 0x729   : > { %3177 = vmatprep.subr.bf16.mxu0 %v4808_v9  ;;  %v4774_v9 = vcombine.high %v2384_v35, %v2388_v37 }
 0x72c   : > { %3178 = vmatpush2.bf16.msra.mxu0 %v4807_v45  ;;  %v4773_v45 = vcombine.low %v2384_v35, %v2388_v37 }
 0x72d   : > { %3179 = vmatprep.subr.bf16.mxu0 %v4800_v47  ;;  %v4766_v47 = vcombine.high %v2376_v5, %v2380_v6 }
 0x730   : > { %3180 = vmatpush2.bf16.msra.mxu0 %v4799_v53  ;;  %v4765_v53 = vcombine.low %v2376_v5, %v2380_v6 }
 0x731   : > { %3181 = vmatprep.subr.bf16.mxu0 %v4792_v55  ;;  %v4758_v55 = vcombine.high %v2368_v50, %v2372_v51 }
 0x734   : > { %3182 = vmatpush2.bf16.msra.mxu0 %v4791_v57  ;;  %v2363_v57 = vld [vmem:[%s6285_s24 + $0xb0] sm:$0xff] }
 0x735   : > { %3233 = vmatprep.subr.bf16.mxu0 %v4788_v62  ;;  %v4748_v62 = vcombine.high %v2359_v56, %v2363_v57 }
 0x781   : > { %v2296_v63 = vpop.xlane.xlu0 %2295 }
 0x782   : > { %v2297_v0 = vmul.f32 0.00390625, %v2296_v63  ;;  %v2404_v63 = vld [vmem:[%s6285_s24 + $0x1f8] sm:$0xff] }
 0x784   : > { %v6328_v1 = vsub.f32 %v6275_v40, %v2297_v0  ;;  %v6331_v2 = vsub.f32 %v6278_v41, %v2297_v0  ;;  %v4787_v0 = vcombine.low %v2399_v59, %v2403_v60  ;;  %v2364_v59 = vld [vmem:[%s6285_s24 + $0xb8] sm:$0xff]  ;;  %v4755_v60 = vcombine.low %v2367_v48, %v2371_v49 }
 0x785   : > { %v2440_v48 = vld [vmem:[%s6285_s24 + $0x318] sm:$0xff] }
 0x786   : > { %v2300_v3 = vmul.f32 %v6328_v1, %v6328_v1  ;;  %v2301_v4 = vmul.f32 %v6331_v2, %v6331_v2  ;;  %v2444_v49 = vld [vmem:[%s6285_s24 + $0x338] sm:$0xff] }
 0x788   : > { %v2302_v7 = vadd.f32 %v2301_v4, %v2300_v3  ;;  %v4789_v3 = vcombine.low %v2400_v61, %v2404_v63  ;;  %v4790_v4 = vcombine.high %v2400_v61, %v2404_v63  ;;  %v4757_v61 = vcombine.low %v2368_v50, %v2372_v51 }
 0x789   : > { %v4750_v63 = vcombine.high %v2360_v58, %v2364_v59  ;;  %v4837_v51 = vcombine.low %v2448_v42, %v2452_v43 }
 0x78a   : > { %2303 = vadd.xlane.f32.xlu1 %v2302_v7  ;;  %3274 = vmatprep.subr.bf16.mxu1 %v4790_v4  ;;  %v2352_v4 = vld [vmem:[%s6285_s24 + $0x58] sm:$0xff] }
 0x813   : > { %v2304_v7 = vpop.xlane.xlu1 %2303 }
 0x814   : > { %v2305_v8 = vmul.f32 0.00390625, %v2304_v7  ;;  %v2356_v7 = vld [vmem:[%s6285_s24 + $0x78] sm:$0xff] }
 0x815   : > { %v4742_v12 = vcombine.high %v2352_v4, %v2356_v7 }
 0x816   : > { %v2306_v10 = vadd.f32 1e-05, %v2305_v8  ;;  %v4747_v8 = vcombine.low %v2359_v56, %v2363_v57  ;;  %v2432_v56 = vld [vmem:[%s6285_s24 + $0x2d8] sm:$0xff] }
 0x817   : > { %v2436_v57 = vld [vmem:[%s6285_s24 + $0x2f8] sm:$0xff] }
 0x818   : > { %5571 = vrsqrt.f32 %v2306_v10  ;;  %v4749_v10 = vcombine.low %v2360_v58, %v2364_v59  ;;  %v4829_v59 = vcombine.low %v2440_v48, %v2444_v49 }
 0x825   : > { %v5572_v15 = vpop.eup %5571 }
 0x826   : > { %v2309_v16 = vmul.f32 %v5572_v15, %v6331_v2  ;;  %v2308_v18 = vmul.f32 %v5572_v15, %v6328_v1  ;;  %v2383_v2 = vld [vmem:[%s6285_s24 + $0x150] sm:$0xff]  ;;  %v4780_v1 = vcombine.high %v2391_v25, %v2395_v26  ;;  %v2344_v15 = vld [vmem:[%s6285_s24 + $0x18] sm:$0xff] }
 0x827   : > { %v4772_v39 = vcombine.high %v2383_v2, %v2387_v34  ;;  %v4771_v44 = vcombine.low %v2383_v2, %v2387_v34  ;;  %v2467_v25 = vld [vmem:[%s6285_s24 + $0x3f0] sm:$0xff]  ;;  %v2464_v26 = vld [vmem:[%s6285_s24 + $0x3d8] sm:$0xff] }
 0x828   : > { %v2322_v20 = vmul.f32 %v2318_v13, %v2309_v16  ;;  %v2321_v21 = vmul.f32 %v2314_v14, %v2308_v18  ;;  %v2343_v13 = vld [vmem:[%s6285_s24 + $0x10] sm:$0xff]  ;;  %v2348_v16 = vld [vmem:[%s6285_s24 + $0x38] sm:$0xff]  ;;  %v4741_v18 = vcombine.low %v2352_v4, %v2356_v7  ;;  %v4853_v37 = vcombine.low %v2464_v26, %v2468_v27 }
 0x829   : > { %v2347_v14 = vld [vmem:[%s6285_s24 + $0x30] sm:$0xff]  ;;  %v2460_v34 = vld [vmem:[%s6285_s24 + $0x3b8] sm:$0xff]  ;;  %v4821_v7 = vcombine.low %v2432_v56, %v2436_v57 }
 0x82a   : > { %v2335_v29 = vadd.f32 %v2331_v17, %v2322_v20  ;;  %v2334_v30 = vadd.f32 %v2327_v19, %v2321_v21  ;;  %v4732_v19 = vcombine.high %v2343_v13, %v2347_v14  ;;  %v4734_v20 = vcombine.high %v2344_v15, %v2348_v16  ;;  %v2463_v21 = vld [vmem:[%s6285_s24 + $0x3d0] sm:$0xff] }
 0x82b   : > { %v4731_v28 = vcombine.low %v2343_v13, %v2347_v14  ;;  %v2455_v2 = vld [vmem:[%s6285_s24 + $0x390] sm:$0xff]  ;;  %v4851_v35 = vcombine.low %v2463_v21, %v2467_v25  ;;  %v2416_v13 = vld [vmem:[%s6285_s24 + $0x258] sm:$0xff] }
 0x82c   : > { %v2337_v31 = vpack.c.bf16 %v2335_v29, %v2335_v29  ;;  %v6387_v32 = vpack.c.bf16 %v2334_v30, %v2334_v30  ;;  %v4733_v29 = vcombine.low %v2344_v15, %v2348_v16  ;;  %v4852_v30 = vcombine.high %v2463_v21, %v2467_v25  ;;  %v2420_v14 = vld [vmem:[%s6285_s24 + $0x278] sm:$0xff] }
 0x82d   : > { %v2408_v21 = vld [vmem:[%s6285_s24 + $0x218] sm:$0xff] }
 0x82e   : > { %3183 = vmatprep.mubr.bf16.mxu0 %v2337_v31  ;;  %3224 = vmatprep.mubr.bf16.mxu1 %v2337_v31  ;;  %v2412_v25 = vld [vmem:[%s6285_s24 + $0x238] sm:$0xff] }
 0x82f   : > { %3184 = vmatmul.mubr.bf16.vlgmr.msra.gmra.mxu0 %v6387_v32  ;;  %3225 = vmatmul.mubr.bf16.vlgmr.msra.gmra.mxu1 %v6387_v32 }
 0x830   : > { %3234 = vmatpush1.bf16.msra.mxu0 %v4787_v0  ;;  %3275 = vmatpush1.bf16.msra.mxu1 %v4789_v3  ;;  %v2351_v0 = vld [vmem:[%s6285_s24 + $0x50] sm:$0xff] }
 0x831   : > { %3265 = vmatprep.mubr.bf16.mxu0 %v2337_v31  ;;  %3306 = vmatprep.mubr.bf16.mxu1 %v2337_v31  ;;  %v2355_v3 = vld [vmem:[%s6285_s24 + $0x70] sm:$0xff]  ;;  %v4854_v31 = vcombine.high %v2464_v26, %v2468_v27  ;;  %v4805_v27 = vcombine.low %v2416_v13, %v2420_v14 }
 0x832   : > { %3235 = vmatprep.subr.bf16.mxu0 %v4780_v1  ;;  %3276 = vmatprep.subr.bf16.mxu1 %v4782_v33  ;;  %v4740_v11 = vcombine.high %v2351_v0, %v2355_v3  ;;  %v4739_v17 = vcombine.low %v2351_v0, %v2355_v3  ;;  %v2459_v1 = vld [vmem:[%s6285_s24 + $0x3b0] sm:$0xff]  ;;  %v2456_v33 = vld [vmem:[%s6285_s24 + $0x398] sm:$0xff] }
 0x833   : > { %v4843_v5 = vcombine.low %v2455_v2, %v2459_v1  ;;  %v4845_v6 = vcombine.low %v2456_v33, %v2460_v34  ;;  %v2424_v0 = vld [vmem:[%s6285_s24 + $0x298] sm:$0xff] }
 0x834   : > { %3236 = vmatpush1.bf16.msra.mxu0 %v4779_v38  ;;  %3277 = vmatpush1.bf16.msra.mxu1 %v4781_v36  ;;  %v4844_v38 = vcombine.high %v2455_v2, %v2459_v1  ;;  %v4846_v36 = vcombine.high %v2456_v33, %v2460_v34  ;;  %v2428_v3 = vld [vmem:[%s6285_s24 + $0x2b8] sm:$0xff] }
 0x835   : > { %3237 = vmatprep.subr.bf16.mxu0 %v4772_v39  ;;  %3278 = vmatprep.subr.bf16.mxu1 %v4774_v9  ;;  %v2447_v39 = vld [vmem:[%s6285_s24 + $0x350] sm:$0xff]  ;;  %v4813_v16 = vcombine.low %v2424_v0, %v2428_v3 }
 0x836   : > { %v2451_v9 = vld [vmem:[%s6285_s24 + $0x370] sm:$0xff] }
 0x837   : > { %v4835_v50 = vcombine.low %v2447_v39, %v2451_v9  ;;  %v5363_v2 = vld [vmem:[%s6367_s5 + $0x74] ss:$8 sps:$4 sm:$0xff]   ;;  %v5361_v33 = vld [vmem:[%s6367_s5 + $0x70] ss:$8 sps:$4 sm:$0xff]  }
 0x838   : > { %3238 = vmatpush1.bf16.msra.mxu0 %v4771_v44  ;;  %3279 = vmatpush1.bf16.msra.mxu1 %v4773_v45  ;;  %v4836_v44 = vcombine.high %v2447_v39, %v2451_v9  ;;  %v4838_v45 = vcombine.high %v2448_v42, %v2452_v43  ;;  %v5366_v1 = vld [vmem:[%s6367_s5 + $0x174] ss:$8 sps:$4 sm:$0xff]   ;;  %v5364_v34 = vld [vmem:[%s6367_s5 + $0x170] ss:$8 sps:$4 sm:$0xff]  }
 0x839   : > { %3239 = vmatprep.subr.bf16.mxu0 %v4764_v46  ;;  %3280 = vmatprep.subr.bf16.mxu1 %v4766_v47  ;;  %v2439_v46 = vld [vmem:[%s6285_s24 + $0x310] sm:$0xff] }
 0x83a   : > { %v2443_v47 = vld [vmem:[%s6285_s24 + $0x330] sm:$0xff] }
 0x83b   : > { %v4827_v58 = vcombine.low %v2439_v46, %v2443_v47  ;;  %v5375_v39 = vld [vmem:[%s6367_s5 + $0x54] ss:$8 sps:$4 sm:$0xff]   ;;  %v5373_v42 = vld [vmem:[%s6367_s5 + $0x50] ss:$8 sps:$4 sm:$0xff]  }
 0x83c   : > { %3240 = vmatpush1.bf16.msra.mxu0 %v4763_v52  ;;  %3281 = vmatpush1.bf16.msra.mxu1 %v4765_v53  ;;  %v4828_v52 = vcombine.high %v2439_v46, %v2443_v47  ;;  %v4830_v53 = vcombine.high %v2440_v48, %v2444_v49  ;;  %v5378_v9 = vld [vmem:[%s6367_s5 + $0x154] ss:$8 sps:$4 sm:$0xff]   ;;  %v5376_v43 = vld [vmem:[%s6367_s5 + $0x150] ss:$8 sps:$4 sm:$0xff]   ;;  %v5393_v49 = vld [vmem:[%s6367_s5 + $0x24] ss:$8 sps:$4 sm:$0xff]  }
 0x83d   : > { %3241 = vmatprep.subr.bf16.mxu0 %v4756_v54  ;;  %3282 = vmatprep.subr.bf16.mxu1 %v4758_v55  ;;  %v2431_v54 = vld [vmem:[%s6285_s24 + $0x2d0] sm:$0xff] }
 0x83e   : > { %v2435_v55 = vld [vmem:[%s6285_s24 + $0x2f0] sm:$0xff] }
 0x83f   : > { %v4819_v4 = vcombine.low %v2431_v54, %v2435_v55  ;;  %v5390_v46 = vld [vmem:[%s6367_s5 + $0x134] ss:$8 sps:$4 sm:$0xff]   ;;  %v5385_v47 = vld [vmem:[%s6367_s5 + $0x30] ss:$8 sps:$4 sm:$0xff]  }
 0x840   : > { %3242 = vmatpush1.bf16.msra.mxu0 %v4755_v60  ;;  %3283 = vmatpush1.bf16.msra.mxu1 %v4757_v61  ;;  %v4820_v60 = vcombine.high %v2431_v54, %v2435_v55  ;;  %v4822_v61 = vcombine.high %v2432_v56, %v2436_v57  ;;  %v5388_v48 = vld [vmem:[%s6367_s5 + $0x130] ss:$8 sps:$4 sm:$0xff]   ;;  %v5402_v54 = vld [vmem:[%s6367_s5 + $0x114] ss:$8 sps:$4 sm:$0xff]   ;;  %v5405_v57 = vld [vmem:[%s6367_s5 + $0x4] ss:$8 sps:$4 sm:$0xff]  }
 0x841   : > { %3243 = vmatprep.subr.bf16.mxu0 %v4748_v62  ;;  %3284 = vmatprep.subr.bf16.mxu1 %v4750_v63  ;;  %v2423_v62 = vld [vmem:[%s6285_s24 + $0x290] sm:$0xff] }
 0x842   : > { %v2427_v63 = vld [vmem:[%s6285_s24 + $0x2b0] sm:$0xff] }
 0x843   : > { %v4811_v15 = vcombine.low %v2423_v62, %v2427_v63  ;;  %v5397_v55 = vld [vmem:[%s6367_s5 + $0x10] ss:$8 sps:$4 sm:$0xff]  }
 0x844   : > { %3244 = vmatpush1.bf16.msra.mxu0 %v4747_v8  ;;  %3285 = vmatpush1.bf16.msra.mxu1 %v4749_v10  ;;  %v4812_v8 = vcombine.high %v2423_v62, %v2427_v63  ;;  %v4814_v10 = vcombine.high %v2424_v0, %v2428_v3  ;;  %v5400_v56 = vld [vmem:[%s6367_s5 + $0x110] ss:$8 sps:$4 sm:$0xff]   ;;  %v5414_v62 = vld [vmem:[%s6367_s5 + $0x1f4] ss:$8 sps:$4 sm:$0xff]   ;;  %v5417_v3 = vld [vmem:[%s6367_s5 + $0xe4] ss:$8 sps:$4 sm:$0xff]  }
 0x845   : > { %3245 = vmatprep.subr.bf16.mxu0 %v4740_v11  ;;  %3286 = vmatprep.subr.bf16.mxu1 %v4742_v12  ;;  %v2415_v11 = vld [vmem:[%s6285_s24 + $0x250] sm:$0xff] }
 0x846   : > { %v2419_v12 = vld [vmem:[%s6285_s24 + $0x270] sm:$0xff] }
 0x847   : > { %v4803_v26 = vcombine.low %v2415_v11, %v2419_v12  ;;  %v5409_v63 = vld [vmem:[%s6367_s5 + $0xf0] ss:$8 sps:$4 sm:$0xff]  }
 0x848   : > { %3246 = vmatpush1.bf16.msra.mxu0 %v4739_v17  ;;  %3287 = vmatpush1.bf16.msra.mxu1 %v4741_v18  ;;  %v4804_v17 = vcombine.high %v2415_v11, %v2419_v12  ;;  %v4806_v18 = vcombine.high %v2416_v13, %v2420_v14  ;;  %v5412_v0 = vld [vmem:[%s6367_s5 + $0x1f0] ss:$8 sps:$4 sm:$0xff]   ;;  %v5426_v11 = vld [vmem:[%s6367_s5 + $0x1d4] ss:$8 sps:$4 sm:$0xff]   ;;  %v5429_v14 = vld [vmem:[%s6367_s5 + $0xc4] ss:$8 sps:$4 sm:$0xff]  }
 0x849   : > { %3247 = vmatprep.subr.bf16.mxu0 %v4732_v19  ;;  %3288 = vmatprep.subr.bf16.mxu1 %v4734_v20  ;;  %v2407_v19 = vld [vmem:[%s6285_s24 + $0x210] sm:$0xff] }
 0x84a   : > { %v2411_v20 = vld [vmem:[%s6285_s24 + $0x230] sm:$0xff] }
 0x84b   : > { %v5421_v12 = vld [vmem:[%s6367_s5 + $0xd0] ss:$8 sps:$4 sm:$0xff]  }
 0x84c   : > { %3248 = vmatpush1.bf16.msra.mxu0 %v4731_v28  ;;  %3289 = vmatpush1.bf16.msra.mxu1 %v4733_v29  ;;  %v4796_v28 = vcombine.high %v2407_v19, %v2411_v20  ;;  %v4798_v29 = vcombine.high %v2408_v21, %v2412_v25  ;;  %v5424_v13 = vld [vmem:[%s6367_s5 + $0x1d0] ss:$8 sps:$4 sm:$0xff]  }
 0x84d   : > { %3249 = vmatprep.subr.bf16.mxu0 %v4852_v30  ;;  %3290 = vmatprep.subr.bf16.mxu1 %v4854_v31  ;;  %v4795_v30 = vcombine.low %v2407_v19, %v2411_v20  ;;  %v4797_v31 = vcombine.low %v2408_v21, %v2412_v25  ;;  %v5438_v19 = vld [vmem:[%s6367_s5 + $0x1b4] ss:$8 sps:$4 sm:$0xff]   ;;  %v5433_v20 = vld [vmem:[%s6367_s5 + $0xb0] ss:$8 sps:$4 sm:$0xff]   ;;  %v5441_v25 = vld [vmem:[%s6367_s5 + $0xa4] ss:$8 sps:$4 sm:$0xff]  }
 0x84e   : > { %v5436_v21 = vld [vmem:[%s6367_s5 + $0x1b0] ss:$8 sps:$4 sm:$0xff]  }
 0x850   : > { %3250 = vmatpush2.bf16.msra.mxu0 %v4851_v35  ;;  %3291 = vmatpush2.bf16.msra.mxu1 %v4853_v37  ;;  %v5369_v35 = vld [vmem:[%s6367_s5 + $0x64] ss:$8 sps:$4 sm:$0xff]  }
 0x851   : > { %3251 = vmatprep.subr.bf16.mxu0 %v4844_v38  ;;  %3292 = vmatprep.subr.bf16.mxu1 %v4846_v36  ;;  %v5372_v37 = vld [vmem:[%s6367_s5 + $0x164] ss:$8 sps:$4 sm:$0xff]   ;;  %v5367_v38 = vld [vmem:[%s6367_s5 + $0x60] ss:$8 sps:$4 sm:$0xff]  }
 0x852   : > { %v5370_v36 = vld [vmem:[%s6367_s5 + $0x160] ss:$8 sps:$4 sm:$0xff]  }
 0x854   : > { %3252 = vmatpush2.bf16.msra.mxu0 %v4843_v5  ;;  %3293 = vmatpush2.bf16.msra.mxu1 %v4845_v6  ;;  %v5384_v5 = vld [vmem:[%s6367_s5 + $0x144] ss:$8 sps:$4 sm:$0xff]   ;;  %v5379_v6 = vld [vmem:[%s6367_s5 + $0x40] ss:$8 sps:$4 sm:$0xff]  }
 0x855   : > { %3253 = vmatprep.subr.bf16.mxu0 %v4836_v44  ;;  %3294 = vmatprep.subr.bf16.mxu1 %v4838_v45  ;;  %v5382_v44 = vld [vmem:[%s6367_s5 + $0x140] ss:$8 sps:$4 sm:$0xff]   ;;  %v5387_v45 = vld [vmem:[%s6367_s5 + $0x34] ss:$8 sps:$4 sm:$0xff]  }
 0x858   : > { %3254 = vmatpush2.bf16.msra.mxu0 %v4835_v50  ;;  %3295 = vmatpush2.bf16.msra.mxu1 %v4837_v51  ;;  %v5396_v50 = vld [vmem:[%s6367_s5 + $0x124] ss:$8 sps:$4 sm:$0xff]   ;;  %v5391_v51 = vld [vmem:[%s6367_s5 + $0x20] ss:$8 sps:$4 sm:$0xff]  }
 0x859   : > { %3255 = vmatprep.subr.bf16.mxu0 %v4828_v52  ;;  %3296 = vmatprep.subr.bf16.mxu1 %v4830_v53  ;;  %v5394_v52 = vld [vmem:[%s6367_s5 + $0x120] ss:$8 sps:$4 sm:$0xff]   ;;  %v5399_v53 = vld [vmem:[%s6367_s5 + $0x14] ss:$8 sps:$4 sm:$0xff]  }
 0x85c   : > { %3256 = vmatpush2.bf16.msra.mxu0 %v4827_v58  ;;  %3297 = vmatpush2.bf16.msra.mxu1 %v4829_v59  ;;  %v5408_v58 = vld [vmem:[%s6367_s5 + $0x104] ss:$8 sps:$4 sm:$0xff]   ;;  %v5403_v59 = vld [vmem:[%s6367_s5] ss:$8 sps:$4 sm:$0xff]  }
 0x85d   : > { %3257 = vmatprep.subr.bf16.mxu0 %v4820_v60  ;;  %3298 = vmatprep.subr.bf16.mxu1 %v4822_v61  ;;  %v5406_v60 = vld [vmem:[%s6367_s5 + $0x100] ss:$8 sps:$4 sm:$0xff]   ;;  %v5411_v61 = vld [vmem:[%s6367_s5 + $0xf4] ss:$8 sps:$4 sm:$0xff]  }
 0x860   : > { %3258 = vmatpush2.bf16.msra.mxu0 %v4819_v4  ;;  %3299 = vmatpush2.bf16.msra.mxu1 %v4821_v7  ;;  %v5420_v4 = vld [vmem:[%s6367_s5 + $0x1e4] ss:$8 sps:$4 sm:$0xff]   ;;  %v5415_v7 = vld [vmem:[%s6367_s5 + $0xe0] ss:$8 sps:$4 sm:$0xff]  }
 0x861   : > { %3259 = vmatprep.subr.bf16.mxu0 %v4812_v8  ;;  %3300 = vmatprep.subr.bf16.mxu1 %v4814_v10  ;;  %v5418_v8 = vld [vmem:[%s6367_s5 + $0x1e0] ss:$8 sps:$4 sm:$0xff]   ;;  %v5423_v10 = vld [vmem:[%s6367_s5 + $0xd4] ss:$8 sps:$4 sm:$0xff]  }
 0x864   : > { %3260 = vmatpush2.bf16.msra.mxu0 %v4811_v15  ;;  %3301 = vmatpush2.bf16.msra.mxu1 %v4813_v16  ;;  %v5432_v15 = vld [vmem:[%s6367_s5 + $0x1c4] ss:$8 sps:$4 sm:$0xff]   ;;  %v5427_v16 = vld [vmem:[%s6367_s5 + $0xc0] ss:$8 sps:$4 sm:$0xff]  }
 0x865   : > { %3261 = vmatprep.subr.bf16.mxu0 %v4804_v17  ;;  %3302 = vmatprep.subr.bf16.mxu1 %v4806_v18  ;;  %v5430_v17 = vld [vmem:[%s6367_s5 + $0x1c0] ss:$8 sps:$4 sm:$0xff]   ;;  %v5435_v18 = vld [vmem:[%s6367_s5 + $0xb4] ss:$8 sps:$4 sm:$0xff]  }
 0x868   : > { %3262 = vmatpush2.bf16.msra.mxu0 %v4803_v26  ;;  %3303 = vmatpush2.bf16.msra.mxu1 %v4805_v27  ;;  %v5444_v26 = vld [vmem:[%s6367_s5 + $0x1a4] ss:$8 sps:$4 sm:$0xff]   ;;  %v5439_v27 = vld [vmem:[%s6367_s5 + $0xa0] ss:$8 sps:$4 sm:$0xff]  }
 0x869   : > { %3263 = vmatprep.subr.bf16.mxu0 %v4796_v28  ;;  %3304 = vmatprep.subr.bf16.mxu1 %v4798_v29  ;;  %v5442_v28 = vld [vmem:[%s6367_s5 + $0x1a0] ss:$8 sps:$4 sm:$0xff]   ;;  %v5447_v29 = vld [vmem:[%s6367_s5 + $0x94] ss:$8 sps:$4 sm:$0xff]  }
 0x86c   : > { %3264 = vmatpush2.bf16.msra.mxu0 %v4795_v30  ;;  %3305 = vmatpush2.bf16.msra.mxu1 %v4797_v31  ;;  %v5450_v30 = vld [vmem:[%s6367_s5 + $0x194] ss:$8 sps:$4 sm:$0xff]   ;;  %v5445_v31 = vld [vmem:[%s6367_s5 + $0x90] ss:$8 sps:$4 sm:$0xff]  }
 0x86d   : > { %4113 = vmatprep.subr.bf16.mxu0 %v5363_v2  ;;  %4154 = vmatprep.subr.bf16.mxu1 %v5366_v1  ;;  %v5448_v2 = vld [vmem:[%s6367_s5 + $0x190] ss:$8 sps:$4 sm:$0xff]   ;;  %v5453_v1 = vld [vmem:[%s6367_s5 + $0x84] ss:$8 sps:$4 sm:$0xff]  }
 0x86f   : > { %3266 = vmatmul.mubr.bf16.vlgmr.msra.gmra.mxu0 %v6387_v32  ;;  %3307 = vmatmul.mubr.bf16.vlgmr.msra.gmra.mxu1 %v6387_v32  ;;  %v5381_v32 = vld [vmem:[%s6367_s5 + $0x44] ss:$8 sps:$4 sm:$0xff]  }
 0x870   : > { %4114 = vmatpush1.bf16.msra.mxu0 %v5361_v33  ;;  %4155 = vmatpush1.bf16.msra.mxu1 %v5364_v34  ;;  %v5456_v33 = vld [vmem:[%s6367_s5 + $0x184] ss:$8 sps:$4 sm:$0xff]   ;;  %v5451_v34 = vld [vmem:[%s6367_s5 + $0x80] ss:$8 sps:$4 sm:$0xff]  }
 0x871   : > { %4115 = vmatprep.subr.bf16.mxu0 %v5369_v35  ;;  %4156 = vmatprep.subr.bf16.mxu1 %v5372_v37  ;;  %v5454_v35 = vld [vmem:[%s6367_s5 + $0x180] ss:$8 sps:$4 sm:$0xff]   ;;  %v5459_v37 = vld [vmem:[%s6367_s5 + $0x274] ss:$8 sps:$4 sm:$0xff]  }
 0x874   : > { %4116 = vmatpush1.bf16.msra.mxu0 %v5367_v38  ;;  %4157 = vmatpush1.bf16.msra.mxu1 %v5370_v36  ;;  %v5462_v38 = vld [vmem:[%s6367_s5 + $0x374] ss:$8 sps:$4 sm:$0xff]   ;;  %v2481_v36 = vsub.s32 2, %v6104_v22 }
 0x875   : > { %4117 = vmatprep.subr.bf16.mxu0 %v5375_v39  ;;  %4158 = vmatprep.subr.bf16.mxu1 %v5378_v9  ;;  %v6520_v39 = vld [vmem:[%s700_s12] sm:$0xff]  ;;  %v2485_v9 = vsub.s32 3, %v6104_v22 }
 0x878   : > { %4118 = vmatpush1.bf16.msra.mxu0 %v5373_v42  ;;  %4159 = vmatpush1.bf16.msra.mxu1 %v5376_v43  ;;  %v2474_v42 = vrot.slane %v6520_v39, %v6118_v24  ;;  %v2482_v43 = vrot.slane %v6520_v39, %v2481_v36  ;;  %v5505_v36 = vld [vmem:[%s6367_s5 + $0x2f0] ss:$8 sps:$4 sm:$0xff]  }
 0x879   : > { %4119 = vmatprep.subr.bf16.mxu0 %v5381_v32  ;;  %4160 = vmatprep.subr.bf16.mxu1 %v5384_v5  ;;  %v2478_v32 = vrot.slane %v6520_v39, %v6115_v23  ;;  %v2486_v5 = vrot.slane %v6520_v39, %v2485_v9  ;;  %v5508_v9 = vld [vmem:[%s6367_s5 + $0x3f0] ss:$8 sps:$4 sm:$0xff]  }
 0x87c   : > { %4120 = vmatpush1.bf16.msra.mxu0 %v5379_v6  ;;  %4161 = vmatpush1.bf16.msra.mxu1 %v5382_v44 }
 0x87d   : > { %4121 = vmatprep.subr.bf16.mxu0 %v5387_v45  ;;  %4162 = vmatprep.subr.bf16.mxu1 %v5390_v46 }
 0x880   : > { %4122 = vmatpush1.bf16.msra.mxu0 %v5385_v47  ;;  %4163 = vmatpush1.bf16.msra.mxu1 %v5388_v48 }
 0x881   : > { %4123 = vmatprep.subr.bf16.mxu0 %v5393_v49  ;;  %4164 = vmatprep.subr.bf16.mxu1 %v5396_v50 }
 0x884   : > { %4124 = vmatpush1.bf16.msra.mxu0 %v5391_v51  ;;  %4165 = vmatpush1.bf16.msra.mxu1 %v5394_v52 }
 0x885   : > { %4125 = vmatprep.subr.bf16.mxu0 %v5399_v53  ;;  %4166 = vmatprep.subr.bf16.mxu1 %v5402_v54 }
 0x888   : > { %4126 = vmatpush1.bf16.msra.mxu0 %v5397_v55  ;;  %4167 = vmatpush1.bf16.msra.mxu1 %v5400_v56 }
 0x889   : > { %4127 = vmatprep.subr.bf16.mxu0 %v5405_v57  ;;  %4168 = vmatprep.subr.bf16.mxu1 %v5408_v58 }
 0x88c   : > { %4128 = vmatpush1.bf16.msra.mxu0 %v5403_v59  ;;  %4169 = vmatpush1.bf16.msra.mxu1 %v5406_v60 }
 0x88d   : > { %4129 = vmatprep.subr.bf16.mxu0 %v5411_v61  ;;  %4170 = vmatprep.subr.bf16.mxu1 %v5414_v62  ;;  %v5457_v61 = vld [vmem:[%s6367_s5 + $0x270] ss:$8 sps:$4 sm:$0xff]  }
 0x88e   : > { %v5460_v62 = vld [vmem:[%s6367_s5 + $0x370] ss:$8 sps:$4 sm:$0xff]  }
 0x890   : > { %4130 = vmatpush2.bf16.msra.mxu0 %v5409_v63  ;;  %4171 = vmatpush2.bf16.msra.mxu1 %v5412_v0 }
 0x891   : > { %4131 = vmatprep.subr.bf16.mxu0 %v5417_v3  ;;  %4172 = vmatprep.subr.bf16.mxu1 %v5420_v4  ;;  %v5465_v3 = vld [vmem:[%s6367_s5 + $0x264] ss:$8 sps:$4 sm:$0xff]  }
 0x892   : > { %v5468_v4 = vld [vmem:[%s6367_s5 + $0x364] ss:$8 sps:$4 sm:$0xff]  }
 0x894   : > { %4132 = vmatpush2.bf16.msra.mxu0 %v5415_v7  ;;  %4173 = vmatpush2.bf16.msra.mxu1 %v5418_v8  ;;  %v5463_v7 = vld [vmem:[%s6367_s5 + $0x260] ss:$8 sps:$4 sm:$0xff]  }
 0x895   : > { %4133 = vmatprep.subr.bf16.mxu0 %v5423_v10  ;;  %4174 = vmatprep.subr.bf16.mxu1 %v5426_v11  ;;  %v5466_v8 = vld [vmem:[%s6367_s5 + $0x360] ss:$8 sps:$4 sm:$0xff]   ;;  %v5471_v10 = vld [vmem:[%s6367_s5 + $0x254] ss:$8 sps:$4 sm:$0xff]  }
 0x896   : > { %v5474_v11 = vld [vmem:[%s6367_s5 + $0x354] ss:$8 sps:$4 sm:$0xff]  }
 0x898   : > { %4134 = vmatpush2.bf16.msra.mxu0 %v5421_v12  ;;  %4175 = vmatpush2.bf16.msra.mxu1 %v5424_v13  ;;  %v5469_v12 = vld [vmem:[%s6367_s5 + $0x250] ss:$8 sps:$4 sm:$0xff]  }
 0x899   : > { %4135 = vmatprep.subr.bf16.mxu0 %v5429_v14  ;;  %4176 = vmatprep.subr.bf16.mxu1 %v5432_v15  ;;  %v5472_v13 = vld [vmem:[%s6367_s5 + $0x350] ss:$8 sps:$4 sm:$0xff]   ;;  %v5477_v14 = vld [vmem:[%s6367_s5 + $0x244] ss:$8 sps:$4 sm:$0xff]  }
 0x89a   : > { %v5480_v15 = vld [vmem:[%s6367_s5 + $0x344] ss:$8 sps:$4 sm:$0xff]  }
 0x89c   : > { %4136 = vmatpush2.bf16.msra.mxu0 %v5427_v16  ;;  %4177 = vmatpush2.bf16.msra.mxu1 %v5430_v17  ;;  %v5475_v16 = vld [vmem:[%s6367_s5 + $0x240] ss:$8 sps:$4 sm:$0xff]  }
 0x89d   : > { %4137 = vmatprep.subr.bf16.mxu0 %v5435_v18  ;;  %4178 = vmatprep.subr.bf16.mxu1 %v5438_v19  ;;  %v5478_v17 = vld [vmem:[%s6367_s5 + $0x340] ss:$8 sps:$4 sm:$0xff]   ;;  %v5483_v18 = vld [vmem:[%s6367_s5 + $0x234] ss:$8 sps:$4 sm:$0xff]  }
 0x89e   : > { %v5486_v19 = vld [vmem:[%s6367_s5 + $0x334] ss:$8 sps:$4 sm:$0xff]  }
 0x8a0   : > { %4138 = vmatpush2.bf16.msra.mxu0 %v5433_v20  ;;  %4179 = vmatpush2.bf16.msra.mxu1 %v5436_v21  ;;  %v5481_v20 = vld [vmem:[%s6367_s5 + $0x230] ss:$8 sps:$4 sm:$0xff]  }
 0x8a1   : > { %4139 = vmatprep.subr.bf16.mxu0 %v5441_v25  ;;  %4180 = vmatprep.subr.bf16.mxu1 %v5444_v26  ;;  %v5484_v21 = vld [vmem:[%s6367_s5 + $0x330] ss:$8 sps:$4 sm:$0xff]   ;;  %v5489_v25 = vld [vmem:[%s6367_s5 + $0x224] ss:$8 sps:$4 sm:$0xff]  }
 0x8a2   : > { %v5492_v26 = vld [vmem:[%s6367_s5 + $0x324] ss:$8 sps:$4 sm:$0xff]  }
 0x8a4   : > { %4140 = vmatpush2.bf16.msra.mxu0 %v5439_v27  ;;  %4181 = vmatpush2.bf16.msra.mxu1 %v5442_v28  ;;  %v5487_v27 = vld [vmem:[%s6367_s5 + $0x220] ss:$8 sps:$4 sm:$0xff]  }
 0x8a5   : > { %4141 = vmatprep.subr.bf16.mxu0 %v5447_v29  ;;  %4182 = vmatprep.subr.bf16.mxu1 %v5450_v30  ;;  %v5490_v28 = vld [vmem:[%s6367_s5 + $0x320] ss:$8 sps:$4 sm:$0xff]   ;;  %v5495_v29 = vld [vmem:[%s6367_s5 + $0x214] ss:$8 sps:$4 sm:$0xff]  }
 0x8a6   : > { %v5498_v30 = vld [vmem:[%s6367_s5 + $0x314] ss:$8 sps:$4 sm:$0xff]  }
 0x8a8   : > { %4142 = vmatpush2.bf16.msra.mxu0 %v5445_v31  ;;  %4183 = vmatpush2.bf16.msra.mxu1 %v5448_v2  ;;  %v5493_v31 = vld [vmem:[%s6367_s5 + $0x210] ss:$8 sps:$4 sm:$0xff]  }
 0x8a9   : > { %4143 = vmatprep.subr.bf16.mxu0 %v5453_v1  ;;  %4184 = vmatprep.subr.bf16.mxu1 %v5456_v33  ;;  %v5496_v2 = vld [vmem:[%s6367_s5 + $0x310] ss:$8 sps:$4 sm:$0xff]   ;;  %v5501_v1 = vld [vmem:[%s6367_s5 + $0x204] ss:$8 sps:$4 sm:$0xff]  }
 0x8aa   : > { %v5504_v33 = vld [vmem:[%s6367_s5 + $0x304] ss:$8 sps:$4 sm:$0xff]  }
 0x8ac   : > { %4144 = vmatpush2.bf16.msra.mxu0 %v5451_v34  ;;  %4185 = vmatpush2.bf16.msra.mxu1 %v5454_v35  ;;  %v5499_v34 = vld [vmem:[%s6367_s5 + $0x200] ss:$8 sps:$4 sm:$0xff]  }
 0x8ad   : > { %4195 = vmatprep.subr.bf16.mxu0 %v5459_v37  ;;  %4236 = vmatprep.subr.bf16.mxu1 %v5462_v38  ;;  %v5502_v35 = vld [vmem:[%s6367_s5 + $0x300] ss:$8 sps:$4 sm:$0xff]   ;;  %v5507_v37 = vld [vmem:[%s6367_s5 + $0x2f4] ss:$8 sps:$4 sm:$0xff]  }
 0x8ae   : > { %v5510_v38 = vld [vmem:[%s6367_s5 + $0x3f4] ss:$8 sps:$4 sm:$0xff]  }
 0x8ef   : > { %v3185_v6 = vpop.f32.mrf.mxu0  ;;  %v3226_v44 = vpop.f32.mrf.mxu1 }
 0x8f0   : > { %v3186_v45 = vadd.f32 %v3185_v6, %v2474_v42  ;;  %v3227_v46 = vadd.f32 %v3226_v44, %v2482_v43  ;;  %v5513_v42 = vld [vmem:[%s6367_s5 + $0x2e4] ss:$8 sps:$4 sm:$0xff]   ;;  %v5519_v6 = vld [vmem:[%s6367_s5 + $0x2d4] ss:$8 sps:$4 sm:$0xff]  }
 0x8f1   : > { %v3187_v47 = vpop.f32.mrf.mxu0  ;;  %v3228_v48 = vpop.f32.mrf.mxu1  ;;  %v5516_v43 = vld [vmem:[%s6367_s5 + $0x3e4] ss:$8 sps:$4 sm:$0xff]   ;;  %v5522_v44 = vld [vmem:[%s6367_s5 + $0x3d4] ss:$8 sps:$4 sm:$0xff]  }
 0x8f2   : > { %v3188_v49 = vadd.f32 %v3187_v47, %v2478_v32  ;;  %v3229_v50 = vadd.f32 %v3228_v48, %v2486_v5  ;;  %v3315_v51 = vmax.f32 %v3186_v45, 0.0  ;;  %v3317_v52 = vmax.f32 %v3227_v46, 0.0  ;;  %v5511_v32 = vld [vmem:[%s6367_s5 + $0x2e0] ss:$8 sps:$4 sm:$0xff]   ;;  %v5517_v45 = vld [vmem:[%s6367_s5 + $0x2d0] ss:$8 sps:$4 sm:$0xff]  }
 0x8f3   : > { %v3189_v53 = vpop.f32.mrf.mxu0  ;;  %v3230_v54 = vpop.f32.mrf.mxu1  ;;  %v5514_v5 = vld [vmem:[%s6367_s5 + $0x3e0] ss:$8 sps:$4 sm:$0xff]   ;;  %v5520_v46 = vld [vmem:[%s6367_s5 + $0x3d0] ss:$8 sps:$4 sm:$0xff]   ;;  %v5525_v47 = vld [vmem:[%s6367_s5 + $0x2c4] ss:$8 sps:$4 sm:$0xff]  }
 0x8f4   : > { %v3316_v55 = vmax.f32 %v3188_v49, 0.0  ;;  %v3318_v56 = vmax.f32 %v3229_v50, 0.0  ;;  %v3323_v63 = vpack.c.bf16 %v3315_v51, %v3315_v51  ;;  %v3325_v0 = vpack.c.bf16 %v3317_v52, %v3317_v52  ;;  %v5528_v48 = vld [vmem:[%s6367_s5 + $0x3c4] ss:$8 sps:$4 sm:$0xff]   ;;  %v5523_v49 = vld [vmem:[%s6367_s5 + $0x2c0] ss:$8 sps:$4 sm:$0xff]  }
 0x8f5   : > { %v3190_v57 = vpop.f32.mrf.mxu0  ;;  %v3231_v58 = vpop.f32.mrf.mxu1  ;;  %v5526_v50 = vld [vmem:[%s6367_s5 + $0x3c0] ss:$8 sps:$4 sm:$0xff]   ;;  %v5531_v51 = vld [vmem:[%s6367_s5 + $0x2b4] ss:$8 sps:$4 sm:$0xff]   ;;  %v5529_v53 = vld [vmem:[%s6367_s5 + $0x2b0] ss:$8 sps:$4 sm:$0xff]  }
 0x8f6   : > { %v3324_v59 = vpack.c.bf16 %v3316_v55, %v3316_v55  ;;  %v3326_v60 = vpack.c.bf16 %v3318_v56, %v3318_v56  ;;  %v5534_v52 = vld [vmem:[%s6367_s5 + $0x3b4] ss:$8 sps:$4 sm:$0xff]   ;;  %v5532_v54 = vld [vmem:[%s6367_s5 + $0x3b0] ss:$8 sps:$4 sm:$0xff]   ;;  %v5537_v55 = vld [vmem:[%s6367_s5 + $0x2a4] ss:$8 sps:$4 sm:$0xff]  }
 0x8f7   : > { %v5540_v56 = vld [vmem:[%s6367_s5 + $0x3a4] ss:$8 sps:$4 sm:$0xff]   ;;  %v2489_v57 = vsub.s32 4, %v6104_v22  ;;  %v2497_v58 = vsub.s32 6, %v6104_v22 }
 0x8f8   : > { %4145 = vmatprep.mubr.bf16.mxu0 %v3324_v59  ;;  %4186 = vmatprep.mubr.bf16.mxu1 %v3326_v60  ;;  %v5535_v59 = vld [vmem:[%s6367_s5 + $0x2a0] ss:$8 sps:$4 sm:$0xff]  }
 0x8f9   : > { %4146 = vmatmul.mubr.bf16.vlgmr.msra.gmra.mxu0 %v3323_v63  ;;  %4187 = vmatmul.mubr.bf16.vlgmr.msra.gmra.mxu1 %v3325_v0  ;;  %v5538_v60 = vld [vmem:[%s6367_s5 + $0x3a0] ss:$8 sps:$4 sm:$0xff]   ;;  %v5543_v63 = vld [vmem:[%s6367_s5 + $0x294] ss:$8 sps:$4 sm:$0xff]  }
 0x8fa   : > { %4196 = vmatpush1.bf16.msra.mxu0 %v5457_v61  ;;  %4237 = vmatpush1.bf16.msra.mxu1 %v5460_v62  ;;  %v2493_v61 = vsub.s32 5, %v6104_v22  ;;  %v2501_v62 = vsub.s32 7, %v6104_v22  ;;  %v5546_v0 = vld [vmem:[%s6367_s5 + $0x394] ss:$8 sps:$4 sm:$0xff]  }
 0x8fb   : > { %4197 = vmatprep.subr.bf16.mxu0 %v5465_v3  ;;  %4238 = vmatprep.subr.bf16.mxu1 %v5468_v4  ;;  %v2490_v3 = vrot.slane %v6520_v39, %v2489_v57  ;;  %v2498_v4 = vrot.slane %v6520_v39, %v2497_v58 }
 0x8fe   : > { %4198 = vmatpush1.bf16.msra.mxu0 %v5463_v7  ;;  %4239 = vmatpush1.bf16.msra.mxu1 %v5466_v8  ;;  %v2494_v7 = vrot.slane %v6520_v39, %v2493_v61  ;;  %v2502_v8 = vrot.slane %v6520_v39, %v2501_v62  ;;  %v5550_v39 = vld [vmem:[%s6367_s5 + $0x380] ss:$8 sps:$4 sm:$0xff]  }
 0x8ff   : > { %4199 = vmatprep.subr.bf16.mxu0 %v5471_v10  ;;  %4240 = vmatprep.subr.bf16.mxu1 %v5474_v11  ;;  %v5541_v10 = vld [vmem:[%s6367_s5 + $0x290] ss:$8 sps:$4 sm:$0xff]  }
 0x900   : > { %v5544_v11 = vld [vmem:[%s6367_s5 + $0x390] ss:$8 sps:$4 sm:$0xff]  }
 0x902   : > { %4200 = vmatpush1.bf16.msra.mxu0 %v5469_v12  ;;  %4241 = vmatpush1.bf16.msra.mxu1 %v5472_v13  ;;  %v5549_v13 = vld [vmem:[%s6367_s5 + $0x284] ss:$8 sps:$4 sm:$0xff]  }
 0x903   : > { %4201 = vmatprep.subr.bf16.mxu0 %v5477_v14  ;;  %4242 = vmatprep.subr.bf16.mxu1 %v5480_v15  ;;  %v5552_v14 = vld [vmem:[%s6367_s5 + $0x384] ss:$8 sps:$4 sm:$0xff]  }
 0x906   : > { %4202 = vmatpush1.bf16.msra.mxu0 %v5475_v16  ;;  %4243 = vmatpush1.bf16.msra.mxu1 %v5478_v17 }
 0x907   : > { %4203 = vmatprep.subr.bf16.mxu0 %v5483_v18  ;;  %4244 = vmatprep.subr.bf16.mxu1 %v5486_v19 }
 0x90a   : > { %4204 = vmatpush1.bf16.msra.mxu0 %v5481_v20  ;;  %4245 = vmatpush1.bf16.msra.mxu1 %v5484_v21  ;;  %v5547_v21 = vld [vmem:[%s6367_s5 + $0x280] ss:$8 sps:$4 sm:$0xff]   ;;  %s6669_s5 = sld [smem:[#allocation22_spill]] }
 0x90b   : > { %4205 = vmatprep.subr.bf16.mxu0 %v5489_v25  ;;  %4246 = vmatprep.subr.bf16.mxu1 %v5492_v26 }
 0x90e   : > { %4206 = vmatpush1.bf16.msra.mxu0 %v5487_v27  ;;  %4247 = vmatpush1.bf16.msra.mxu1 %v5490_v28 }
 0x90f   : > { %4207 = vmatprep.subr.bf16.mxu0 %v5495_v29  ;;  %4248 = vmatprep.subr.bf16.mxu1 %v5498_v30 }
 0x910   : > { %s704_s4 = scalar_lea.vmem %s6669_s5, %s6102_s11 }
 0x912   : > { %4208 = vmatpush1.bf16.msra.mxu0 %v5493_v31  ;;  %4249 = vmatpush1.bf16.msra.mxu1 %v5496_v2 }
 0x913   : > { %4209 = vmatprep.subr.bf16.mxu0 %v5501_v1  ;;  %4250 = vmatprep.subr.bf16.mxu1 %v5504_v33 }
 0x916   : > { %4210 = vmatpush1.bf16.msra.mxu0 %v5499_v34  ;;  %4251 = vmatpush1.bf16.msra.mxu1 %v5502_v35 }
 0x917   : > { %4211 = vmatprep.subr.bf16.mxu0 %v5507_v37  ;;  %4252 = vmatprep.subr.bf16.mxu1 %v5510_v38 }
 0x91a   : > { %4212 = vmatpush2.bf16.msra.mxu0 %v5505_v36  ;;  %4253 = vmatpush2.bf16.msra.mxu1 %v5508_v9 }
 0x91b   : > { %4213 = vmatprep.subr.bf16.mxu0 %v5513_v42  ;;  %4254 = vmatprep.subr.bf16.mxu1 %v5516_v43 }
 0x91e   : > { %4214 = vmatpush2.bf16.msra.mxu0 %v5511_v32  ;;  %4255 = vmatpush2.bf16.msra.mxu1 %v5514_v5 }
 0x91f   : > { %4215 = vmatprep.subr.bf16.mxu0 %v5519_v6  ;;  %4256 = vmatprep.subr.bf16.mxu1 %v5522_v44  ;;  %v3461_v6 = vld [vmem:[%s704_s4] sm:$0x3] }
 0x920   : > { %v3466_v44 = vrot.slane %v3461_v6, %v6118_v24 }
 0x922   : > { %4216 = vmatpush2.bf16.msra.mxu0 %v5517_v45  ;;  %4257 = vmatpush2.bf16.msra.mxu1 %v5520_v46  ;;  %v3470_v45 = vrot.slane %v3461_v6, %v6115_v23 }
 0x923   : > { %4217 = vmatprep.subr.bf16.mxu0 %v5525_v47  ;;  %4258 = vmatprep.subr.bf16.mxu1 %v5528_v48 }
 0x926   : > { %4218 = vmatpush2.bf16.msra.mxu0 %v5523_v49  ;;  %4259 = vmatpush2.bf16.msra.mxu1 %v5526_v50 }
 0x927   : > { %4219 = vmatprep.subr.bf16.mxu0 %v5531_v51  ;;  %4260 = vmatprep.subr.bf16.mxu1 %v5534_v52 }
 0x92a   : > { %4220 = vmatpush2.bf16.msra.mxu0 %v5529_v53  ;;  %4261 = vmatpush2.bf16.msra.mxu1 %v5532_v54 }
 0x92b   : > { %4221 = vmatprep.subr.bf16.mxu0 %v5537_v55  ;;  %4262 = vmatprep.subr.bf16.mxu1 %v5540_v56 }
 0x92e   : > { %4222 = vmatpush2.bf16.msra.mxu0 %v5535_v59  ;;  %4263 = vmatpush2.bf16.msra.mxu1 %v5538_v60 }
 0x92f   : > { %v3267_v22 = vpop.f32.mrf.mxu0  ;;  %v3308_v12 = vpop.f32.mrf.mxu1  ;;  %4223 = vmatprep.subr.bf16.mxu0 %v5543_v63  ;;  %4264 = vmatprep.subr.bf16.mxu1 %v5546_v0 }
 0x930   : > { %v3268_v15 = vadd.f32 %v3267_v22, %v2490_v3  ;;  %v3309_v16 = vadd.f32 %v3308_v12, %v2498_v4 }
 0x931   : > { %v3269_v17 = vpop.f32.mrf.mxu0  ;;  %v3310_v18 = vpop.f32.mrf.mxu1 }
 0x932   : > { %v3270_v19 = vadd.f32 %v3269_v17, %v2494_v7  ;;  %v3311_v20 = vadd.f32 %v3310_v18, %v2502_v8  ;;  %4224 = vmatpush2.bf16.msra.mxu0 %v5541_v10  ;;  %4265 = vmatpush2.bf16.msra.mxu1 %v5544_v11  ;;  %v3319_v25 = vmax.f32 %v3268_v15, 0.0  ;;  %v3321_v26 = vmax.f32 %v3309_v16, 0.0 }
 0x933   : > { %v3271_v27 = vpop.f32.mrf.mxu0  ;;  %v3312_v28 = vpop.f32.mrf.mxu1  ;;  %4225 = vmatprep.subr.bf16.mxu0 %v5549_v13  ;;  %4266 = vmatprep.subr.bf16.mxu1 %v5552_v14 }
 0x934   : > { %v3320_v29 = vmax.f32 %v3270_v19, 0.0  ;;  %v3322_v30 = vmax.f32 %v3311_v20, 0.0  ;;  %v3327_v34 = vpack.c.bf16 %v3319_v25, %v3319_v25  ;;  %v3329_v35 = vpack.c.bf16 %v3321_v26, %v3321_v26 }
 0x935   : > { %v3272_v31 = vpop.f32.mrf.mxu0  ;;  %v3313_v2 = vpop.f32.mrf.mxu1 }
 0x936   : > { %v3328_v1 = vpack.c.bf16 %v3320_v29, %v3320_v29  ;;  %v3330_v33 = vpack.c.bf16 %v3322_v30, %v3322_v30  ;;  %4226 = vmatpush2.bf16.msra.mxu0 %v5547_v21  ;;  %4267 = vmatpush2.bf16.msra.mxu1 %v5550_v39 }
 0x938   : > { %4227 = vmatprep.mubr.bf16.mxu0 %v3328_v1  ;;  %4268 = vmatprep.mubr.bf16.mxu1 %v3330_v33 }
 0x939   : > { %4228 = vmatmul.mubr.bf16.vlgmr.msra.gmra.mxu0 %v3327_v34  ;;  %4269 = vmatmul.mubr.bf16.vlgmr.msra.gmra.mxu1 %v3329_v35 }
 0x9b9   : > { %v4147_v37 = vpop.f32.mrf.mxu0  ;;  %v4188_v38 = vpop.f32.mrf.mxu1 }
 0x9ba   : > { %v4148_v46 = vadd.f32 %v4147_v37, %v3466_v44 }
 0x9bb   : > { %v4149_v36 = vpop.f32.mrf.mxu0  ;;  %v4190_v9 = vpop.f32.mrf.mxu1 }
 0x9bc   : > { %v4150_v47 = vadd.f32 %v4149_v36, %v3470_v45  ;;  %v4189_v48 = vadd.f32 %v4188_v38, %v4148_v46 }
 0x9bd   : > { %v4151_v42 = vpop.f32.mrf.mxu0  ;;  %v4192_v43 = vpop.f32.mrf.mxu1 }
 0x9be   : > { %v4191_v51 = vadd.f32 %v4190_v9, %v4150_v47 }
 0x9bf   : > { %v4152_v32 = vpop.f32.mrf.mxu0  ;;  %v4193_v5 = vpop.f32.mrf.mxu1 }
 0x9f9   : > { %v4229_v49 = vpop.f32.mrf.mxu0  ;;  %v4270_v50 = vpop.f32.mrf.mxu1 }
 0x9fa   : > { %v4230_v52 = vadd.f32 %v4229_v49, %v4189_v48 }
 0x9fb   : > { %v4231_v53 = vpop.f32.mrf.mxu0  ;;  %v4272_v54 = vpop.f32.mrf.mxu1 }
 0x9fc   : > { %v4271_v55 = vadd.f32 %v4270_v50, %v4230_v52  ;;  %v4232_v56 = vadd.f32 %v4231_v53, %v4191_v51  ;;  %4282 = sbr.rel (%p4984_p8) target bundleno = 2873 (0xb39), region = 108 }
 0x9fd   : > { %v4233_v57 = vpop.f32.mrf.mxu0  ;;  %v4274_v58 = vpop.f32.mrf.mxu1 }
 0x9fe   : > { %v4277_v59 = vadd.f32 %v4271_v55, %v6275_v40  ;;  %v4273_v60 = vadd.f32 %v4272_v54, %v4232_v56 }
 0x9ff   : > { %v4234_v61 = vpop.f32.mrf.mxu0  ;;  %v4275_v62 = vpop.f32.mrf.mxu1 }
 0xa00   : > { %v4278_v63 = vadd.f32 %v4273_v60, %v6278_v41 }
 0xa01   : > { %v4283_v41 = vld [vmem:[#allocation9] sm:$0x3]  ;;  %v4284_v14 = vld [vmem:[#allocation10] sm:$0x3] }
 0xa02   : > { %v4285_v0 = vadd.f32 %v4278_v63, %v4277_v59  ;;  %v4305_v15 = vrot.slane %v4283_v41, %v6118_v24  ;;  %v4309_v16 = vrot.slane %v4283_v41, %v6115_v23  ;;  %v4318_v20 = vrot.slane %v4284_v14, %v6118_v24 }
 0xa03   : > { %v4322_v21 = vrot.slane %v4284_v14, %v6115_v23 }
 0xa04   : > { %4286 = vadd.xlane.f32.xlu0 %v4285_v0 }
 0xa8d   : > { %v4287_v3 = vpop.xlane.xlu0 %4286 }
 0xa8e   : > { %v4288_v4 = vmul.f32 0.00390625, %v4287_v3 }
 0xa90   : > { %v4289_v7 = vsub.f32 %v4277_v59, %v4288_v4  ;;  %v4290_v8 = vsub.f32 %v4278_v63, %v4288_v4 }
 0xa92   : > { %v4291_v10 = vmul.f32 %v4289_v7, %v4289_v7  ;;  %v4292_v11 = vmul.f32 %v4290_v8, %v4290_v8 }
 0xa94   : > { %v4293_v22 = vadd.f32 %v4292_v11, %v4291_v10 }
 0xa96   : > { %4294 = vadd.xlane.f32.xlu0 %v4293_v22 }
 0xb1f   : > { %v4295_v12 = vpop.xlane.xlu0 %4294 }
 0xb20   : > { %v4296_v40 = vmul.f32 0.00390625, %v4295_v12 }
 0xb22   : > { %v4297_v13 = vadd.f32 1e-05, %v4296_v40 }
 0xb24   : > { %5573 = vrsqrt.f32 %v4297_v13 }
 0xb31   : > { %v5574_v17 = vpop.eup %5573 }
 0xb32   : > { %v4299_v18 = vmul.f32 %v5574_v17, %v4289_v7  ;;  %v4300_v19 = vmul.f32 %v5574_v17, %v4290_v8 }
 0xb34   : > { %v4312_v39 = vmul.f32 %v4305_v15, %v4299_v18  ;;  %v4313_v25 = vmul.f32 %v4309_v16, %v4300_v19 }
 0xb36   : > { %v4325_v26 = vadd.f32 %v4318_v20, %v4312_v39  ;;  %v4326_v27 = vadd.f32 %v4322_v21, %v4313_v25 }
 0xb38   : > { %4327 = vst [vmem:[%s6009_s25] sm:$0xff] %v4325_v26  ;;  %4328 = vst [vmem:[%s6009_s25 + $0x8] sm:$0xff] %v4326_v27 }
 0xb39 PF: > { %p4985_p10 = scmp.eq.s32.totalorder %s5769_s18, 3 }
 0xb3b   : > { %4332 = sbr.rel (%p4985_p10) target bundleno = 2881 (0xb41), region = 112 }
 0xb40   : > { %4333 = vst [vmem:[%s6009_s25] sm:$0xff] %v4277_v59  ;;  %4334 = vst [vmem:[%s6009_s25 + $0x8] sm:$0xff] %v4278_v63 }
 0xb41 PF: > { %s6670_s11 = sld [smem:[#allocation16_spill]]  ;;  %s6672_s18 = smov %s5777_s20 }
 0xb42   : > { %s6671_s30 = sld [smem:[#allocation17_spill]]  ;;  %s6673_s19 = smov %s5781_s21 }
 0xb43   : > { %s6674_s20 = smov %s6678_s22 }
 0xb47   : > { %s29_s27 = sadd.s32 1, %s6670_s11  }
 0xb48   : > { %p26_p9 = scmp.ge.s32.totalorder %s29_s27, 10   ;;  %s6675_s21 = smov %s6671_s30 }
 0xb49   : > { %s6676_s22 = smov %s29_s27 }
 0xb4a   :  { %28 = sbr.rel (!%p26_p9) target bundleno = 12 (0xc), region = 168 }
 0xb4f   :  { %4356 = vsyncpa [#allocation3], 1 }
 0xb50   :  { %4358 = vsyncpa [#allocation3 + $0x1], 1 }
 0xb51   :  { %4359 = vsyncpa [#allocation5], 1 }
 0xb52   :  { %4360 = vsyncpa [#allocation8], 1 }
 0xb53   :  { %4361 = vsyncpa [#allocation11], 1 }

</bundles_post_ra>
